<compile_context>
chip_gen: v7x
topology: tpu7x:2x2x1
jax: 0.10.0
libtpu: 0.0.40
codegen_flags: <defaults>
</compile_context>

<pallas_src>
import numpy as np
import jax
import jax.numpy as jnp
from jax.experimental import pallas as pl
from jax.experimental.pallas import tpu as pltpu

# ---- model hyperparameters (match the PyTorch module defaults) ----
INPUT_DIM = 1
D_MODEL = 64
N_HEADS = 4
NUM_LAYERS = 2
DIM_FF = 2048          # nn.TransformerEncoderLayer default dim_feedforward
LN_EPS = 1e-5
HEAD_DIM = D_MODEL // N_HEADS

# ---- small example shapes ----
BATCH = 2
SEQ = 8

# ---- packed per-layer vector layout (128-lane aligned segments) ----
OFF_BQKV = 0                     # (3*D_MODEL = 192) -> padded to 256
OFF_BO   = 256                   # (D_MODEL)         -> padded to 128
OFF_G1   = 384
OFF_BE1  = 512
OFF_B1   = 640                   # (DIM_FF = 2048)
OFF_B2   = 640 + DIM_FF          # 2688
OFF_G2   = OFF_B2 + 128          # 2816
OFF_BE2  = OFF_G2 + 128          # 2944
VEC_PACK = OFF_BE2 + 128         # 3072

# sublane-aligned row offset of the (PE + input bias) block inside inp_pack
PE_ROW_OFF = ((INPUT_DIM + 7) // 8) * 8


# ---------------------------------------------------------------------------
# Fused kernel: input projection + PE + NUM_LAYERS post-norm encoder layers.
# Single invocation (grid collapsed); all weights live in VMEM for the whole
# forward; every matmul except the per-batch attention block runs on the full
# (B*S, D) slab.
# ---------------------------------------------------------------------------
def _make_kernel(B, S):
    BS = B * S
    D = D_MODEL
    hd = HEAD_DIM
    scale = 1.0 / float(np.sqrt(hd))

    def kernel(x_ref, inp_ref, wqkv_ref, wo_ref, w1_ref, w2_ref, vec_ref,
               o_ref):
        x = x_ref[...]                                   # (B*S, INPUT_DIM)
        w_in = inp_ref[0:INPUT_DIM, :]                   # (INPUT_DIM, D)
        pe_b = inp_ref[PE_ROW_OFF:PE_ROW_OFF + BS, :]    # (B*S, D) PE + b_in

        if INPUT_DIM == 1:
            # K=1 matmul -> pure VPU broadcast (outer product), no MXU pass.
            h = x * w_in + pe_b
        else:
            h = jnp.dot(x, w_in, preferred_element_type=jnp.float32) + pe_b
        # TODO(synk): dropout after the positional encoding / inside the
        # encoder layers is a no-op in eval mode, so it is omitted.

        # Per-head lane masks over the D model lanes (isolate head h's lanes).
        lane_d = jax.lax.broadcasted_iota(jnp.int32, (1, D), 1)
        head_masks = [
            jnp.logical_and(lane_d >= hidx * hd, lane_d < (hidx + 1) * hd)
            .astype(jnp.float32)
            for hidx in range(N_HEADS)
        ]
        # Per-head segment masks over the (H*S)-lane stacked score axis.
        lane_hs = jax.lax.broadcasted_iota(jnp.int32, (1, N_HEADS * S), 1)
        seg_b = [jnp.logical_and(lane_hs >= hidx * S, lane_hs < (hidx + 1) * S)
                 for hidx in range(N_HEADS)]
        seg_f = [m.astype(jnp.float32) for m in seg_b]

        for l in range(NUM_LAYERS):
            # packed per-layer vectors, loaded segment-wise (static slices)
            bqkv = vec_ref[l:l + 1, OFF_BQKV:OFF_BQKV + 3 * D]
            bo   = vec_ref[l:l + 1, OFF_BO:OFF_BO + D]
            g1   = vec_ref[l:l + 1, OFF_G1:OFF_G1 + D]
            be1  = vec_ref[l:l + 1, OFF_BE1:OFF_BE1 + D]
            b1   = vec_ref[l:l + 1, OFF_B1:OFF_B1 + DIM_FF]
            b2   = vec_ref[l:l + 1, OFF_B2:OFF_B2 + D]
            g2   = vec_ref[l:l + 1, OFF_G2:OFF_G2 + D]
            be2  = vec_ref[l:l + 1, OFF_BE2:OFF_BE2 + D]

            # ---- multi-head self-attention (bf16 inputs, f32 accumulate) ----
            qkv = jnp.dot(h.astype(jnp.bfloat16), wqkv_ref[l],
                          preferred_element_type=jnp.float32) + bqkv  # (BS,3D)
            q = qkv[:, :D]
            k = qkv[:, D:2 * D]
            v = qkv[:, 2 * D:]

            ctx_parts = []
            for b in range(B):
                q_b = q[b * S:(b + 1) * S, :]
                k_b = k[b * S:(b + 1) * S, :]
                v_b = v[b * S:(b + 1) * S, :]
                # Stack heads along sublanes; rows [h*S, (h+1)*S) carry only
                # head h's lanes.
                k_stack = jnp.concatenate([k_b * m for m in head_masks],
                                          axis=0)            # (H*S, D)
                v_stack = jnp.concatenate([v_b * m for m in head_masks],
                                          axis=0)            # (H*S, D)

                # All head scores in ONE MXU push; contraction over dim 1 of
                # both operands folds the transpose (no explicit k.T).
                s = jax.lax.dot_general(
                    q_b.astype(jnp.bfloat16), k_stack.astype(jnp.bfloat16),
                    dimension_numbers=(((1,), (1,)), ((), ())),
                    preferred_element_type=jnp.float32) * scale  # (S, H*S)

                # Segment-wise softmax: one S-lane segment per head.
                max_full = jnp.zeros_like(s)
                for mb, mf in zip(seg_b, seg_f):
                    mx = jnp.max(jnp.where(mb, s, jnp.float32(-1e30)),
                                 axis=-1, keepdims=True)
                    max_full = max_full + mx * mf
                p = jnp.exp(s - max_full)
                inv_full = jnp.zeros_like(s)
                for mf in seg_f:
                    den = jnp.sum(p * mf, axis=-1, keepdims=True)
                    inv_full = inv_full + pl.reciprocal(den, approx=True) * mf
                p = p * inv_full

                # All head outputs in ONE MXU push; each head writes only its
                # own lanes because v_stack rows are lane-masked.
                ctx_parts.append(
                    jnp.dot(p.astype(jnp.bfloat16),
                            v_stack.astype(jnp.bfloat16),
                            preferred_element_type=jnp.float32))   # (S, D)
            ctx = jnp.concatenate(ctx_parts, axis=0)               # (BS, D)

            attn = jnp.dot(ctx.astype(jnp.bfloat16), wo_ref[l],
                           preferred_element_type=jnp.float32) + bo

            # ---- residual + LayerNorm 1 (post-norm) ----
            y = h + attn
            mu = jnp.mean(y, axis=-1, keepdims=True)
            var = jnp.mean((y - mu) ** 2, axis=-1, keepdims=True)
            y = (y - mu) * jax.lax.rsqrt(var + LN_EPS) * g1 + be1

            # ---- feed-forward: relu(y @ W1) @ W2 ----
            h1 = jnp.dot(y.astype(jnp.bfloat16), w1_ref[l],
                         preferred_element_type=jnp.float32) + b1
            h1 = jnp.maximum(h1, 0.0)
            h2 = jnp.dot(h1.astype(jnp.bfloat16), w2_ref[l],
                         preferred_element_type=jnp.float32) + b2

            # ---- residual + LayerNorm 2 ----
            z = y + h2
            mu2 = jnp.mean(z, axis=-1, keepdims=True)
            var2 = jnp.mean((z - mu2) ** 2, axis=-1, keepdims=True)
            h = (z - mu2) * jax.lax.rsqrt(var2 + LN_EPS) * g2 + be2

        o_ref[...] = h.astype(o_ref.dtype)

    return kernel


def transformer_encoder_forward(x, fused):
    B, S, _ = x.shape
    x_flat = x.reshape(B * S, INPUT_DIM)
    vmem_spec = pl.BlockSpec(memory_space=pltpu.MemorySpace.VMEM)
    out = pl.pallas_call(
        _make_kernel(B, S),
        out_shape=jax.ShapeDtypeStruct((B * S, D_MODEL), jnp.float32),
        in_specs=[vmem_spec] * 7,
        out_specs=vmem_spec,
    )(x_flat, fused["inp_pack"], fused["wqkv"], fused["wo"],
      fused["w1"], fused["w2"], fused["vecs"])
    return out.reshape(B, S, D_MODEL)


# ---------------------------------------------------------------------------
# Parameter construction / packing (deterministic, synthetic)
# ---------------------------------------------------------------------------
def make_positional_encoding(max_len, d_model):
    position = np.arange(0, max_len, dtype=np.float32)[:, None]
    div_term = np.exp(np.arange(0, d_model, 2, dtype=np.float32)
                      * (-np.log(10000.0) / d_model))
    pe = np.zeros((max_len, d_model), dtype=np.float32)
    pe[:, 0::2] = np.sin(position * div_term)
    pe[:, 1::2] = np.cos(position * div_term)
    return jnp.asarray(pe)


def init_params(key):
    def rnd(key, shape, scale=0.05):
        return (scale * jax.random.normal(key, shape)).astype(jnp.float32)

    keys = jax.random.split(key, 2 + NUM_LAYERS * 6)
    p = {}
    p["w_in_t"] = rnd(keys[0], (INPUT_DIM, D_MODEL))   # input_proj.weight.T
    p["b_in"] = rnd(keys[1], (1, D_MODEL))

    layers = []
    for l in range(NUM_LAYERS):
        k = keys[2 + l * 6: 2 + (l + 1) * 6]
        layers.append({
            "wqkv_t": rnd(k[0], (D_MODEL, 3 * D_MODEL)),   # in_proj_weight.T
            "bqkv":   rnd(k[1], (1, 3 * D_MODEL)),
            "wo_t":   rnd(k[2], (D_MODEL, D_MODEL)),       # out_proj.weight.T
            "bo":     rnd(k[3], (1, D_MODEL)),
            "w1_t":   rnd(k[4], (D_MODEL, DIM_FF)),        # linear1.weight.T
            "b1":     jnp.zeros((1, DIM_FF), jnp.float32),
            "w2_t":   rnd(k[5], (DIM_FF, D_MODEL)),        # linear2.weight.T
            "b2":     jnp.zeros((1, D_MODEL), jnp.float32),
            "ln1_g":  jnp.ones((1, D_MODEL), jnp.float32),
            "ln1_b":  jnp.zeros((1, D_MODEL), jnp.float32),
            "ln2_g":  jnp.ones((1, D_MODEL), jnp.float32),
            "ln2_b":  jnp.zeros((1, D_MODEL), jnp.float32),
        })
    p["layers"] = layers
    return p


def pack_params(params, pe, seq_len, batch):
    """Stack per-layer weights (bf16) and coalesce all small vectors."""
    # input projection weight row + (PE + input bias), tiled over the batch
    inp = jnp.zeros((PE_ROW_OFF + batch * seq_len, D_MODEL), jnp.float32)
    inp = inp.at[:INPUT_DIM].set(params["w_in_t"])
    pe_bias = pe[:seq_len] + params["b_in"]
    inp = inp.at[PE_ROW_OFF:].set(jnp.tile(pe_bias, (batch, 1)))

    def seg(v, width):
        v = jnp.reshape(v, (-1,)).astype(jnp.float32)
        return jnp.pad(v, (0, width - v.shape[0]))

    def pack_vec(lp):
        return jnp.concatenate([
            seg(lp["bqkv"],  OFF_BO - OFF_BQKV),
            seg(lp["bo"],    OFF_G1 - OFF_BO),
            seg(lp["ln1_g"], OFF_BE1 - OFF_G1),
            seg(lp["ln1_b"], OFF_B1 - OFF_BE1),
            seg(lp["b1"],    OFF_B2 - OFF_B1),
            seg(lp["b2"],    OFF_G2 - OFF_B2),
            seg(lp["ln2_g"], OFF_BE2 - OFF_G2),
            seg(lp["ln2_b"], VEC_PACK - OFF_BE2),
        ])

    layers = params["layers"]
    return {
        "inp_pack": inp,
        "wqkv": jnp.stack([l["wqkv_t"] for l in layers]).astype(jnp.bfloat16),
        "wo":   jnp.stack([l["wo_t"] for l in layers]).astype(jnp.bfloat16),
        "w1":   jnp.stack([l["w1_t"] for l in layers]).astype(jnp.bfloat16),
        "w2":   jnp.stack([l["w2_t"] for l in layers]).astype(jnp.bfloat16),
        "vecs": jnp.stack([pack_vec(l) for l in layers]),
    }


# ---------------------------------------------------------------------------
# Pure-JAX f32 reference (matches PyTorch post-norm encoder semantics)
# ---------------------------------------------------------------------------
def _layer_norm(x, g, b):
    mu = jnp.mean(x, axis=-1, keepdims=True)
    var = jnp.mean((x - mu) ** 2, axis=-1, keepdims=True)
    return (x - mu) * jax.lax.rsqrt(var + LN_EPS) * g + b


def reference_forward(x, params, pe):
    B, S, _ = x.shape
    h = jnp.einsum("bsi,id->bsd", x, params["w_in_t"]) + params["b_in"] + pe[:S]
    for lp in params["layers"]:
        qkv = jnp.einsum("bsd,de->bse", h, lp["wqkv_t"]) + lp["bqkv"]
        q, k, v = jnp.split(qkv, 3, axis=-1)
        q = q.reshape(B, S, N_HEADS, HEAD_DIM)
        k = k.reshape(B, S, N_HEADS, HEAD_DIM)
        v = v.reshape(B, S, N_HEADS, HEAD_DIM)
        s = jnp.einsum("bqhd,bkhd->bhqk", q, k) / np.sqrt(HEAD_DIM)
        p = jax.nn.softmax(s, axis=-1)
        ctx = jnp.einsum("bhqk,bkhd->bqhd", p, v).reshape(B, S, D_MODEL)
        attn = jnp.einsum("bsd,de->bse", ctx, lp["wo_t"]) + lp["bo"]
        y = _layer_norm(h + attn, lp["ln1_g"], lp["ln1_b"])
        ff = jnp.maximum(jnp.einsum("bsd,df->bsf", y, lp["w1_t"]) + lp["b1"], 0.0)
        ff = jnp.einsum("bsf,fd->bsd", ff, lp["w2_t"]) + lp["b2"]
        h = _layer_norm(y + ff, lp["ln2_g"], lp["ln2_b"])
    return h


if __name__ == "__main__":
    key = jax.random.PRNGKey(0)
    pkey, xkey = jax.random.split(key)

    params = init_params(pkey)
    pe = make_positional_encoding(500, D_MODEL)
    x = jax.random.normal(xkey, (BATCH, SEQ, INPUT_DIM), dtype=jnp.float32)

    fused = pack_params(params, pe, SEQ, BATCH)
    out = transformer_encoder_forward(x, fused)
    out = jax.block_until_ready(out)

    assert out.shape == (BATCH, SEQ, D_MODEL), out.shape
    assert bool(jnp.all(jnp.isfinite(out)))

    # correctness check vs pure-JAX f32 reference (tolerance covers the
    # intentional bf16 quantization of weights / attention operands and the
    # approx reciprocal in the softmax)
    ref = reference_forward(x, params, pe)
    max_err = float(jnp.max(jnp.abs(out - ref)))
    assert max_err < 0.25, max_err

    print("KERNEL_OK")
</pallas_src>

<mosaic_0001>
module attributes {stable_mosaic.version = 11 : i64} {
  func.func @kernel(%arg0: memref<16x1xf32, #tpu.memory_space<vmem>>, %arg1: memref<24x64xf32, #tpu.memory_space<vmem>>, %arg2: memref<2x64x192xbf16, #tpu.memory_space<vmem>>, %arg3: memref<2x64x64xbf16, #tpu.memory_space<vmem>>, %arg4: memref<2x64x2048xbf16, #tpu.memory_space<vmem>>, %arg5: memref<2x2048x64xbf16, #tpu.memory_space<vmem>>, %arg6: memref<2x3072xf32, #tpu.memory_space<vmem>>, %arg7: memref<16x64xf32, #tpu.memory_space<vmem>>) attributes {dimension_semantics = [], scalar_prefetch = 0 : i64, scratch_operands = 0 : i64, tpu.core_type = #tpu.core_type<tc>} {
    %c0 = arith.constant 0 : index
    %c0_0 = arith.constant 0 : index
    %0 = vector.load %arg0[%c0, %c0_0] : memref<16x1xf32, #tpu.memory_space<vmem>>, vector<16x1xf32>
    %c0_1 = arith.constant 0 : index
    %c0_2 = arith.constant 0 : index
    %1 = vector.load %arg1[%c0_1, %c0_2] : memref<24x64xf32, #tpu.memory_space<vmem>>, vector<1x64xf32>
    %c8 = arith.constant 8 : index
    %c0_3 = arith.constant 0 : index
    %2 = vector.load %arg1[%c8, %c0_3] : memref<24x64xf32, #tpu.memory_space<vmem>>, vector<16x64xf32>
    %3 = vector.broadcast %0 : vector<16x1xf32> to vector<16x64xf32>
    %4 = vector.broadcast %1 : vector<1x64xf32> to vector<16x64xf32>
    %5 = arith.mulf %3, %4 : vector<16x64xf32>
    %6 = arith.addf %5, %2 : vector<16x64xf32>
    %7 = tpu.iota {dimensions = array<i32: 1>} : vector<1x64xi32>
    %c0_i32 = arith.constant 0 : i32
    %8 = vector.broadcast %c0_i32 : i32 to vector<1x64xi32>
    %9 = arith.cmpi sge, %7, %8 : vector<1x64xi32>
    %c16_i32 = arith.constant 16 : i32
    %10 = vector.broadcast %c16_i32 : i32 to vector<1x64xi32>
    %11 = arith.cmpi slt, %7, %10 : vector<1x64xi32>
    %12 = arith.andi %9, %11 : vector<1x64xi1>
    %13 = arith.extui %12 : vector<1x64xi1> to vector<1x64xi32>
    %14 = arith.sitofp %13 : vector<1x64xi32> to vector<1x64xf32>
    %c16_i32_4 = arith.constant 16 : i32
    %15 = vector.broadcast %c16_i32_4 : i32 to vector<1x64xi32>
    %16 = arith.cmpi sge, %7, %15 : vector<1x64xi32>
    %c32_i32 = arith.constant 32 : i32
    %17 = vector.broadcast %c32_i32 : i32 to vector<1x64xi32>
    %18 = arith.cmpi slt, %7, %17 : vector<1x64xi32>
    %19 = arith.andi %16, %18 : vector<1x64xi1>
    %20 = arith.extui %19 : vector<1x64xi1> to vector<1x64xi32>
    %21 = arith.sitofp %20 : vector<1x64xi32> to vector<1x64xf32>
    %c32_i32_5 = arith.constant 32 : i32
    %22 = vector.broadcast %c32_i32_5 : i32 to vector<1x64xi32>
    %23 = arith.cmpi sge, %7, %22 : vector<1x64xi32>
    %c48_i32 = arith.constant 48 : i32
    %24 = vector.broadcast %c48_i32 : i32 to vector<1x64xi32>
    %25 = arith.cmpi slt, %7, %24 : vector<1x64xi32>
    %26 = arith.andi %23, %25 : vector<1x64xi1>
    %27 = arith.extui %26 : vector<1x64xi1> to vector<1x64xi32>
    %28 = arith.sitofp %27 : vector<1x64xi32> to vector<1x64xf32>
    %c48_i32_6 = arith.constant 48 : i32
    %29 = vector.broadcast %c48_i32_6 : i32 to vector<1x64xi32>
    %30 = arith.cmpi sge, %7, %29 : vector<1x64xi32>
    %c64_i32 = arith.constant 64 : i32
    %31 = vector.broadcast %c64_i32 : i32 to vector<1x64xi32>
    %32 = arith.cmpi slt, %7, %31 : vector<1x64xi32>
    %33 = arith.andi %30, %32 : vector<1x64xi1>
    %34 = arith.extui %33 : vector<1x64xi1> to vector<1x64xi32>
    %35 = arith.sitofp %34 : vector<1x64xi32> to vector<1x64xf32>
    %36 = tpu.iota {dimensions = array<i32: 1>} : vector<1x32xi32>
    %c0_i32_7 = arith.constant 0 : i32
    %37 = vector.broadcast %c0_i32_7 : i32 to vector<1x32xi32>
    %38 = arith.cmpi sge, %36, %37 : vector<1x32xi32>
    %c8_i32 = arith.constant 8 : i32
    %39 = vector.broadcast %c8_i32 : i32 to vector<1x32xi32>
    %40 = arith.cmpi slt, %36, %39 : vector<1x32xi32>
    %41 = arith.andi %38, %40 : vector<1x32xi1>
    %c8_i32_8 = arith.constant 8 : i32
    %42 = vector.broadcast %c8_i32_8 : i32 to vector<1x32xi32>
    %43 = arith.cmpi sge, %36, %42 : vector<1x32xi32>
    %c16_i32_9 = arith.constant 16 : i32
    %44 = vector.broadcast %c16_i32_9 : i32 to vector<1x32xi32>
    %45 = arith.cmpi slt, %36, %44 : vector<1x32xi32>
    %46 = arith.andi %43, %45 : vector<1x32xi1>
    %c16_i32_10 = arith.constant 16 : i32
    %47 = vector.broadcast %c16_i32_10 : i32 to vector<1x32xi32>
    %48 = arith.cmpi sge, %36, %47 : vector<1x32xi32>
    %c24_i32 = arith.constant 24 : i32
    %49 = vector.broadcast %c24_i32 : i32 to vector<1x32xi32>
    %50 = arith.cmpi slt, %36, %49 : vector<1x32xi32>
    %51 = arith.andi %48, %50 : vector<1x32xi1>
    %c24_i32_11 = arith.constant 24 : i32
    %52 = vector.broadcast %c24_i32_11 : i32 to vector<1x32xi32>
    %53 = arith.cmpi sge, %36, %52 : vector<1x32xi32>
    %c32_i32_12 = arith.constant 32 : i32
    %54 = vector.broadcast %c32_i32_12 : i32 to vector<1x32xi32>
    %55 = arith.cmpi slt, %36, %54 : vector<1x32xi32>
    %56 = arith.andi %53, %55 : vector<1x32xi1>
    %57 = arith.extui %41 : vector<1x32xi1> to vector<1x32xi32>
    %58 = arith.sitofp %57 : vector<1x32xi32> to vector<1x32xf32>
    %59 = arith.extui %46 : vector<1x32xi1> to vector<1x32xi32>
    %60 = arith.sitofp %59 : vector<1x32xi32> to vector<1x32xf32>
    %61 = arith.extui %51 : vector<1x32xi1> to vector<1x32xi32>
    %62 = arith.sitofp %61 : vector<1x32xi32> to vector<1x32xf32>
    %63 = arith.extui %56 : vector<1x32xi1> to vector<1x32xi32>
    %64 = arith.sitofp %63 : vector<1x32xi32> to vector<1x32xf32>
    %c0_13 = arith.constant 0 : index
    %c0_14 = arith.constant 0 : index
    %65 = vector.load %arg6[%c0_13, %c0_14] : memref<2x3072xf32, #tpu.memory_space<vmem>>, vector<1x192xf32>
    %c0_15 = arith.constant 0 : index
    %c256 = arith.constant 256 : index
    %66 = vector.load %arg6[%c0_15, %c256] : memref<2x3072xf32, #tpu.memory_space<vmem>>, vector<1x64xf32>
    %c0_16 = arith.constant 0 : index
    %c384 = arith.constant 384 : index
    %67 = vector.load %arg6[%c0_16, %c384] : memref<2x3072xf32, #tpu.memory_space<vmem>>, vector<1x64xf32>
    %c0_17 = arith.constant 0 : index
    %c512 = arith.constant 512 : index
    %68 = vector.load %arg6[%c0_17, %c512] : memref<2x3072xf32, #tpu.memory_space<vmem>>, vector<1x64xf32>
    %c0_18 = arith.constant 0 : index
    %c640 = arith.constant 640 : index
    %69 = vector.load %arg6[%c0_18, %c640] : memref<2x3072xf32, #tpu.memory_space<vmem>>, vector<1x2048xf32>
    %c0_19 = arith.constant 0 : index
    %c2688 = arith.constant 2688 : index
    %70 = vector.load %arg6[%c0_19, %c2688] : memref<2x3072xf32, #tpu.memory_space<vmem>>, vector<1x64xf32>
    %c0_20 = arith.constant 0 : index
    %c2816 = arith.constant 2816 : index
    %71 = vector.load %arg6[%c0_20, %c2816] : memref<2x3072xf32, #tpu.memory_space<vmem>>, vector<1x64xf32>
    %c0_21 = arith.constant 0 : index
    %c2944 = arith.constant 2944 : index
    %72 = vector.load %arg6[%c0_21, %c2944] : memref<2x3072xf32, #tpu.memory_space<vmem>>, vector<1x64xf32>
    %73 = arith.truncf %6 : vector<16x64xf32> to vector<16x64xbf16>
    %c0_22 = arith.constant 0 : index
    %c0_23 = arith.constant 0 : index
    %c0_24 = arith.constant 0 : index
    %74 = vector.load %arg2[%c0_22, %c0_23, %c0_24] : memref<2x64x192xbf16, #tpu.memory_space<vmem>>, vector<1x64x192xbf16>
    %75 = vector.shape_cast %74 : vector<1x64x192xbf16> to vector<64x192xbf16>
    %cst = arith.constant dense<0.000000e+00> : vector<16x192xf32>
    %76 = tpu.matmul %73, %75, %cst {dimension_numbers = #tpu.dot_dimension_numbers<[1], [0], [0], [1], [0, 0, 1, 1], [], []>} : vector<16x64xbf16>, vector<64x192xbf16>, vector<16x192xf32> -> vector<16x192xf32>
    %77 = vector.broadcast %65 : vector<1x192xf32> to vector<16x192xf32>
    %78 = arith.addf %76, %77 : vector<16x192xf32>
    %79 = vector.extract_strided_slice %78 {offsets = [0, 0], sizes = [16, 64], strides = [1, 1]} : vector<16x192xf32> to vector<16x64xf32>
    %80 = vector.extract_strided_slice %78 {offsets = [0, 64], sizes = [16, 64], strides = [1, 1]} : vector<16x192xf32> to vector<16x64xf32>
    %81 = vector.extract_strided_slice %78 {offsets = [0, 128], sizes = [16, 64], strides = [1, 1]} : vector<16x192xf32> to vector<16x64xf32>
    %82 = vector.extract_strided_slice %79 {offsets = [0, 0], sizes = [8, 64], strides = [1, 1]} : vector<16x64xf32> to vector<8x64xf32>
    %83 = vector.extract_strided_slice %80 {offsets = [0, 0], sizes = [8, 64], strides = [1, 1]} : vector<16x64xf32> to vector<8x64xf32>
    %84 = vector.extract_strided_slice %81 {offsets = [0, 0], sizes = [8, 64], strides = [1, 1]} : vector<16x64xf32> to vector<8x64xf32>
    %85 = vector.broadcast %14 : vector<1x64xf32> to vector<8x64xf32>
    %86 = arith.mulf %83, %85 : vector<8x64xf32>
    %87 = vector.broadcast %21 : vector<1x64xf32> to vector<8x64xf32>
    %88 = arith.mulf %83, %87 : vector<8x64xf32>
    %89 = vector.broadcast %28 : vector<1x64xf32> to vector<8x64xf32>
    %90 = arith.mulf %83, %89 : vector<8x64xf32>
    %91 = vector.broadcast %35 : vector<1x64xf32> to vector<8x64xf32>
    %92 = arith.mulf %83, %91 : vector<8x64xf32>
    %93 = tpu.concatenate %86, %88, %90, %92 in 0 : vector<8x64xf32>, vector<8x64xf32>, vector<8x64xf32>, vector<8x64xf32> -> vector<32x64xf32>
    %94 = vector.broadcast %14 : vector<1x64xf32> to vector<8x64xf32>
    %95 = arith.mulf %84, %94 : vector<8x64xf32>
    %96 = vector.broadcast %21 : vector<1x64xf32> to vector<8x64xf32>
    %97 = arith.mulf %84, %96 : vector<8x64xf32>
    %98 = vector.broadcast %28 : vector<1x64xf32> to vector<8x64xf32>
    %99 = arith.mulf %84, %98 : vector<8x64xf32>
    %100 = vector.broadcast %35 : vector<1x64xf32> to vector<8x64xf32>
    %101 = arith.mulf %84, %100 : vector<8x64xf32>
    %102 = tpu.concatenate %95, %97, %99, %101 in 0 : vector<8x64xf32>, vector<8x64xf32>, vector<8x64xf32>, vector<8x64xf32> -> vector<32x64xf32>
    %103 = arith.truncf %82 : vector<8x64xf32> to vector<8x64xbf16>
    %104 = arith.truncf %93 : vector<32x64xf32> to vector<32x64xbf16>
    %cst_25 = arith.constant dense<0.000000e+00> : vector<8x32xf32>
    %105 = tpu.matmul %103, %104, %cst_25 {dimension_numbers = #tpu.dot_dimension_numbers<[1], [1], [0], [0], [0, 0, 1, 0], [], []>} : vector<8x64xbf16>, vector<32x64xbf16>, vector<8x32xf32> -> vector<8x32xf32>
    %cst_26 = arith.constant 2.500000e-01 : f32
    %106 = vector.broadcast %cst_26 : f32 to vector<8x32xf32>
    %107 = arith.mulf %105, %106 : vector<8x32xf32>
    %cst_27 = arith.constant 0.000000e+00 : f32
    %108 = vector.broadcast %cst_27 : f32 to vector<8x32xf32>
    %cst_28 = arith.constant -1.000000e+30 : f32
    %109 = vector.shape_cast %41 : vector<1x32xi1> to vector<1x32xi1>
    %110 = vector.broadcast %109 : vector<1x32xi1> to vector<8x32xi1>
    %111 = vector.broadcast %cst_28 : f32 to vector<8x32xf32>
    %112 = arith.select %110, %107, %111 : vector<8x32xi1>, vector<8x32xf32>
    %cst_29 = arith.constant dense<0xFF800000> : vector<8xf32>
    %113 = vector.multi_reduction <maximumf>, %112, %cst_29 [1] : vector<8x32xf32> to vector<8xf32>
    %114 = vector.shape_cast %113 : vector<8xf32> to vector<8x1xf32>
    %115 = vector.broadcast %114 : vector<8x1xf32> to vector<8x32xf32>
    %116 = vector.broadcast %58 : vector<1x32xf32> to vector<8x32xf32>
    %117 = arith.mulf %115, %116 : vector<8x32xf32>
    %118 = arith.addf %108, %117 : vector<8x32xf32>
    %cst_30 = arith.constant -1.000000e+30 : f32
    %119 = vector.shape_cast %46 : vector<1x32xi1> to vector<1x32xi1>
    %120 = vector.broadcast %119 : vector<1x32xi1> to vector<8x32xi1>
    %121 = vector.broadcast %cst_30 : f32 to vector<8x32xf32>
    %122 = arith.select %120, %107, %121 : vector<8x32xi1>, vector<8x32xf32>
    %cst_31 = arith.constant dense<0xFF800000> : vector<8xf32>
    %123 = vector.multi_reduction <maximumf>, %122, %cst_31 [1] : vector<8x32xf32> to vector<8xf32>
    %124 = vector.shape_cast %123 : vector<8xf32> to vector<8x1xf32>
    %125 = vector.broadcast %124 : vector<8x1xf32> to vector<8x32xf32>
    %126 = vector.broadcast %60 : vector<1x32xf32> to vector<8x32xf32>
    %127 = arith.mulf %125, %126 : vector<8x32xf32>
    %128 = arith.addf %118, %127 : vector<8x32xf32>
    %cst_32 = arith.constant -1.000000e+30 : f32
    %129 = vector.shape_cast %51 : vector<1x32xi1> to vector<1x32xi1>
    %130 = vector.broadcast %129 : vector<1x32xi1> to vector<8x32xi1>
    %131 = vector.broadcast %cst_32 : f32 to vector<8x32xf32>
    %132 = arith.select %130, %107, %131 : vector<8x32xi1>, vector<8x32xf32>
    %cst_33 = arith.constant dense<0xFF800000> : vector<8xf32>
    %133 = vector.multi_reduction <maximumf>, %132, %cst_33 [1] : vector<8x32xf32> to vector<8xf32>
    %134 = vector.shape_cast %133 : vector<8xf32> to vector<8x1xf32>
    %135 = vector.broadcast %134 : vector<8x1xf32> to vector<8x32xf32>
    %136 = vector.broadcast %62 : vector<1x32xf32> to vector<8x32xf32>
    %137 = arith.mulf %135, %136 : vector<8x32xf32>
    %138 = arith.addf %128, %137 : vector<8x32xf32>
    %cst_34 = arith.constant -1.000000e+30 : f32
    %139 = vector.shape_cast %56 : vector<1x32xi1> to vector<1x32xi1>
    %140 = vector.broadcast %139 : vector<1x32xi1> to vector<8x32xi1>
    %141 = vector.broadcast %cst_34 : f32 to vector<8x32xf32>
    %142 = arith.select %140, %107, %141 : vector<8x32xi1>, vector<8x32xf32>
    %cst_35 = arith.constant dense<0xFF800000> : vector<8xf32>
    %143 = vector.multi_reduction <maximumf>, %142, %cst_35 [1] : vector<8x32xf32> to vector<8xf32>
    %144 = vector.shape_cast %143 : vector<8xf32> to vector<8x1xf32>
    %145 = vector.broadcast %144 : vector<8x1xf32> to vector<8x32xf32>
    %146 = vector.broadcast %64 : vector<1x32xf32> to vector<8x32xf32>
    %147 = arith.mulf %145, %146 : vector<8x32xf32>
    %148 = arith.addf %138, %147 : vector<8x32xf32>
    %149 = arith.subf %107, %148 : vector<8x32xf32>
    %150 = math.exp %149 : vector<8x32xf32>
    %cst_36 = arith.constant 0.000000e+00 : f32
    %151 = vector.broadcast %cst_36 : f32 to vector<8x32xf32>
    %152 = vector.broadcast %58 : vector<1x32xf32> to vector<8x32xf32>
    %153 = arith.mulf %150, %152 : vector<8x32xf32>
    %cst_37 = arith.constant dense<0.000000e+00> : vector<8xf32>
    %154 = vector.multi_reduction <add>, %153, %cst_37 [1] : vector<8x32xf32> to vector<8xf32>
    %155 = vector.shape_cast %154 : vector<8xf32> to vector<8x1xf32>
    %156 = tpu.reciprocal %155 {approx = true} : vector<8x1xf32> -> vector<8x1xf32>
    %157 = vector.broadcast %156 : vector<8x1xf32> to vector<8x32xf32>
    %158 = vector.broadcast %58 : vector<1x32xf32> to vector<8x32xf32>
    %159 = arith.mulf %157, %158 : vector<8x32xf32>
    %160 = arith.addf %151, %159 : vector<8x32xf32>
    %161 = vector.broadcast %60 : vector<1x32xf32> to vector<8x32xf32>
    %162 = arith.mulf %150, %161 : vector<8x32xf32>
    %cst_38 = arith.constant dense<0.000000e+00> : vector<8xf32>
    %163 = vector.multi_reduction <add>, %162, %cst_38 [1] : vector<8x32xf32> to vector<8xf32>
    %164 = vector.shape_cast %163 : vector<8xf32> to vector<8x1xf32>
    %165 = tpu.reciprocal %164 {approx = true} : vector<8x1xf32> -> vector<8x1xf32>
    %166 = vector.broadcast %165 : vector<8x1xf32> to vector<8x32xf32>
    %167 = vector.broadcast %60 : vector<1x32xf32> to vector<8x32xf32>
    %168 = arith.mulf %166, %167 : vector<8x32xf32>
    %169 = arith.addf %160, %168 : vector<8x32xf32>
    %170 = vector.broadcast %62 : vector<1x32xf32> to vector<8x32xf32>
    %171 = arith.mulf %150, %170 : vector<8x32xf32>
    %cst_39 = arith.constant dense<0.000000e+00> : vector<8xf32>
    %172 = vector.multi_reduction <add>, %171, %cst_39 [1] : vector<8x32xf32> to vector<8xf32>
    %173 = vector.shape_cast %172 : vector<8xf32> to vector<8x1xf32>
    %174 = tpu.reciprocal %173 {approx = true} : vector<8x1xf32> -> vector<8x1xf32>
    %175 = vector.broadcast %174 : vector<8x1xf32> to vector<8x32xf32>
    %176 = vector.broadcast %62 : vector<1x32xf32> to vector<8x32xf32>
    %177 = arith.mulf %175, %176 : vector<8x32xf32>
    %178 = arith.addf %169, %177 : vector<8x32xf32>
    %179 = vector.broadcast %64 : vector<1x32xf32> to vector<8x32xf32>
    %180 = arith.mulf %150, %179 : vector<8x32xf32>
    %cst_40 = arith.constant dense<0.000000e+00> : vector<8xf32>
    %181 = vector.multi_reduction <add>, %180, %cst_40 [1] : vector<8x32xf32> to vector<8xf32>
    %182 = vector.shape_cast %181 : vector<8xf32> to vector<8x1xf32>
    %183 = tpu.reciprocal %182 {approx = true} : vector<8x1xf32> -> vector<8x1xf32>
    %184 = vector.broadcast %183 : vector<8x1xf32> to vector<8x32xf32>
    %185 = vector.broadcast %64 : vector<1x32xf32> to vector<8x32xf32>
    %186 = arith.mulf %184, %185 : vector<8x32xf32>
    %187 = arith.addf %178, %186 : vector<8x32xf32>
    %188 = arith.mulf %150, %187 : vector<8x32xf32>
    %189 = arith.truncf %188 : vector<8x32xf32> to vector<8x32xbf16>
    %190 = arith.truncf %102 : vector<32x64xf32> to vector<32x64xbf16>
    %cst_41 = arith.constant dense<0.000000e+00> : vector<8x64xf32>
    %191 = tpu.matmul %189, %190, %cst_41 {dimension_numbers = #tpu.dot_dimension_numbers<[1], [0], [0], [1], [0, 0, 1, 1], [], []>} : vector<8x32xbf16>, vector<32x64xbf16>, vector<8x64xf32> -> vector<8x64xf32>
    %192 = vector.extract_strided_slice %79 {offsets = [8, 0], sizes = [8, 64], strides = [1, 1]} : vector<16x64xf32> to vector<8x64xf32>
    %193 = vector.extract_strided_slice %80 {offsets = [8, 0], sizes = [8, 64], strides = [1, 1]} : vector<16x64xf32> to vector<8x64xf32>
    %194 = vector.extract_strided_slice %81 {offsets = [8, 0], sizes = [8, 64], strides = [1, 1]} : vector<16x64xf32> to vector<8x64xf32>
    %195 = vector.broadcast %14 : vector<1x64xf32> to vector<8x64xf32>
    %196 = arith.mulf %193, %195 : vector<8x64xf32>
    %197 = vector.broadcast %21 : vector<1x64xf32> to vector<8x64xf32>
    %198 = arith.mulf %193, %197 : vector<8x64xf32>
    %199 = vector.broadcast %28 : vector<1x64xf32> to vector<8x64xf32>
    %200 = arith.mulf %193, %199 : vector<8x64xf32>
    %201 = vector.broadcast %35 : vector<1x64xf32> to vector<8x64xf32>
    %202 = arith.mulf %193, %201 : vector<8x64xf32>
    %203 = tpu.concatenate %196, %198, %200, %202 in 0 : vector<8x64xf32>, vector<8x64xf32>, vector<8x64xf32>, vector<8x64xf32> -> vector<32x64xf32>
    %204 = vector.broadcast %14 : vector<1x64xf32> to vector<8x64xf32>
    %205 = arith.mulf %194, %204 : vector<8x64xf32>
    %206 = vector.broadcast %21 : vector<1x64xf32> to vector<8x64xf32>
    %207 = arith.mulf %194, %206 : vector<8x64xf32>
    %208 = vector.broadcast %28 : vector<1x64xf32> to vector<8x64xf32>
    %209 = arith.mulf %194, %208 : vector<8x64xf32>
    %210 = vector.broadcast %35 : vector<1x64xf32> to vector<8x64xf32>
    %211 = arith.mulf %194, %210 : vector<8x64xf32>
    %212 = tpu.concatenate %205, %207, %209, %211 in 0 : vector<8x64xf32>, vector<8x64xf32>, vector<8x64xf32>, vector<8x64xf32> -> vector<32x64xf32>
    %213 = arith.truncf %192 : vector<8x64xf32> to vector<8x64xbf16>
    %214 = arith.truncf %203 : vector<32x64xf32> to vector<32x64xbf16>
    %cst_42 = arith.constant dense<0.000000e+00> : vector<8x32xf32>
    %215 = tpu.matmul %213, %214, %cst_42 {dimension_numbers = #tpu.dot_dimension_numbers<[1], [1], [0], [0], [0, 0, 1, 0], [], []>} : vector<8x64xbf16>, vector<32x64xbf16>, vector<8x32xf32> -> vector<8x32xf32>
    %cst_43 = arith.constant 2.500000e-01 : f32
    %216 = vector.broadcast %cst_43 : f32 to vector<8x32xf32>
    %217 = arith.mulf %215, %216 : vector<8x32xf32>
    %cst_44 = arith.constant 0.000000e+00 : f32
    %218 = vector.broadcast %cst_44 : f32 to vector<8x32xf32>
    %cst_45 = arith.constant -1.000000e+30 : f32
    %219 = vector.shape_cast %41 : vector<1x32xi1> to vector<1x32xi1>
    %220 = vector.broadcast %219 : vector<1x32xi1> to vector<8x32xi1>
    %221 = vector.broadcast %cst_45 : f32 to vector<8x32xf32>
    %222 = arith.select %220, %217, %221 : vector<8x32xi1>, vector<8x32xf32>
    %cst_46 = arith.constant dense<0xFF800000> : vector<8xf32>
    %223 = vector.multi_reduction <maximumf>, %222, %cst_46 [1] : vector<8x32xf32> to vector<8xf32>
    %224 = vector.shape_cast %223 : vector<8xf32> to vector<8x1xf32>
    %225 = vector.broadcast %224 : vector<8x1xf32> to vector<8x32xf32>
    %226 = vector.broadcast %58 : vector<1x32xf32> to vector<8x32xf32>
    %227 = arith.mulf %225, %226 : vector<8x32xf32>
    %228 = arith.addf %218, %227 : vector<8x32xf32>
    %cst_47 = arith.constant -1.000000e+30 : f32
    %229 = vector.shape_cast %46 : vector<1x32xi1> to vector<1x32xi1>
    %230 = vector.broadcast %229 : vector<1x32xi1> to vector<8x32xi1>
    %231 = vector.broadcast %cst_47 : f32 to vector<8x32xf32>
    %232 = arith.select %230, %217, %231 : vector<8x32xi1>, vector<8x32xf32>
    %cst_48 = arith.constant dense<0xFF800000> : vector<8xf32>
    %233 = vector.multi_reduction <maximumf>, %232, %cst_48 [1] : vector<8x32xf32> to vector<8xf32>
    %234 = vector.shape_cast %233 : vector<8xf32> to vector<8x1xf32>
    %235 = vector.broadcast %234 : vector<8x1xf32> to vector<8x32xf32>
    %236 = vector.broadcast %60 : vector<1x32xf32> to vector<8x32xf32>
    %237 = arith.mulf %235, %236 : vector<8x32xf32>
    %238 = arith.addf %228, %237 : vector<8x32xf32>
    %cst_49 = arith.constant -1.000000e+30 : f32
    %239 = vector.shape_cast %51 : vector<1x32xi1> to vector<1x32xi1>
    %240 = vector.broadcast %239 : vector<1x32xi1> to vector<8x32xi1>
    %241 = vector.broadcast %cst_49 : f32 to vector<8x32xf32>
    %242 = arith.select %240, %217, %241 : vector<8x32xi1>, vector<8x32xf32>
    %cst_50 = arith.constant dense<0xFF800000> : vector<8xf32>
    %243 = vector.multi_reduction <maximumf>, %242, %cst_50 [1] : vector<8x32xf32> to vector<8xf32>
    %244 = vector.shape_cast %243 : vector<8xf32> to vector<8x1xf32>
    %245 = vector.broadcast %244 : vector<8x1xf32> to vector<8x32xf32>
    %246 = vector.broadcast %62 : vector<1x32xf32> to vector<8x32xf32>
    %247 = arith.mulf %245, %246 : vector<8x32xf32>
    %248 = arith.addf %238, %247 : vector<8x32xf32>
    %cst_51 = arith.constant -1.000000e+30 : f32
    %249 = vector.shape_cast %56 : vector<1x32xi1> to vector<1x32xi1>
    %250 = vector.broadcast %249 : vector<1x32xi1> to vector<8x32xi1>
    %251 = vector.broadcast %cst_51 : f32 to vector<8x32xf32>
    %252 = arith.select %250, %217, %251 : vector<8x32xi1>, vector<8x32xf32>
    %cst_52 = arith.constant dense<0xFF800000> : vector<8xf32>
    %253 = vector.multi_reduction <maximumf>, %252, %cst_52 [1] : vector<8x32xf32> to vector<8xf32>
    %254 = vector.shape_cast %253 : vector<8xf32> to vector<8x1xf32>
    %255 = vector.broadcast %254 : vector<8x1xf32> to vector<8x32xf32>
    %256 = vector.broadcast %64 : vector<1x32xf32> to vector<8x32xf32>
    %257 = arith.mulf %255, %256 : vector<8x32xf32>
    %258 = arith.addf %248, %257 : vector<8x32xf32>
    %259 = arith.subf %217, %258 : vector<8x32xf32>
    %260 = math.exp %259 : vector<8x32xf32>
    %cst_53 = arith.constant 0.000000e+00 : f32
    %261 = vector.broadcast %cst_53 : f32 to vector<8x32xf32>
    %262 = vector.broadcast %58 : vector<1x32xf32> to vector<8x32xf32>
    %263 = arith.mulf %260, %262 : vector<8x32xf32>
    %cst_54 = arith.constant dense<0.000000e+00> : vector<8xf32>
    %264 = vector.multi_reduction <add>, %263, %cst_54 [1] : vector<8x32xf32> to vector<8xf32>
    %265 = vector.shape_cast %264 : vector<8xf32> to vector<8x1xf32>
    %266 = tpu.reciprocal %265 {approx = true} : vector<8x1xf32> -> vector<8x1xf32>
    %267 = vector.broadcast %266 : vector<8x1xf32> to vector<8x32xf32>
    %268 = vector.broadcast %58 : vector<1x32xf32> to vector<8x32xf32>
    %269 = arith.mulf %267, %268 : vector<8x32xf32>
    %270 = arith.addf %261, %269 : vector<8x32xf32>
    %271 = vector.broadcast %60 : vector<1x32xf32> to vector<8x32xf32>
    %272 = arith.mulf %260, %271 : vector<8x32xf32>
    %cst_55 = arith.constant dense<0.000000e+00> : vector<8xf32>
    %273 = vector.multi_reduction <add>, %272, %cst_55 [1] : vector<8x32xf32> to vector<8xf32>
    %274 = vector.shape_cast %273 : vector<8xf32> to vector<8x1xf32>
    %275 = tpu.reciprocal %274 {approx = true} : vector<8x1xf32> -> vector<8x1xf32>
    %276 = vector.broadcast %275 : vector<8x1xf32> to vector<8x32xf32>
    %277 = vector.broadcast %60 : vector<1x32xf32> to vector<8x32xf32>
    %278 = arith.mulf %276, %277 : vector<8x32xf32>
    %279 = arith.addf %270, %278 : vector<8x32xf32>
    %280 = vector.broadcast %62 : vector<1x32xf32> to vector<8x32xf32>
    %281 = arith.mulf %260, %280 : vector<8x32xf32>
    %cst_56 = arith.constant dense<0.000000e+00> : vector<8xf32>
    %282 = vector.multi_reduction <add>, %281, %cst_56 [1] : vector<8x32xf32> to vector<8xf32>
    %283 = vector.shape_cast %282 : vector<8xf32> to vector<8x1xf32>
    %284 = tpu.reciprocal %283 {approx = true} : vector<8x1xf32> -> vector<8x1xf32>
    %285 = vector.broadcast %284 : vector<8x1xf32> to vector<8x32xf32>
    %286 = vector.broadcast %62 : vector<1x32xf32> to vector<8x32xf32>
    %287 = arith.mulf %285, %286 : vector<8x32xf32>
    %288 = arith.addf %279, %287 : vector<8x32xf32>
    %289 = vector.broadcast %64 : vector<1x32xf32> to vector<8x32xf32>
    %290 = arith.mulf %260, %289 : vector<8x32xf32>
    %cst_57 = arith.constant dense<0.000000e+00> : vector<8xf32>
    %291 = vector.multi_reduction <add>, %290, %cst_57 [1] : vector<8x32xf32> to vector<8xf32>
    %292 = vector.shape_cast %291 : vector<8xf32> to vector<8x1xf32>
    %293 = tpu.reciprocal %292 {approx = true} : vector<8x1xf32> -> vector<8x1xf32>
    %294 = vector.broadcast %293 : vector<8x1xf32> to vector<8x32xf32>
    %295 = vector.broadcast %64 : vector<1x32xf32> to vector<8x32xf32>
    %296 = arith.mulf %294, %295 : vector<8x32xf32>
    %297 = arith.addf %288, %296 : vector<8x32xf32>
    %298 = arith.mulf %260, %297 : vector<8x32xf32>
    %299 = arith.truncf %298 : vector<8x32xf32> to vector<8x32xbf16>
    %300 = arith.truncf %212 : vector<32x64xf32> to vector<32x64xbf16>
    %cst_58 = arith.constant dense<0.000000e+00> : vector<8x64xf32>
    %301 = tpu.matmul %299, %300, %cst_58 {dimension_numbers = #tpu.dot_dimension_numbers<[1], [0], [0], [1], [0, 0, 1, 1], [], []>} : vector<8x32xbf16>, vector<32x64xbf16>, vector<8x64xf32> -> vector<8x64xf32>
    %302 = tpu.concatenate %191, %301 in 0 : vector<8x64xf32>, vector<8x64xf32> -> vector<16x64xf32>
    %303 = arith.truncf %302 : vector<16x64xf32> to vector<16x64xbf16>
    %c0_59 = arith.constant 0 : index
    %c0_60 = arith.constant 0 : index
    %c0_61 = arith.constant 0 : index
    %304 = vector.load %arg3[%c0_59, %c0_60, %c0_61] : memref<2x64x64xbf16, #tpu.memory_space<vmem>>, vector<1x64x64xbf16>
    %305 = vector.shape_cast %304 : vector<1x64x64xbf16> to vector<64x64xbf16>
    %cst_62 = arith.constant dense<0.000000e+00> : vector<16x64xf32>
    %306 = tpu.matmul %303, %305, %cst_62 {dimension_numbers = #tpu.dot_dimension_numbers<[1], [0], [0], [1], [0, 0, 1, 1], [], []>} : vector<16x64xbf16>, vector<64x64xbf16>, vector<16x64xf32> -> vector<16x64xf32>
    %307 = vector.broadcast %66 : vector<1x64xf32> to vector<16x64xf32>
    %308 = arith.addf %306, %307 : vector<16x64xf32>
    %309 = arith.addf %6, %308 : vector<16x64xf32>
    %cst_63 = arith.constant dense<0.000000e+00> : vector<16xf32>
    %310 = vector.multi_reduction <add>, %309, %cst_63 [1] : vector<16x64xf32> to vector<16xf32>
    %311 = vector.shape_cast %310 : vector<16xf32> to vector<16x1xf32>
    %cst_64 = arith.constant 6.400000e+01 : f32
    %312 = vector.broadcast %cst_64 : f32 to vector<16x1xf32>
    %313 = arith.divf %311, %312 : vector<16x1xf32>
    %314 = vector.broadcast %313 : vector<16x1xf32> to vector<16x64xf32>
    %315 = arith.subf %309, %314 : vector<16x64xf32>
    %316 = arith.mulf %315, %315 : vector<16x64xf32>
    %cst_65 = arith.constant dense<0.000000e+00> : vector<16xf32>
    %317 = vector.multi_reduction <add>, %316, %cst_65 [1] : vector<16x64xf32> to vector<16xf32>
    %318 = vector.shape_cast %317 : vector<16xf32> to vector<16x1xf32>
    %cst_66 = arith.constant 6.400000e+01 : f32
    %319 = vector.broadcast %cst_66 : f32 to vector<16x1xf32>
    %320 = arith.divf %318, %319 : vector<16x1xf32>
    %321 = vector.broadcast %313 : vector<16x1xf32> to vector<16x64xf32>
    %322 = arith.subf %309, %321 : vector<16x64xf32>
    %cst_67 = arith.constant 9.99999974E-6 : f32
    %323 = vector.broadcast %cst_67 : f32 to vector<16x1xf32>
    %324 = arith.addf %320, %323 : vector<16x1xf32>
    %325 = math.rsqrt %324 : vector<16x1xf32>
    %326 = vector.broadcast %325 : vector<16x1xf32> to vector<16x64xf32>
    %327 = arith.mulf %322, %326 : vector<16x64xf32>
    %328 = vector.broadcast %67 : vector<1x64xf32> to vector<16x64xf32>
    %329 = arith.mulf %327, %328 : vector<16x64xf32>
    %330 = vector.broadcast %68 : vector<1x64xf32> to vector<16x64xf32>
    %331 = arith.addf %329, %330 : vector<16x64xf32>
    %332 = arith.truncf %331 : vector<16x64xf32> to vector<16x64xbf16>
    %c0_68 = arith.constant 0 : index
    %c0_69 = arith.constant 0 : index
    %c0_70 = arith.constant 0 : index
    %333 = vector.load %arg4[%c0_68, %c0_69, %c0_70] : memref<2x64x2048xbf16, #tpu.memory_space<vmem>>, vector<1x64x2048xbf16>
    %334 = vector.shape_cast %333 : vector<1x64x2048xbf16> to vector<64x2048xbf16>
    %cst_71 = arith.constant dense<0.000000e+00> : vector<16x2048xf32>
    %335 = tpu.matmul %332, %334, %cst_71 {dimension_numbers = #tpu.dot_dimension_numbers<[1], [0], [0], [1], [0, 0, 1, 1], [], []>} : vector<16x64xbf16>, vector<64x2048xbf16>, vector<16x2048xf32> -> vector<16x2048xf32>
    %336 = vector.broadcast %69 : vector<1x2048xf32> to vector<16x2048xf32>
    %337 = arith.addf %335, %336 : vector<16x2048xf32>
    %cst_72 = arith.constant 0.000000e+00 : f32
    %338 = vector.broadcast %cst_72 : f32 to vector<16x2048xf32>
    %339 = arith.maximumf %337, %338 : vector<16x2048xf32>
    %340 = arith.truncf %339 : vector<16x2048xf32> to vector<16x2048xbf16>
    %c0_73 = arith.constant 0 : index
    %c0_74 = arith.constant 0 : index
    %c0_75 = arith.constant 0 : index
    %341 = vector.load %arg5[%c0_73, %c0_74, %c0_75] : memref<2x2048x64xbf16, #tpu.memory_space<vmem>>, vector<1x2048x64xbf16>
    %342 = vector.shape_cast %341 : vector<1x2048x64xbf16> to vector<2048x64xbf16>
    %cst_76 = arith.constant dense<0.000000e+00> : vector<16x64xf32>
    %343 = tpu.matmul %340, %342, %cst_76 {dimension_numbers = #tpu.dot_dimension_numbers<[1], [0], [0], [1], [0, 0, 1, 1], [], []>} : vector<16x2048xbf16>, vector<2048x64xbf16>, vector<16x64xf32> -> vector<16x64xf32>
    %344 = vector.broadcast %70 : vector<1x64xf32> to vector<16x64xf32>
    %345 = arith.addf %343, %344 : vector<16x64xf32>
    %346 = arith.addf %331, %345 : vector<16x64xf32>
    %cst_77 = arith.constant dense<0.000000e+00> : vector<16xf32>
    %347 = vector.multi_reduction <add>, %346, %cst_77 [1] : vector<16x64xf32> to vector<16xf32>
    %348 = vector.shape_cast %347 : vector<16xf32> to vector<16x1xf32>
    %cst_78 = arith.constant 6.400000e+01 : f32
    %349 = vector.broadcast %cst_78 : f32 to vector<16x1xf32>
    %350 = arith.divf %348, %349 : vector<16x1xf32>
    %351 = vector.broadcast %350 : vector<16x1xf32> to vector<16x64xf32>
    %352 = arith.subf %346, %351 : vector<16x64xf32>
    %353 = arith.mulf %352, %352 : vector<16x64xf32>
    %cst_79 = arith.constant dense<0.000000e+00> : vector<16xf32>
    %354 = vector.multi_reduction <add>, %353, %cst_79 [1] : vector<16x64xf32> to vector<16xf32>
    %355 = vector.shape_cast %354 : vector<16xf32> to vector<16x1xf32>
    %cst_80 = arith.constant 6.400000e+01 : f32
    %356 = vector.broadcast %cst_80 : f32 to vector<16x1xf32>
    %357 = arith.divf %355, %356 : vector<16x1xf32>
    %358 = vector.broadcast %350 : vector<16x1xf32> to vector<16x64xf32>
    %359 = arith.subf %346, %358 : vector<16x64xf32>
    %cst_81 = arith.constant 9.99999974E-6 : f32
    %360 = vector.broadcast %cst_81 : f32 to vector<16x1xf32>
    %361 = arith.addf %357, %360 : vector<16x1xf32>
    %362 = math.rsqrt %361 : vector<16x1xf32>
    %363 = vector.broadcast %362 : vector<16x1xf32> to vector<16x64xf32>
    %364 = arith.mulf %359, %363 : vector<16x64xf32>
    %365 = vector.broadcast %71 : vector<1x64xf32> to vector<16x64xf32>
    %366 = arith.mulf %364, %365 : vector<16x64xf32>
    %367 = vector.broadcast %72 : vector<1x64xf32> to vector<16x64xf32>
    %368 = arith.addf %366, %367 : vector<16x64xf32>
    %c1 = arith.constant 1 : index
    %c0_82 = arith.constant 0 : index
    %369 = vector.load %arg6[%c1, %c0_82] : memref<2x3072xf32, #tpu.memory_space<vmem>>, vector<1x192xf32>
    %c1_83 = arith.constant 1 : index
    %c256_84 = arith.constant 256 : index
    %370 = vector.load %arg6[%c1_83, %c256_84] : memref<2x3072xf32, #tpu.memory_space<vmem>>, vector<1x64xf32>
    %c1_85 = arith.constant 1 : index
    %c384_86 = arith.constant 384 : index
    %371 = vector.load %arg6[%c1_85, %c384_86] : memref<2x3072xf32, #tpu.memory_space<vmem>>, vector<1x64xf32>
    %c1_87 = arith.constant 1 : index
    %c512_88 = arith.constant 512 : index
    %372 = vector.load %arg6[%c1_87, %c512_88] : memref<2x3072xf32, #tpu.memory_space<vmem>>, vector<1x64xf32>
    %c1_89 = arith.constant 1 : index
    %c640_90 = arith.constant 640 : index
    %373 = vector.load %arg6[%c1_89, %c640_90] : memref<2x3072xf32, #tpu.memory_space<vmem>>, vector<1x2048xf32>
    %c1_91 = arith.constant 1 : index
    %c2688_92 = arith.constant 2688 : index
    %374 = vector.load %arg6[%c1_91, %c2688_92] : memref<2x3072xf32, #tpu.memory_space<vmem>>, vector<1x64xf32>
    %c1_93 = arith.constant 1 : index
    %c2816_94 = arith.constant 2816 : index
    %375 = vector.load %arg6[%c1_93, %c2816_94] : memref<2x3072xf32, #tpu.memory_space<vmem>>, vector<1x64xf32>
    %c1_95 = arith.constant 1 : index
    %c2944_96 = arith.constant 2944 : index
    %376 = vector.load %arg6[%c1_95, %c2944_96] : memref<2x3072xf32, #tpu.memory_space<vmem>>, vector<1x64xf32>
    %377 = arith.truncf %368 : vector<16x64xf32> to vector<16x64xbf16>
    %c1_97 = arith.constant 1 : index
    %c0_98 = arith.constant 0 : index
    %c0_99 = arith.constant 0 : index
    %378 = vector.load %arg2[%c1_97, %c0_98, %c0_99] : memref<2x64x192xbf16, #tpu.memory_space<vmem>>, vector<1x64x192xbf16>
    %379 = vector.shape_cast %378 : vector<1x64x192xbf16> to vector<64x192xbf16>
    %cst_100 = arith.constant dense<0.000000e+00> : vector<16x192xf32>
    %380 = tpu.matmul %377, %379, %cst_100 {dimension_numbers = #tpu.dot_dimension_numbers<[1], [0], [0], [1], [0, 0, 1, 1], [], []>} : vector<16x64xbf16>, vector<64x192xbf16>, vector<16x192xf32> -> vector<16x192xf32>
    %381 = vector.broadcast %369 : vector<1x192xf32> to vector<16x192xf32>
    %382 = arith.addf %380, %381 : vector<16x192xf32>
    %383 = vector.extract_strided_slice %382 {offsets = [0, 0], sizes = [16, 64], strides = [1, 1]} : vector<16x192xf32> to vector<16x64xf32>
    %384 = vector.extract_strided_slice %382 {offsets = [0, 64], sizes = [16, 64], strides = [1, 1]} : vector<16x192xf32> to vector<16x64xf32>
    %385 = vector.extract_strided_slice %382 {offsets = [0, 128], sizes = [16, 64], strides = [1, 1]} : vector<16x192xf32> to vector<16x64xf32>
    %386 = vector.extract_strided_slice %383 {offsets = [0, 0], sizes = [8, 64], strides = [1, 1]} : vector<16x64xf32> to vector<8x64xf32>
    %387 = vector.extract_strided_slice %384 {offsets = [0, 0], sizes = [8, 64], strides = [1, 1]} : vector<16x64xf32> to vector<8x64xf32>
    %388 = vector.extract_strided_slice %385 {offsets = [0, 0], sizes = [8, 64], strides = [1, 1]} : vector<16x64xf32> to vector<8x64xf32>
    %389 = vector.broadcast %14 : vector<1x64xf32> to vector<8x64xf32>
    %390 = arith.mulf %387, %389 : vector<8x64xf32>
    %391 = vector.broadcast %21 : vector<1x64xf32> to vector<8x64xf32>
    %392 = arith.mulf %387, %391 : vector<8x64xf32>
    %393 = vector.broadcast %28 : vector<1x64xf32> to vector<8x64xf32>
    %394 = arith.mulf %387, %393 : vector<8x64xf32>
    %395 = vector.broadcast %35 : vector<1x64xf32> to vector<8x64xf32>
    %396 = arith.mulf %387, %395 : vector<8x64xf32>
    %397 = tpu.concatenate %390, %392, %394, %396 in 0 : vector<8x64xf32>, vector<8x64xf32>, vector<8x64xf32>, vector<8x64xf32> -> vector<32x64xf32>
    %398 = vector.broadcast %14 : vector<1x64xf32> to vector<8x64xf32>
    %399 = arith.mulf %388, %398 : vector<8x64xf32>
    %400 = vector.broadcast %21 : vector<1x64xf32> to vector<8x64xf32>
    %401 = arith.mulf %388, %400 : vector<8x64xf32>
    %402 = vector.broadcast %28 : vector<1x64xf32> to vector<8x64xf32>
    %403 = arith.mulf %388, %402 : vector<8x64xf32>
    %404 = vector.broadcast %35 : vector<1x64xf32> to vector<8x64xf32>
    %405 = arith.mulf %388, %404 : vector<8x64xf32>
    %406 = tpu.concatenate %399, %401, %403, %405 in 0 : vector<8x64xf32>, vector<8x64xf32>, vector<8x64xf32>, vector<8x64xf32> -> vector<32x64xf32>
    %407 = arith.truncf %386 : vector<8x64xf32> to vector<8x64xbf16>
    %408 = arith.truncf %397 : vector<32x64xf32> to vector<32x64xbf16>
    %cst_101 = arith.constant dense<0.000000e+00> : vector<8x32xf32>
    %409 = tpu.matmul %407, %408, %cst_101 {dimension_numbers = #tpu.dot_dimension_numbers<[1], [1], [0], [0], [0, 0, 1, 0], [], []>} : vector<8x64xbf16>, vector<32x64xbf16>, vector<8x32xf32> -> vector<8x32xf32>
    %cst_102 = arith.constant 2.500000e-01 : f32
    %410 = vector.broadcast %cst_102 : f32 to vector<8x32xf32>
    %411 = arith.mulf %409, %410 : vector<8x32xf32>
    %cst_103 = arith.constant 0.000000e+00 : f32
    %412 = vector.broadcast %cst_103 : f32 to vector<8x32xf32>
    %cst_104 = arith.constant -1.000000e+30 : f32
    %413 = vector.shape_cast %41 : vector<1x32xi1> to vector<1x32xi1>
    %414 = vector.broadcast %413 : vector<1x32xi1> to vector<8x32xi1>
    %415 = vector.broadcast %cst_104 : f32 to vector<8x32xf32>
    %416 = arith.select %414, %411, %415 : vector<8x32xi1>, vector<8x32xf32>
    %cst_105 = arith.constant dense<0xFF800000> : vector<8xf32>
    %417 = vector.multi_reduction <maximumf>, %416, %cst_105 [1] : vector<8x32xf32> to vector<8xf32>
    %418 = vector.shape_cast %417 : vector<8xf32> to vector<8x1xf32>
    %419 = vector.broadcast %418 : vector<8x1xf32> to vector<8x32xf32>
    %420 = vector.broadcast %58 : vector<1x32xf32> to vector<8x32xf32>
    %421 = arith.mulf %419, %420 : vector<8x32xf32>
    %422 = arith.addf %412, %421 : vector<8x32xf32>
    %cst_106 = arith.constant -1.000000e+30 : f32
    %423 = vector.shape_cast %46 : vector<1x32xi1> to vector<1x32xi1>
    %424 = vector.broadcast %423 : vector<1x32xi1> to vector<8x32xi1>
    %425 = vector.broadcast %cst_106 : f32 to vector<8x32xf32>
    %426 = arith.select %424, %411, %425 : vector<8x32xi1>, vector<8x32xf32>
    %cst_107 = arith.constant dense<0xFF800000> : vector<8xf32>
    %427 = vector.multi_reduction <maximumf>, %426, %cst_107 [1] : vector<8x32xf32> to vector<8xf32>
    %428 = vector.shape_cast %427 : vector<8xf32> to vector<8x1xf32>
    %429 = vector.broadcast %428 : vector<8x1xf32> to vector<8x32xf32>
    %430 = vector.broadcast %60 : vector<1x32xf32> to vector<8x32xf32>
    %431 = arith.mulf %429, %430 : vector<8x32xf32>
    %432 = arith.addf %422, %431 : vector<8x32xf32>
    %cst_108 = arith.constant -1.000000e+30 : f32
    %433 = vector.shape_cast %51 : vector<1x32xi1> to vector<1x32xi1>
    %434 = vector.broadcast %433 : vector<1x32xi1> to vector<8x32xi1>
    %435 = vector.broadcast %cst_108 : f32 to vector<8x32xf32>
    %436 = arith.select %434, %411, %435 : vector<8x32xi1>, vector<8x32xf32>
    %cst_109 = arith.constant dense<0xFF800000> : vector<8xf32>
    %437 = vector.multi_reduction <maximumf>, %436, %cst_109 [1] : vector<8x32xf32> to vector<8xf32>
    %438 = vector.shape_cast %437 : vector<8xf32> to vector<8x1xf32>
    %439 = vector.broadcast %438 : vector<8x1xf32> to vector<8x32xf32>
    %440 = vector.broadcast %62 : vector<1x32xf32> to vector<8x32xf32>
    %441 = arith.mulf %439, %440 : vector<8x32xf32>
    %442 = arith.addf %432, %441 : vector<8x32xf32>
    %cst_110 = arith.constant -1.000000e+30 : f32
    %443 = vector.shape_cast %56 : vector<1x32xi1> to vector<1x32xi1>
    %444 = vector.broadcast %443 : vector<1x32xi1> to vector<8x32xi1>
    %445 = vector.broadcast %cst_110 : f32 to vector<8x32xf32>
    %446 = arith.select %444, %411, %445 : vector<8x32xi1>, vector<8x32xf32>
    %cst_111 = arith.constant dense<0xFF800000> : vector<8xf32>
    %447 = vector.multi_reduction <maximumf>, %446, %cst_111 [1] : vector<8x32xf32> to vector<8xf32>
    %448 = vector.shape_cast %447 : vector<8xf32> to vector<8x1xf32>
    %449 = vector.broadcast %448 : vector<8x1xf32> to vector<8x32xf32>
    %450 = vector.broadcast %64 : vector<1x32xf32> to vector<8x32xf32>
    %451 = arith.mulf %449, %450 : vector<8x32xf32>
    %452 = arith.addf %442, %451 : vector<8x32xf32>
    %453 = arith.subf %411, %452 : vector<8x32xf32>
    %454 = math.exp %453 : vector<8x32xf32>
    %cst_112 = arith.constant 0.000000e+00 : f32
    %455 = vector.broadcast %cst_112 : f32 to vector<8x32xf32>
    %456 = vector.broadcast %58 : vector<1x32xf32> to vector<8x32xf32>
    %457 = arith.mulf %454, %456 : vector<8x32xf32>
    %cst_113 = arith.constant dense<0.000000e+00> : vector<8xf32>
    %458 = vector.multi_reduction <add>, %457, %cst_113 [1] : vector<8x32xf32> to vector<8xf32>
    %459 = vector.shape_cast %458 : vector<8xf32> to vector<8x1xf32>
    %460 = tpu.reciprocal %459 {approx = true} : vector<8x1xf32> -> vector<8x1xf32>
    %461 = vector.broadcast %460 : vector<8x1xf32> to vector<8x32xf32>
    %462 = vector.broadcast %58 : vector<1x32xf32> to vector<8x32xf32>
    %463 = arith.mulf %461, %462 : vector<8x32xf32>
    %464 = arith.addf %455, %463 : vector<8x32xf32>
    %465 = vector.broadcast %60 : vector<1x32xf32> to vector<8x32xf32>
    %466 = arith.mulf %454, %465 : vector<8x32xf32>
    %cst_114 = arith.constant dense<0.000000e+00> : vector<8xf32>
    %467 = vector.multi_reduction <add>, %466, %cst_114 [1] : vector<8x32xf32> to vector<8xf32>
    %468 = vector.shape_cast %467 : vector<8xf32> to vector<8x1xf32>
    %469 = tpu.reciprocal %468 {approx = true} : vector<8x1xf32> -> vector<8x1xf32>
    %470 = vector.broadcast %469 : vector<8x1xf32> to vector<8x32xf32>
    %471 = vector.broadcast %60 : vector<1x32xf32> to vector<8x32xf32>
    %472 = arith.mulf %470, %471 : vector<8x32xf32>
    %473 = arith.addf %464, %472 : vector<8x32xf32>
    %474 = vector.broadcast %62 : vector<1x32xf32> to vector<8x32xf32>
    %475 = arith.mulf %454, %474 : vector<8x32xf32>
    %cst_115 = arith.constant dense<0.000000e+00> : vector<8xf32>
    %476 = vector.multi_reduction <add>, %475, %cst_115 [1] : vector<8x32xf32> to vector<8xf32>
    %477 = vector.shape_cast %476 : vector<8xf32> to vector<8x1xf32>
    %478 = tpu.reciprocal %477 {approx = true} : vector<8x1xf32> -> vector<8x1xf32>
    %479 = vector.broadcast %478 : vector<8x1xf32> to vector<8x32xf32>
    %480 = vector.broadcast %62 : vector<1x32xf32> to vector<8x32xf32>
    %481 = arith.mulf %479, %480 : vector<8x32xf32>
    %482 = arith.addf %473, %481 : vector<8x32xf32>
    %483 = vector.broadcast %64 : vector<1x32xf32> to vector<8x32xf32>
    %484 = arith.mulf %454, %483 : vector<8x32xf32>
    %cst_116 = arith.constant dense<0.000000e+00> : vector<8xf32>
    %485 = vector.multi_reduction <add>, %484, %cst_116 [1] : vector<8x32xf32> to vector<8xf32>
    %486 = vector.shape_cast %485 : vector<8xf32> to vector<8x1xf32>
    %487 = tpu.reciprocal %486 {approx = true} : vector<8x1xf32> -> vector<8x1xf32>
    %488 = vector.broadcast %487 : vector<8x1xf32> to vector<8x32xf32>
    %489 = vector.broadcast %64 : vector<1x32xf32> to vector<8x32xf32>
    %490 = arith.mulf %488, %489 : vector<8x32xf32>
    %491 = arith.addf %482, %490 : vector<8x32xf32>
    %492 = arith.mulf %454, %491 : vector<8x32xf32>
    %493 = arith.truncf %492 : vector<8x32xf32> to vector<8x32xbf16>
    %494 = arith.truncf %406 : vector<32x64xf32> to vector<32x64xbf16>
    %cst_117 = arith.constant dense<0.000000e+00> : vector<8x64xf32>
    %495 = tpu.matmul %493, %494, %cst_117 {dimension_numbers = #tpu.dot_dimension_numbers<[1], [0], [0], [1], [0, 0, 1, 1], [], []>} : vector<8x32xbf16>, vector<32x64xbf16>, vector<8x64xf32> -> vector<8x64xf32>
    %496 = vector.extract_strided_slice %383 {offsets = [8, 0], sizes = [8, 64], strides = [1, 1]} : vector<16x64xf32> to vector<8x64xf32>
    %497 = vector.extract_strided_slice %384 {offsets = [8, 0], sizes = [8, 64], strides = [1, 1]} : vector<16x64xf32> to vector<8x64xf32>
    %498 = vector.extract_strided_slice %385 {offsets = [8, 0], sizes = [8, 64], strides = [1, 1]} : vector<16x64xf32> to vector<8x64xf32>
    %499 = vector.broadcast %14 : vector<1x64xf32> to vector<8x64xf32>
    %500 = arith.mulf %497, %499 : vector<8x64xf32>
    %501 = vector.broadcast %21 : vector<1x64xf32> to vector<8x64xf32>
    %502 = arith.mulf %497, %501 : vector<8x64xf32>
    %503 = vector.broadcast %28 : vector<1x64xf32> to vector<8x64xf32>
    %504 = arith.mulf %497, %503 : vector<8x64xf32>
    %505 = vector.broadcast %35 : vector<1x64xf32> to vector<8x64xf32>
    %506 = arith.mulf %497, %505 : vector<8x64xf32>
    %507 = tpu.concatenate %500, %502, %504, %506 in 0 : vector<8x64xf32>, vector<8x64xf32>, vector<8x64xf32>, vector<8x64xf32> -> vector<32x64xf32>
    %508 = vector.broadcast %14 : vector<1x64xf32> to vector<8x64xf32>
    %509 = arith.mulf %498, %508 : vector<8x64xf32>
    %510 = vector.broadcast %21 : vector<1x64xf32> to vector<8x64xf32>
    %511 = arith.mulf %498, %510 : vector<8x64xf32>
    %512 = vector.broadcast %28 : vector<1x64xf32> to vector<8x64xf32>
    %513 = arith.mulf %498, %512 : vector<8x64xf32>
    %514 = vector.broadcast %35 : vector<1x64xf32> to vector<8x64xf32>
    %515 = arith.mulf %498, %514 : vector<8x64xf32>
    %516 = tpu.concatenate %509, %511, %513, %515 in 0 : vector<8x64xf32>, vector<8x64xf32>, vector<8x64xf32>, vector<8x64xf32> -> vector<32x64xf32>
    %517 = arith.truncf %496 : vector<8x64xf32> to vector<8x64xbf16>
    %518 = arith.truncf %507 : vector<32x64xf32> to vector<32x64xbf16>
    %cst_118 = arith.constant dense<0.000000e+00> : vector<8x32xf32>
    %519 = tpu.matmul %517, %518, %cst_118 {dimension_numbers = #tpu.dot_dimension_numbers<[1], [1], [0], [0], [0, 0, 1, 0], [], []>} : vector<8x64xbf16>, vector<32x64xbf16>, vector<8x32xf32> -> vector<8x32xf32>
    %cst_119 = arith.constant 2.500000e-01 : f32
    %520 = vector.broadcast %cst_119 : f32 to vector<8x32xf32>
    %521 = arith.mulf %519, %520 : vector<8x32xf32>
    %cst_120 = arith.constant 0.000000e+00 : f32
    %522 = vector.broadcast %cst_120 : f32 to vector<8x32xf32>
    %cst_121 = arith.constant -1.000000e+30 : f32
    %523 = vector.shape_cast %41 : vector<1x32xi1> to vector<1x32xi1>
    %524 = vector.broadcast %523 : vector<1x32xi1> to vector<8x32xi1>
    %525 = vector.broadcast %cst_121 : f32 to vector<8x32xf32>
    %526 = arith.select %524, %521, %525 : vector<8x32xi1>, vector<8x32xf32>
    %cst_122 = arith.constant dense<0xFF800000> : vector<8xf32>
    %527 = vector.multi_reduction <maximumf>, %526, %cst_122 [1] : vector<8x32xf32> to vector<8xf32>
    %528 = vector.shape_cast %527 : vector<8xf32> to vector<8x1xf32>
    %529 = vector.broadcast %528 : vector<8x1xf32> to vector<8x32xf32>
    %530 = vector.broadcast %58 : vector<1x32xf32> to vector<8x32xf32>
    %531 = arith.mulf %529, %530 : vector<8x32xf32>
    %532 = arith.addf %522, %531 : vector<8x32xf32>
    %cst_123 = arith.constant -1.000000e+30 : f32
    %533 = vector.shape_cast %46 : vector<1x32xi1> to vector<1x32xi1>
    %534 = vector.broadcast %533 : vector<1x32xi1> to vector<8x32xi1>
    %535 = vector.broadcast %cst_123 : f32 to vector<8x32xf32>
    %536 = arith.select %534, %521, %535 : vector<8x32xi1>, vector<8x32xf32>
    %cst_124 = arith.constant dense<0xFF800000> : vector<8xf32>
    %537 = vector.multi_reduction <maximumf>, %536, %cst_124 [1] : vector<8x32xf32> to vector<8xf32>
    %538 = vector.shape_cast %537 : vector<8xf32> to vector<8x1xf32>
    %539 = vector.broadcast %538 : vector<8x1xf32> to vector<8x32xf32>
    %540 = vector.broadcast %60 : vector<1x32xf32> to vector<8x32xf32>
    %541 = arith.mulf %539, %540 : vector<8x32xf32>
    %542 = arith.addf %532, %541 : vector<8x32xf32>
    %cst_125 = arith.constant -1.000000e+30 : f32
    %543 = vector.shape_cast %51 : vector<1x32xi1> to vector<1x32xi1>
    %544 = vector.broadcast %543 : vector<1x32xi1> to vector<8x32xi1>
    %545 = vector.broadcast %cst_125 : f32 to vector<8x32xf32>
    %546 = arith.select %544, %521, %545 : vector<8x32xi1>, vector<8x32xf32>
    %cst_126 = arith.constant dense<0xFF800000> : vector<8xf32>
    %547 = vector.multi_reduction <maximumf>, %546, %cst_126 [1] : vector<8x32xf32> to vector<8xf32>
    %548 = vector.shape_cast %547 : vector<8xf32> to vector<8x1xf32>
    %549 = vector.broadcast %548 : vector<8x1xf32> to vector<8x32xf32>
    %550 = vector.broadcast %62 : vector<1x32xf32> to vector<8x32xf32>
    %551 = arith.mulf %549, %550 : vector<8x32xf32>
    %552 = arith.addf %542, %551 : vector<8x32xf32>
    %cst_127 = arith.constant -1.000000e+30 : f32
    %553 = vector.shape_cast %56 : vector<1x32xi1> to vector<1x32xi1>
    %554 = vector.broadcast %553 : vector<1x32xi1> to vector<8x32xi1>
    %555 = vector.broadcast %cst_127 : f32 to vector<8x32xf32>
    %556 = arith.select %554, %521, %555 : vector<8x32xi1>, vector<8x32xf32>
    %cst_128 = arith.constant dense<0xFF800000> : vector<8xf32>
    %557 = vector.multi_reduction <maximumf>, %556, %cst_128 [1] : vector<8x32xf32> to vector<8xf32>
    %558 = vector.shape_cast %557 : vector<8xf32> to vector<8x1xf32>
    %559 = vector.broadcast %558 : vector<8x1xf32> to vector<8x32xf32>
    %560 = vector.broadcast %64 : vector<1x32xf32> to vector<8x32xf32>
    %561 = arith.mulf %559, %560 : vector<8x32xf32>
    %562 = arith.addf %552, %561 : vector<8x32xf32>
    %563 = arith.subf %521, %562 : vector<8x32xf32>
    %564 = math.exp %563 : vector<8x32xf32>
    %cst_129 = arith.constant 0.000000e+00 : f32
    %565 = vector.broadcast %cst_129 : f32 to vector<8x32xf32>
    %566 = vector.broadcast %58 : vector<1x32xf32> to vector<8x32xf32>
    %567 = arith.mulf %564, %566 : vector<8x32xf32>
    %cst_130 = arith.constant dense<0.000000e+00> : vector<8xf32>
    %568 = vector.multi_reduction <add>, %567, %cst_130 [1] : vector<8x32xf32> to vector<8xf32>
    %569 = vector.shape_cast %568 : vector<8xf32> to vector<8x1xf32>
    %570 = tpu.reciprocal %569 {approx = true} : vector<8x1xf32> -> vector<8x1xf32>
    %571 = vector.broadcast %570 : vector<8x1xf32> to vector<8x32xf32>
    %572 = vector.broadcast %58 : vector<1x32xf32> to vector<8x32xf32>
    %573 = arith.mulf %571, %572 : vector<8x32xf32>
    %574 = arith.addf %565, %573 : vector<8x32xf32>
    %575 = vector.broadcast %60 : vector<1x32xf32> to vector<8x32xf32>
    %576 = arith.mulf %564, %575 : vector<8x32xf32>
    %cst_131 = arith.constant dense<0.000000e+00> : vector<8xf32>
    %577 = vector.multi_reduction <add>, %576, %cst_131 [1] : vector<8x32xf32> to vector<8xf32>
    %578 = vector.shape_cast %577 : vector<8xf32> to vector<8x1xf32>
    %579 = tpu.reciprocal %578 {approx = true} : vector<8x1xf32> -> vector<8x1xf32>
    %580 = vector.broadcast %579 : vector<8x1xf32> to vector<8x32xf32>
    %581 = vector.broadcast %60 : vector<1x32xf32> to vector<8x32xf32>
    %582 = arith.mulf %580, %581 : vector<8x32xf32>
    %583 = arith.addf %574, %582 : vector<8x32xf32>
    %584 = vector.broadcast %62 : vector<1x32xf32> to vector<8x32xf32>
    %585 = arith.mulf %564, %584 : vector<8x32xf32>
    %cst_132 = arith.constant dense<0.000000e+00> : vector<8xf32>
    %586 = vector.multi_reduction <add>, %585, %cst_132 [1] : vector<8x32xf32> to vector<8xf32>
    %587 = vector.shape_cast %586 : vector<8xf32> to vector<8x1xf32>
    %588 = tpu.reciprocal %587 {approx = true} : vector<8x1xf32> -> vector<8x1xf32>
    %589 = vector.broadcast %588 : vector<8x1xf32> to vector<8x32xf32>
    %590 = vector.broadcast %62 : vector<1x32xf32> to vector<8x32xf32>
    %591 = arith.mulf %589, %590 : vector<8x32xf32>
    %592 = arith.addf %583, %591 : vector<8x32xf32>
    %593 = vector.broadcast %64 : vector<1x32xf32> to vector<8x32xf32>
    %594 = arith.mulf %564, %593 : vector<8x32xf32>
    %cst_133 = arith.constant dense<0.000000e+00> : vector<8xf32>
    %595 = vector.multi_reduction <add>, %594, %cst_133 [1] : vector<8x32xf32> to vector<8xf32>
    %596 = vector.shape_cast %595 : vector<8xf32> to vector<8x1xf32>
    %597 = tpu.reciprocal %596 {approx = true} : vector<8x1xf32> -> vector<8x1xf32>
    %598 = vector.broadcast %597 : vector<8x1xf32> to vector<8x32xf32>
    %599 = vector.broadcast %64 : vector<1x32xf32> to vector<8x32xf32>
    %600 = arith.mulf %598, %599 : vector<8x32xf32>
    %601 = arith.addf %592, %600 : vector<8x32xf32>
    %602 = arith.mulf %564, %601 : vector<8x32xf32>
    %603 = arith.truncf %602 : vector<8x32xf32> to vector<8x32xbf16>
    %604 = arith.truncf %516 : vector<32x64xf32> to vector<32x64xbf16>
    %cst_134 = arith.constant dense<0.000000e+00> : vector<8x64xf32>
    %605 = tpu.matmul %603, %604, %cst_134 {dimension_numbers = #tpu.dot_dimension_numbers<[1], [0], [0], [1], [0, 0, 1, 1], [], []>} : vector<8x32xbf16>, vector<32x64xbf16>, vector<8x64xf32> -> vector<8x64xf32>
    %606 = tpu.concatenate %495, %605 in 0 : vector<8x64xf32>, vector<8x64xf32> -> vector<16x64xf32>
    %607 = arith.truncf %606 : vector<16x64xf32> to vector<16x64xbf16>
    %c1_135 = arith.constant 1 : index
    %c0_136 = arith.constant 0 : index
    %c0_137 = arith.constant 0 : index
    %608 = vector.load %arg3[%c1_135, %c0_136, %c0_137] : memref<2x64x64xbf16, #tpu.memory_space<vmem>>, vector<1x64x64xbf16>
    %609 = vector.shape_cast %608 : vector<1x64x64xbf16> to vector<64x64xbf16>
    %cst_138 = arith.constant dense<0.000000e+00> : vector<16x64xf32>
    %610 = tpu.matmul %607, %609, %cst_138 {dimension_numbers = #tpu.dot_dimension_numbers<[1], [0], [0], [1], [0, 0, 1, 1], [], []>} : vector<16x64xbf16>, vector<64x64xbf16>, vector<16x64xf32> -> vector<16x64xf32>
    %611 = vector.broadcast %370 : vector<1x64xf32> to vector<16x64xf32>
    %612 = arith.addf %610, %611 : vector<16x64xf32>
    %613 = arith.addf %368, %612 : vector<16x64xf32>
    %cst_139 = arith.constant dense<0.000000e+00> : vector<16xf32>
    %614 = vector.multi_reduction <add>, %613, %cst_139 [1] : vector<16x64xf32> to vector<16xf32>
    %615 = vector.shape_cast %614 : vector<16xf32> to vector<16x1xf32>
    %cst_140 = arith.constant 6.400000e+01 : f32
    %616 = vector.broadcast %cst_140 : f32 to vector<16x1xf32>
    %617 = arith.divf %615, %616 : vector<16x1xf32>
    %618 = vector.broadcast %617 : vector<16x1xf32> to vector<16x64xf32>
    %619 = arith.subf %613, %618 : vector<16x64xf32>
    %620 = arith.mulf %619, %619 : vector<16x64xf32>
    %cst_141 = arith.constant dense<0.000000e+00> : vector<16xf32>
    %621 = vector.multi_reduction <add>, %620, %cst_141 [1] : vector<16x64xf32> to vector<16xf32>
    %622 = vector.shape_cast %621 : vector<16xf32> to vector<16x1xf32>
    %cst_142 = arith.constant 6.400000e+01 : f32
    %623 = vector.broadcast %cst_142 : f32 to vector<16x1xf32>
    %624 = arith.divf %622, %623 : vector<16x1xf32>
    %625 = vector.broadcast %617 : vector<16x1xf32> to vector<16x64xf32>
    %626 = arith.subf %613, %625 : vector<16x64xf32>
    %cst_143 = arith.constant 9.99999974E-6 : f32
    %627 = vector.broadcast %cst_143 : f32 to vector<16x1xf32>
    %628 = arith.addf %624, %627 : vector<16x1xf32>
    %629 = math.rsqrt %628 : vector<16x1xf32>
    %630 = vector.broadcast %629 : vector<16x1xf32> to vector<16x64xf32>
    %631 = arith.mulf %626, %630 : vector<16x64xf32>
    %632 = vector.broadcast %371 : vector<1x64xf32> to vector<16x64xf32>
    %633 = arith.mulf %631, %632 : vector<16x64xf32>
    %634 = vector.broadcast %372 : vector<1x64xf32> to vector<16x64xf32>
    %635 = arith.addf %633, %634 : vector<16x64xf32>
    %636 = arith.truncf %635 : vector<16x64xf32> to vector<16x64xbf16>
    %c1_144 = arith.constant 1 : index
    %c0_145 = arith.constant 0 : index
    %c0_146 = arith.constant 0 : index
    %637 = vector.load %arg4[%c1_144, %c0_145, %c0_146] : memref<2x64x2048xbf16, #tpu.memory_space<vmem>>, vector<1x64x2048xbf16>
    %638 = vector.shape_cast %637 : vector<1x64x2048xbf16> to vector<64x2048xbf16>
    %cst_147 = arith.constant dense<0.000000e+00> : vector<16x2048xf32>
    %639 = tpu.matmul %636, %638, %cst_147 {dimension_numbers = #tpu.dot_dimension_numbers<[1], [0], [0], [1], [0, 0, 1, 1], [], []>} : vector<16x64xbf16>, vector<64x2048xbf16>, vector<16x2048xf32> -> vector<16x2048xf32>
    %640 = vector.broadcast %373 : vector<1x2048xf32> to vector<16x2048xf32>
    %641 = arith.addf %639, %640 : vector<16x2048xf32>
    %cst_148 = arith.constant 0.000000e+00 : f32
    %642 = vector.broadcast %cst_148 : f32 to vector<16x2048xf32>
    %643 = arith.maximumf %641, %642 : vector<16x2048xf32>
    %644 = arith.truncf %643 : vector<16x2048xf32> to vector<16x2048xbf16>
    %c1_149 = arith.constant 1 : index
    %c0_150 = arith.constant 0 : index
    %c0_151 = arith.constant 0 : index
    %645 = vector.load %arg5[%c1_149, %c0_150, %c0_151] : memref<2x2048x64xbf16, #tpu.memory_space<vmem>>, vector<1x2048x64xbf16>
    %646 = vector.shape_cast %645 : vector<1x2048x64xbf16> to vector<2048x64xbf16>
    %cst_152 = arith.constant dense<0.000000e+00> : vector<16x64xf32>
    %647 = tpu.matmul %644, %646, %cst_152 {dimension_numbers = #tpu.dot_dimension_numbers<[1], [0], [0], [1], [0, 0, 1, 1], [], []>} : vector<16x2048xbf16>, vector<2048x64xbf16>, vector<16x64xf32> -> vector<16x64xf32>
    %648 = vector.broadcast %374 : vector<1x64xf32> to vector<16x64xf32>
    %649 = arith.addf %647, %648 : vector<16x64xf32>
    %650 = arith.addf %635, %649 : vector<16x64xf32>
    %cst_153 = arith.constant dense<0.000000e+00> : vector<16xf32>
    %651 = vector.multi_reduction <add>, %650, %cst_153 [1] : vector<16x64xf32> to vector<16xf32>
    %652 = vector.shape_cast %651 : vector<16xf32> to vector<16x1xf32>
    %cst_154 = arith.constant 6.400000e+01 : f32
    %653 = vector.broadcast %cst_154 : f32 to vector<16x1xf32>
    %654 = arith.divf %652, %653 : vector<16x1xf32>
    %655 = vector.broadcast %654 : vector<16x1xf32> to vector<16x64xf32>
    %656 = arith.subf %650, %655 : vector<16x64xf32>
    %657 = arith.mulf %656, %656 : vector<16x64xf32>
    %cst_155 = arith.constant dense<0.000000e+00> : vector<16xf32>
    %658 = vector.multi_reduction <add>, %657, %cst_155 [1] : vector<16x64xf32> to vector<16xf32>
    %659 = vector.shape_cast %658 : vector<16xf32> to vector<16x1xf32>
    %cst_156 = arith.constant 6.400000e+01 : f32
    %660 = vector.broadcast %cst_156 : f32 to vector<16x1xf32>
    %661 = arith.divf %659, %660 : vector<16x1xf32>
    %662 = vector.broadcast %654 : vector<16x1xf32> to vector<16x64xf32>
    %663 = arith.subf %650, %662 : vector<16x64xf32>
    %cst_157 = arith.constant 9.99999974E-6 : f32
    %664 = vector.broadcast %cst_157 : f32 to vector<16x1xf32>
    %665 = arith.addf %661, %664 : vector<16x1xf32>
    %666 = math.rsqrt %665 : vector<16x1xf32>
    %667 = vector.broadcast %666 : vector<16x1xf32> to vector<16x64xf32>
    %668 = arith.mulf %663, %667 : vector<16x64xf32>
    %669 = vector.broadcast %375 : vector<1x64xf32> to vector<16x64xf32>
    %670 = arith.mulf %668, %669 : vector<16x64xf32>
    %671 = vector.broadcast %376 : vector<1x64xf32> to vector<16x64xf32>
    %672 = arith.addf %670, %671 : vector<16x64xf32>
    %c0_158 = arith.constant 0 : index
    %c0_159 = arith.constant 0 : index
    %673 = vector.load %arg7[%c0_158, %c0_159] : memref<16x64xf32, #tpu.memory_space<vmem>>, vector<16x64xf32>
    tpu.vector_store %arg7[%c0_158, %c0_159], %672 {strides = array<i32>} : memref<16x64xf32, #tpu.memory_space<vmem>>, vector<16x64xf32>,
    return
  }
}

</mosaic_0001>

<bundles_post_ra>
// kernel: tpu_custom_call.1
= control target key start
LH: loop header
LB: loop body
LE: loop exit
PB: predicated region body
PF: predicated region fallthrough
CT: control target
= control target key end

     0   :  { %v7461_v1 = vmov 0   ;;  %v51_v11 = vlaneseq  ;;  %v7462_v12 = vmov 0.0   ;;  %s7463_s20 = smov 64   ;;  %vm160_vm10 = vcmask 523264   ;;  %s9377_s0 = inlined_call_operand.vmem [shape: f32[16,1], index: 0, kind: input, shape index: {}]   ;;  %s9378_s1 = inlined_call_operand.vmem [shape: f32[24,64], index: 1, kind: input, shape index: {}]   ;;  %s9379_s2 = inlined_call_operand.vmem [shape: bf16[2,64,192], index: 2, kind: input, shape index: {}]   ;;  %s9380_s3 = inlined_call_operand.vmem [shape: bf16[2,64,64], index: 3, kind: input, shape index: {}]   ;;  %s9381_s4 = inlined_call_operand.vmem [shape: bf16[2,64,2048], index: 4, kind: input, shape index: {}]   ;;  %s9382_s5 = inlined_call_operand.vmem [shape: bf16[2,2048,64], index: 5, kind: input, shape index: {}]   ;;  %s9383_s6 = inlined_call_operand.vmem [shape: f32[2,3072], index: 6, kind: input, shape index: {}]   ;;  %s9384_s7 = inlined_call_operand.hbm [shape: f32[16,64], index: 7, kind: output, shape index: {}]  }
   0x1   :  { %v28_v0 = vld [vmem:[%s9377_s0] sm:$0xff]  ;;  %7082 = vset.pattern.permute.xlu0 %v7461_v1  ;;  %196 = vmatprep.mubr.bf16.mxu0 %v7461_v1  ;;  %v7096_v4 = vld [vmem:[%s9379_s2 + $0x14] ss:$8 sps:$4 sm:$0xff]   ;;  %v29_v5 = vld [vmem:[%s9377_s0 + $0x8] sm:$0xff] }
   0x2   :  { %v7093_v2 = vld [vmem:[%s9379_s2 + $0x4] ss:$8 sps:$4 sm:$0xff]   ;;  %v7095_v3 = vld [vmem:[%s9379_s2] ss:$8 sps:$4 sm:$0xff]   ;;  %35 = vperm.xlu0 %7082, %v28_v0   ;;  %v7098_v6 = vld [vmem:[%s9379_s2 + $0x10] ss:$8 sps:$4 sm:$0xff]   ;;  %6987 = vmatprep.subr.bf16.mxu1 %v7462_v12 }
   0x3   :  { %164 = vmatprep.subr.bf16.mxu0 %v7093_v2  ;;  %v7099_v7 = vld [vmem:[%s9379_s2 + $0x24] ss:$8 sps:$4 sm:$0xff]   ;;  %v7101_v8 = vld [vmem:[%s9379_s2 + $0x20] ss:$8 sps:$4 sm:$0xff]   ;;  %v7102_v9 = vld [vmem:[%s9379_s2 + $0x34] ss:$8 sps:$4 sm:$0xff]  }
   0x4   :  { %165 = vmatpush1.bf16.msra.mxu0 %v7095_v3  ;;  %v7104_v10 = vld [vmem:[%s9379_s2 + $0x30] ss:$8 sps:$4 sm:$0xff]   ;;  %v7541_v13 = vand.u32 127, %v51_v11  ;;  %v5803_v20 = vld [vmem:[%s9378_s1] ss:$0 sm:$0xff]  ;;  %v31_v22 = vld [vmem:[%s9378_s1 + $0x8] sm:$0xff] }
   0x5   :  { %166 = vmatprep.subr.bf16.mxu0 %v7096_v4  ;;  %v32_v23 = vld [vmem:[%s9378_s1 + $0x10] sm:$0xff] }
   0x6   :  { %40 = vperm.xlu0 %7082, %v29_v5   ;;  %vm54_vm0 = vcmp.lt.s32.totalorder %v7541_v13, 16  ;;  %vm58_vm1 = vcmp.ge.s32.totalorder %v7541_v13, 16  ;;  %vm59_vm2 = vcmp.lt.s32.totalorder %v7541_v13, 32  ;;  %vm63_vm3 = vcmp.ge.s32.totalorder %v7541_v13, 32 }
   0x7   :  { %v7550_v14 = vsel %vm54_vm0, 1.0, %v7462_v12  ;;  %vm60_vm4 = vmand %vm58_vm1, %vm59_vm2  ;;  %vm64_vm5 = vcmp.lt.s32.totalorder %v7541_v13, 48  ;;  %vm68_vm6 = vcmp.ge.s32.totalorder %v7541_v13, 48  ;;  %vm69_vm7 = vcmp.lt.s32.totalorder %v7541_v13, 64 }
   0x8   :  { %167 = vmatpush1.bf16.msra.mxu0 %v7098_v6  ;;  %v7561_v15 = vsel %vm60_vm4, 1.0, %v7462_v12  ;;  %vm65_vm8 = vmand %vm63_vm3, %vm64_vm5 }
   0x9   :  { %168 = vmatprep.subr.bf16.mxu0 %v7099_v7  ;;  %v7083_v16 = vpack.i.bf16 %v7561_v15, %v7550_v14  ;;  %v7566_v17 = vsel %vm65_vm8, 1.0, %v7462_v12  ;;  %vm70_vm9 = vmand %vm68_vm6, %vm69_vm7 }
   0xa   :  { %v7569_v18 = vsel %vm70_vm9, 1.0, %v7462_v12 }
   0xb   :  { %7084 = vrot.lane.b32.xlu1 %v7083_v16, %s7463_s20  ;;  %v7088_v19 = vpack.i.bf16 %v7569_v18, %v7566_v17 }
   0xc   :  { %169 = vmatpush1.bf16.msra.mxu0 %v7101_v8 }
   0xd   :  { %170 = vmatprep.subr.bf16.mxu0 %v7102_v9 }
   0xf   :  { %7089 = vrot.lane.b32.xlu1 %v7088_v19, %s7463_s20 }
  0x10   :  { %171 = vmatpush1.bf16.msra.mxu0 %v7104_v10 }
  0x11   :  { %7011 = vmatprep.subr.bf16.mxu0 %v7462_v12 }
  0x81   :  { %v36_v21 = vpop.permute.xlu0 %35 }
  0x82   :  { %v47_v24 = vmul.f32 %v5803_v20, %v36_v21 }
  0x84   :  { %v7584_v27 = vadd.f32 %v47_v24, %v31_v22 }
  0x85   :  { %v41_v25 = vpop.permute.xlu0 %40 }
  0x86   :  { %v48_v26 = vmul.f32 %v5803_v20, %v41_v25 }
  0x88   :  { %v7586_v28 = vadd.f32 %v48_v26, %v32_v23 }
  0x8a   :  { %v100_v29 = vpack.c.bf16 %v7586_v28, %v7584_v27 }
  0x8c   :  { %5822 = vmatmul.mubr.msk.bf16.vlgmr.msra.gmra.mrb[0].mxu0 %vm160_vm10, %v100_v29 }
  0x8d   :  { %12 = vsyncpa [#allocation3], 0  ;;  %v7591_v30 = vshrl.u32 %v51_v11, 7  ;;  %v7085_v31 = vpop.permute.xlu1 %7084  ;;  %v89_v33 = vld [vmem:[%s9383_s6] ss:$2 sm:$0x3] }
  0x8e   :  { %v7608_v40 = vunpack.i.l.bf16 %v7085_v31  ;;  %v7610_v42 = vunpack.i.h.bf16 %v7085_v31  ;;  %vm7464_vm11 = vmmov 0   ;;  %vm75_vm12 = vcmp.ge.s32.totalorder %v7541_v13, 8  ;;  %s7465_s15 = smov [#allocation2]  }
  0x8f   :  { %v7594_v32 = vsub.s32 0, %v7591_v30  ;;  %v7600_v34 = vsub.s32 1, %v7591_v30  ;;  %6991 = vmatprep.mubr.msk.bf16.mxu1 %vm7464_vm11, %v7462_v12  ;;  %7015 = vmatprep.mubr.msk.bf16.mxu0 %vm7464_vm11, %v7462_v12  ;;  %vm77_vm13 = vcmp.lt.s32.totalorder %v7541_v13, 24  ;;  %vm7647_vm14 = vmand %vm75_vm12, %vm54_vm0  ;;  %vm73_vm15 = vcmp.lt.s32.totalorder %v7541_v13, 8  ;;  %s5792_s16 = sshll.u32 %s7465_s15, 4  ;;  %s5793_s16 = int_to_ptr.vmem [resolvable:$true] %s5792_s16 }
  0x90   :  { %vm292_vm3 = vcmask 261120   ;;  %vm7654_vm4 = vmand %vm58_vm1, %vm77_vm13  ;;  %vm79_vm0 = vcmp.ge.s32.totalorder %v7541_v13, 24  ;;  %s7437_s17 = scalar_lea.vmem %s5793_s16, 256  ;;  %p7442_p1 = scmp.lt.s32.totalorder %s5793_s16, %s5793_s16 }
  0x91   :  { %v7090_v35 = vpop.permute.xlu1 %7089  ;;  %v113_v36 = vrot.slane %v89_v33, %v7594_v32  ;;  %v117_v37 = vrot.slane %v89_v33, %v7600_v34  ;;  %vm7669_vm1 = vmand %vm79_vm0, %vm59_vm2  ;;  %p7438_p0 = scmp.ne.s32.totalorder %s5793_s16, %s7437_s17  ;;  %p7443_p2 = scmp.lt.s32.totalorder %s7437_s17, %s7437_s17 }
  0x92   :  { %v7604_v38 = vunpack.i.h.bf16 %v7090_v35  ;;  %v7606_v39 = vunpack.i.l.bf16 %v7090_v35 }
  0x93   :  { %p7444_p3 = por %p7443_p2, %p7442_p1 }
  0x95   :  { %p7445_p4 = pnand %p7444_p3, %p7438_p0 }
 0x15f   :  { %v198_v41 = vpop.f32.mrb[0].mxu0 }
 0x160   :  { %v199_v43 = vadd.f32 %v198_v41, %v113_v36  ;;  %v200_v44 = vpop.f32.mrb[1].mxu0  ;;  %v7685_v41 = vsel %vm73_vm15, 1.0, %v7462_v12 }
 0x161   :  { %v201_v45 = vadd.f32 %v200_v44, %v117_v37  ;;  %v202_v46 = vpop.f32.mrb[2].mxu0 }
 0x162   :  { %v7612_v47 = vadd.f32 %v202_v46, %v113_v36  ;;  %v204_v48 = vpop.f32.mrb[3].mxu0  ;;  %v221_v49 = vmul.f32 %v7606_v39, %v199_v43  ;;  %v226_v50 = vmul.f32 %v7604_v38, %v199_v43  ;;  %v211_v51 = vmul.f32 %v7608_v40, %v199_v43 }
 0x163   :  { %v205_v52 = vadd.f32 %v204_v48, %v117_v37  ;;  %v216_v54 = vmul.f32 %v7610_v42, %v199_v43  ;;  %v227_v3 = vmul.f32 %v7550_v14, %v201_v45  ;;  %v228_v4 = vmul.f32 %v7561_v15, %v201_v45 }
 0x164   :  { %v233_v53 = vpack.c.bf16 %v226_v50, %v221_v49  ;;  %v231_v5 = vpack.c.bf16 %v199_v43, %v199_v43  ;;  %v229_v6 = vmul.f32 %v7566_v17, %v201_v45  ;;  %v230_v7 = vmul.f32 %v7569_v18, %v201_v45 }
 0x165   :  { %v401_v55 = vmul.f32 %v7550_v14, %v205_v52  ;;  %v402_v56 = vmul.f32 %v7561_v15, %v205_v52  ;;  %v232_v57 = vpack.c.bf16 %v216_v54, %v211_v51  ;;  %v403_v58 = vmul.f32 %v7566_v17, %v205_v52 }
 0x166   :  { %238 = vrot.lane.b32.xlu1 %v233_v53, %s7463_s20  ;;  %v404_v59 = vmul.f32 %v7569_v18, %v205_v52  ;;  %v352_v8 = vpack.c.bf16 %v228_v4, %v227_v3  ;;  %v353_v9 = vpack.c.bf16 %v230_v7, %v229_v6  ;;  %v7680_v37 = vsel %vm7647_vm14, 1.0, %v7462_v12 }
 0x167   :  { %v521_v60 = vpack.c.bf16 %v402_v56, %v401_v55  ;;  %236 = vrot.lane.b32.xlu0 %v232_v57, %s7463_s20  ;;  %v7690_v45 = vsel %vm7654_vm4, 1.0, %v7462_v12  ;;  %v7698_v51 = vsel %vm7669_vm1, 1.0, %v7462_v12  ;;  %v398_v6 = vmul.f32 %v7610_v42, %v7612_v47 }
 0x168   :  { %v522_v61 = vpack.c.bf16 %v404_v59, %v403_v58 }
 0x169   :  { %7012 = vmatpush3.bf16.msra.mxu0 %v521_v60 }
 0x16a   :  { %7013 = vmatprep.subr.bf16.mxu0 %v7462_v12 }
 0x16d   :  { %7014 = vmatpush3.bf16.msra.mxu0 %v522_v61 }
 0x16e   :  { %7019 = vmatprep.subr.bf16.mxu0 %v7462_v12 }
 0x1d8   :  { %v239_v0 = vpop.permute.xlu1 %238 }
 0x1d9   :  { %v237_v62 = vpop.permute.xlu0 %236  ;;  %v247_v2 = vsel %vm160_vm10, %v239_v0, 0 }
 0x1da   :  { %v244_v63 = vsel %vm160_vm10, %v237_v62, 0 }
 0x1db   :  { %6988 = vmatpush3.bf16.xpose.msra.mxu1 %v244_v63 }
 0x1dc   :  { %6989 = vmatprep.subr.bf16.mxu1 %v7462_v12 }
 0x1e3   :  { %6990 = vmatpush3.bf16.xpose.msra.mxu1 %v247_v2 }
 0x1e4   :  { %6995 = vmatprep.subr.bf16.mxu1 %v7462_v12 }
 0x1ea   :  { %6992 = vmatmul.mubr.msk.bf16.vlgmr.msra.gmra.mrb[0].mxu1 %vm160_vm10, %v231_v5  ;;  %v397_v5 = vmul.f32 %v7608_v40, %v7612_v47 }
 0x1eb   :  { %6996 = vmatpush3.bf16.msra.mxu1 %v352_v8  ;;  %6999 = vmatprep.mubr.msk.bf16.mxu1 %vm7464_vm11, %v7462_v12  ;;  %v399_v8 = vmul.f32 %v7606_v39, %v7612_v47 }
 0x1ec   :  { %6997 = vmatprep.subr.bf16.mxu1 %v7462_v12  ;;  %v406_v7 = vpack.c.bf16 %v398_v6, %v397_v5 }
 0x1ef   :  { %6998 = vmatpush3.bf16.msra.mxu1 %v353_v9  ;;  %v400_v9 = vmul.f32 %v7604_v38, %v7612_v47 }
 0x1f0   :  { %7003 = vmatprep.subr.bf16.mxu1 %v7462_v12 }
 0x2bd   :  { %v283_v10 = vpop.f32.mrb[0].mxu1 }
 0x2be   :  { %v289_v16 = vmul.f32 0.25, %v283_v10  ;;  %v6993_v19 = vpop.f32.mrb[1].mxu1  ;;  %v407_v10 = vpack.c.bf16 %v400_v9, %v399_v8 }
 0x2bf   :  { %v286_v20 = vpop.f32.mrb[2].mxu1 }
 0x2c0   :  { %v6994_v22 = vpop.f32.mrb[3].mxu1  ;;  %v299_v23 = vsel %vm7647_vm14, %v289_v16, -1e+30  ;;  %v291_v24 = vsel %vm73_vm15, %v289_v16, -1e+30 }
 0x2c1   :  { %v300_v25 = vsel %vm292_vm3, %v299_v23, -inf  ;;  %v293_v26 = vsel %vm292_vm3, %v291_v24, -inf  ;;  %v306_v29 = vsel %vm7654_vm4, %v289_v16, -1e+30  ;;  %v313_v35 = vsel %vm7669_vm1, %v289_v16, -1e+30 }
 0x2c2   :  { %301 = vmax.xlane.f32.xlu1 %v300_v25  ;;  %294 = vmax.xlane.f32.xlu0 %v293_v26  ;;  %v307_v33 = vsel %vm292_vm3, %v306_v29, -inf  ;;  %v314_v36 = vsel %vm292_vm3, %v313_v35, -inf }
 0x2c6   :  { %308 = vmax.xlane.f32.xlu0 %v307_v33 }
 0x2ca   :  { %315 = vmax.xlane.f32.xlu0 %v314_v36 }
 0x34f   :  { %v302_v43 = vpop.xlane.xlu1 %301  ;;  %v295_v44 = vpop.xlane.xlu0 %294 }
 0x350   :  { %v303_v46 = vmul.f32 %v7680_v37, %v302_v43  ;;  %v296_v48 = vmul.f32 %v7685_v41, %v295_v44 }
 0x352   :  { %v304_v52 = vadd.f32 %v303_v46, %v296_v48 }
 0x353   :  { %v309_v49 = vpop.xlane.xlu0 %308 }
 0x354   :  { %v310_v50 = vmul.f32 %v7690_v45, %v309_v49 }
 0x356   :  { %v311_v54 = vadd.f32 %v310_v50, %v304_v52 }
 0x357   :  { %v316_v53 = vpop.xlane.xlu0 %315 }
 0x358   :  { %v317_v55 = vmul.f32 %v7698_v51, %v316_v53 }
 0x35a   :  { %v318_v56 = vadd.f32 %v317_v55, %v311_v54  ;;  %v405_v55 = vpack.c.bf16 %v7612_v47, %v7612_v47 }
 0x35c   :  { %v319_v57 = vsub.f32 %v289_v16, %v318_v56 }
 0x35e   :  { %v320_v58 = vmul.f32 1.442695, %v319_v57 }
 0x360   :  { %7381 = vpow2.f32 %v320_v58 }
 0x36a   :  { %v7382_v59 = vpop.eup %7381 }
 0x36b   :  { %v329_v60 = vmul.f32 %v7382_v59, %v7680_v37  ;;  %v322_v61 = vmul.f32 %v7382_v59, %v7685_v41  ;;  %v343_v0 = vmul.f32 %v7382_v59, %v7698_v51  ;;  %v336_v2 = vmul.f32 %v7382_v59, %v7690_v45 }
 0x36d   :  { %v330_v62 = vsel %vm292_vm3, %v329_v60, 0.0  ;;  %v323_v63 = vsel %vm292_vm3, %v322_v61, 0.0  ;;  %v344_v3 = vsel %vm292_vm3, %v343_v0, 0.0  ;;  %v337_v4 = vsel %vm292_vm3, %v336_v2, 0.0 }
 0x36e   :  { %331 = vadd.xlane.f32.xlu0 %v330_v62  ;;  %324 = vadd.xlane.f32.xlu1 %v323_v63 }
 0x372   :  { %345 = vadd.xlane.f32.xlu0 %v344_v3  ;;  %338 = vadd.xlane.f32.xlu1 %v337_v4 }
 0x383   :  { %410 = vrot.lane.b32.xlu1 %v406_v7, %s7463_s20 }
 0x388   :  { %412 = vrot.lane.b32.xlu0 %v407_v10, %s7463_s20 }
 0x3fb   :  { %v332_v16 = vpop.xlane.xlu0 %331  ;;  %v325_v19 = vpop.xlane.xlu1 %324 }
 0x3fc   :  { %7383 = vrcp.f32 %v332_v16 }
 0x3fd   :  { %7385 = vrcp.f32 %v325_v19 }
 0x3ff   :  { %v346_v20 = vpop.xlane.xlu0 %345  ;;  %v339_v22 = vpop.xlane.xlu1 %338 }
 0x400   :  { %7387 = vrcp.f32 %v346_v20 }
 0x401   :  { %7389 = vrcp.f32 %v339_v22 }
 0x403   :  { %v411_v49 = vpop.permute.xlu1 %410  ;;  %v413_v53 = vpop.permute.xlu0 %412 }
 0x404   :  { %v418_v52 = vsel %vm160_vm10, %v411_v49, 0  ;;  %v421_v54 = vsel %vm160_vm10, %v413_v53, 0 }
 0x406   :  { %v7384_v23 = vpop.eup %7383 }
 0x407   :  { %v7386_v24 = vpop.eup %7385  ;;  %v334_v25 = vmul.f32 %v7384_v23, %v7680_v37 }
 0x408   :  { %v327_v26 = vmul.f32 %v7386_v24, %v7685_v41 }
 0x40a   :  { %v7388_v29 = vpop.eup %7387  ;;  %v335_v35 = vadd.f32 %v334_v25, %v327_v26 }
 0x40b   :  { %v7390_v33 = vpop.eup %7389  ;;  %v348_v43 = vmul.f32 %v7388_v29, %v7698_v51 }
 0x40c   :  { %v341_v36 = vmul.f32 %v7390_v33, %v7690_v45 }
 0x40e   :  { %v342_v44 = vadd.f32 %v341_v36, %v335_v35 }
 0x410   :  { %v349_v46 = vadd.f32 %v348_v43, %v342_v44 }
 0x412   :  { %v350_v48 = vmul.f32 %v7382_v59, %v349_v46 }
 0x414   :  { %v351_v50 = vpack.c.bf16 %v350_v48, %v350_v48 }
 0x416   :  { %7000 = vmatmul.mubr.msk.bf16.vlgmr.msra.gmra.mrb[4].mxu1 %vm292_vm3, %v351_v50 }
 0x417   :  { %7004 = vmatpush3.bf16.xpose.msra.mxu1 %v418_v52  ;;  %7007 = vmatprep.mubr.msk.bf16.mxu1 %vm7464_vm11, %v7462_v12 }
 0x418   :  { %7005 = vmatprep.subr.bf16.mxu1 %v7462_v12 }
 0x41f   :  { %7006 = vmatpush3.bf16.xpose.msra.mxu1 %v421_v54 }
 0x426   :  { %7008 = vmatmul.mubr.msk.bf16.vlgmr.msra.gmra.mrb[8].mxu1 %vm160_vm10, %v405_v55 }
 0x427   :  { %1190 = vmatprep.mubr.bf16.mxu1 %v7461_v1 }
 0x4e9   :  { %v7733_v56 = vpop.f32.mrb[4].mxu1 }
 0x4ea   :  { %v7001_v57 = vpop.f32.mrb[5].mxu1 }
 0x4eb   :  { %v394_v58 = vpop.f32.mrb[6].mxu1 }
 0x4ec   :  { %v7002_v59 = vpop.f32.mrb[7].mxu1 }
 0x4f9   :  { %v457_v60 = vpop.f32.mrb[8].mxu1 }
 0x4fa   :  { %v463_v61 = vmul.f32 0.25, %v457_v60  ;;  %v7009_v62 = vpop.f32.mrb[9].mxu1 }
 0x4fb   :  { %v460_v63 = vpop.f32.mrb[10].mxu1 }
 0x4fc   :  { %v7010_v0 = vpop.f32.mrb[11].mxu1  ;;  %v470_v2 = vsel %vm7647_vm14, %v463_v61, -1e+30  ;;  %v464_v47 = vsel %vm73_vm15, %v463_v61, -1e+30 }
 0x4fd   :  { %v471_v3 = vsel %vm292_vm3, %v470_v2, -inf  ;;  %v465_v4 = vsel %vm292_vm3, %v464_v47, -inf  ;;  %v482_v5 = vsel %vm7669_vm1, %v463_v61, -1e+30  ;;  %v476_v6 = vsel %vm7654_vm4, %v463_v61, -1e+30 }
 0x4fe   :  { %472 = vmax.xlane.f32.xlu0 %v471_v3  ;;  %466 = vmax.xlane.f32.xlu1 %v465_v4  ;;  %v483_v7 = vsel %vm292_vm3, %v482_v5, -inf  ;;  %v477_v8 = vsel %vm292_vm3, %v476_v6, -inf }
 0x502   :  { %484 = vmax.xlane.f32.xlu0 %v483_v7  ;;  %478 = vmax.xlane.f32.xlu1 %v477_v8  ;;  %v7105_v7 = vld [vmem:[%s9380_s3] sm:$0xff]  }
 0x58b   :  { %v473_v9 = vpop.xlane.xlu0 %472  ;;  %v467_v10 = vpop.xlane.xlu1 %466 }
 0x58c   :  { %v474_v16 = vmul.f32 %v7680_v37, %v473_v9  ;;  %v468_v19 = vmul.f32 %v7685_v41, %v467_v10  ;;  %v7106_v9 = vld [vmem:[%s9380_s3 + $0x8] sm:$0xff]   ;;  %v7107_v10 = vld [vmem:[%s9380_s3 + $0x10] sm:$0xff]  }
 0x58e   :  { %v475_v23 = vadd.f32 %v474_v16, %v468_v19  ;;  %v7108_v16 = vld [vmem:[%s9380_s3 + $0x18] sm:$0xff]  }
 0x58f   :  { %v485_v20 = vpop.xlane.xlu0 %484  ;;  %v479_v22 = vpop.xlane.xlu1 %478 }
 0x590   :  { %v480_v24 = vmul.f32 %v7690_v45, %v479_v22  ;;  %v486_v25 = vmul.f32 %v7698_v51, %v485_v20 }
 0x592   :  { %v481_v26 = vadd.f32 %v480_v24, %v475_v23 }
 0x594   :  { %v487_v29 = vadd.f32 %v486_v25, %v481_v26  ;;  %v5827_v25 = vld [vmem:[%s9383_s6 + $0x4] ss:$0 sm:$0xff] }
 0x596   :  { %v488_v33 = vsub.f32 %v463_v61, %v487_v29 }
 0x598   :  { %v489_v35 = vmul.f32 1.442695, %v488_v33 }
 0x59a   :  { %7391 = vpow2.f32 %v489_v35 }
 0x5a4   :  { %v7392_v36 = vpop.eup %7391 }
 0x5a5   :  { %v498_v43 = vmul.f32 %v7392_v36, %v7680_v37  ;;  %v491_v44 = vmul.f32 %v7392_v36, %v7685_v41  ;;  %v512_v49 = vmul.f32 %v7392_v36, %v7698_v51  ;;  %v505_v50 = vmul.f32 %v7392_v36, %v7690_v45 }
 0x5a7   :  { %v499_v46 = vsel %vm292_vm3, %v498_v43, 0.0  ;;  %v492_v48 = vsel %vm292_vm3, %v491_v44, 0.0  ;;  %v513_v52 = vsel %vm292_vm3, %v512_v49, 0.0  ;;  %v506_v53 = vsel %vm292_vm3, %v505_v50, 0.0 }
 0x5a8   :  { %500 = vadd.xlane.f32.xlu0 %v499_v46  ;;  %493 = vadd.xlane.f32.xlu1 %v492_v48 }
 0x5ac   :  { %514 = vadd.xlane.f32.xlu0 %v513_v52  ;;  %507 = vadd.xlane.f32.xlu1 %v506_v53 }
 0x635   :  { %v501_v54 = vpop.xlane.xlu0 %500  ;;  %v494_v55 = vpop.xlane.xlu1 %493 }
 0x636   :  { %7393 = vrcp.f32 %v501_v54 }
 0x637   :  { %7395 = vrcp.f32 %v494_v55 }
 0x639   :  { %v515_v57 = vpop.xlane.xlu0 %514  ;;  %v508_v58 = vpop.xlane.xlu1 %507 }
 0x63a   :  { %7397 = vrcp.f32 %v515_v57 }
 0x63b   :  { %7399 = vrcp.f32 %v508_v58 }
 0x640   :  { %v7394_v59 = vpop.eup %7393 }
 0x641   :  { %v7396_v60 = vpop.eup %7395  ;;  %v503_v61 = vmul.f32 %v7394_v59, %v7680_v37  ;;  %v689_v59 = vld [vmem:[%s9381_s4] sm:$0xff] }
 0x642   :  { %v496_v62 = vmul.f32 %v7396_v60, %v7685_v41  ;;  %v697_v60 = vld [vmem:[%s9381_s4 + $0x40] sm:$0xff] }
 0x644   :  { %v7398_v63 = vpop.eup %7397  ;;  %v504_v2 = vadd.f32 %v503_v61, %v496_v62  ;;  %v690_v61 = vld [vmem:[%s9381_s4 + $0x8] sm:$0xff]  ;;  %v5836_v62 = vcombine.high %v689_v59, %v697_v60 }
 0x645   :  { %v7400_v0 = vpop.eup %7399  ;;  %v517_v3 = vmul.f32 %v7398_v63, %v7698_v51  ;;  %v698_v63 = vld [vmem:[%s9381_s4 + $0x48] sm:$0xff] }
 0x646   :  { %v510_v47 = vmul.f32 %v7400_v0, %v7690_v45  ;;  %v5835_v0 = vcombine.low %v689_v59, %v697_v60  ;;  %1158 = vmatprep.subr.bf16.mxu1 %v5836_v62 }
 0x648   :  { %v511_v4 = vadd.f32 %v510_v47, %v504_v2  ;;  %v5837_v2 = vcombine.low %v690_v61, %v698_v63  ;;  %v5838_v47 = vcombine.high %v690_v61, %v698_v63  ;;  %1159 = vmatpush1.bf16.msra.mxu1 %v5835_v0 }
 0x64a   :  { %v518_v5 = vadd.f32 %v517_v3, %v511_v4  ;;  %v705_v3 = vld [vmem:[%s9381_s4 + $0x80] sm:$0xff] }
 0x64b   :  { %v713_v4 = vld [vmem:[%s9381_s4 + $0xc0] sm:$0xff] }
 0x64c   :  { %v519_v6 = vmul.f32 %v7392_v36, %v518_v5  ;;  %v706_v5 = vld [vmem:[%s9381_s4 + $0x88] sm:$0xff] }
 0x64e   :  { %v520_v8 = vpack.c.bf16 %v519_v6, %v519_v6  ;;  %v5852_v6 = vcombine.high %v705_v3, %v713_v4 }
 0x650   :  { %7016 = vmatmul.mubr.msk.bf16.vlgmr.msra.gmra.mrb[4].mxu0 %vm292_vm3, %v520_v8  ;;  %v5851_v8 = vcombine.low %v705_v3, %v713_v4  ;;  %1160 = vmatprep.subr.bf16.mxu1 %v5852_v6  ;;  %v5834_v6 = vld [vmem:[%s9383_s6 + $0x8] ss:$0 sm:$0xff] }
 0x651   :  { %7020 = vmatpush3.bf16.msra.mxu0 %v7105_v7  ;;  %7027 = vmatprep.mubr.msk.bf16.mxu0 %vm7464_vm11, %v7462_v12  ;;  %v714_v7 = vld [vmem:[%s9381_s4 + $0xc8] sm:$0xff] }
 0x652   :  { %7021 = vmatprep.subr.bf16.mxu0 %v7462_v12  ;;  %1161 = vmatpush1.bf16.msra.mxu1 %v5851_v8  ;;  %v707_v8 = vld [vmem:[%s9381_s4 + $0x90] sm:$0xff] }
 0x655   :  { %7022 = vmatpush3.bf16.msra.mxu0 %v7106_v9  ;;  %v5853_v9 = vcombine.low %v706_v5, %v714_v7 }
 0x656   :  { %7023 = vmatprep.subr.bf16.mxu0 %v7462_v12 }
 0x659   :  { %7024 = vmatpush3.bf16.msra.mxu0 %v7107_v10  ;;  %v5854_v10 = vcombine.high %v706_v5, %v714_v7 }
 0x65a   :  { %7025 = vmatprep.subr.bf16.mxu0 %v7462_v12 }
 0x65d   :  { %7026 = vmatpush3.bf16.msra.mxu0 %v7108_v16  ;;  %v721_v16 = vld [vmem:[%s9381_s4 + $0x100] sm:$0xff] }
 0x65e   :  { %1201 = vmatprep.subr.bf16.mxu0 %v5838_v47 }
 0x723   :  { %v560_v19 = vpop.f32.mrb[4].mxu0 }
 0x724   :  { %v566_v20 = vpack.c.bf16 %v560_v19, %v7733_v56  ;;  %v7017_v22 = vpop.f32.mrb[5].mxu0  ;;  %v729_v19 = vld [vmem:[%s9381_s4 + $0x140] sm:$0xff] }
 0x725   :  { %v563_v23 = vpop.f32.mrb[6].mxu0  ;;  %v5868_v22 = vcombine.high %v721_v16, %v729_v19 }
 0x726   :  { %v7018_v24 = vpop.f32.mrb[7].mxu0  ;;  %7028 = vmatmul.mubr.msk.bf16.vlgmr.msra.gmra.mrb[8].mxu0 %vm160_vm10, %v566_v20  ;;  %v722_v20 = vld [vmem:[%s9381_s4 + $0x108] sm:$0xff] }
 0x727   :  { %1233 = vmatprep.mubr.bf16.mxu0 %v7461_v1  ;;  %1202 = vmatpush1.bf16.msra.mxu0 %v5837_v2  ;;  %v730_v23 = vld [vmem:[%s9381_s4 + $0x148] sm:$0xff]  ;;  %v5867_v24 = vcombine.low %v721_v16, %v729_v19  ;;  %v5833_v2 = vld [vmem:[%s9383_s6 + $0x6] ss:$0 sm:$0xff] }
 0x728   :  { %1203 = vmatprep.subr.bf16.mxu0 %v5854_v10  ;;  %1162 = vmatprep.subr.bf16.mxu1 %v5868_v22 }
 0x729   :  { %1163 = vmatpush1.bf16.msra.mxu1 %v5867_v24  ;;  %v731_v24 = vld [vmem:[%s9381_s4 + $0x150] sm:$0xff] }
 0x72b   :  { %1204 = vmatpush1.bf16.msra.mxu0 %v5853_v9  ;;  %v715_v9 = vld [vmem:[%s9381_s4 + $0xd0] sm:$0xff] }
 0x7f9   :  { %v640_v26 = vpop.f32.mrb[8].mxu0 }
 0x7fa   :  { %v641_v29 = vadd.f32 %v5827_v25, %v640_v26  ;;  %v7029_v33 = vpop.f32.mrb[9].mxu0  ;;  %v5870_v26 = vcombine.high %v722_v20, %v730_v23 }
 0x7fb   :  { %v643_v35 = vpop.f32.mrb[10].mxu0  ;;  %v745_v33 = vld [vmem:[%s9381_s4 + $0x1c0] sm:$0xff] }
 0x7fc   :  { %v644_v36 = vadd.f32 %v5827_v25, %v643_v35  ;;  %v7030_v43 = vpop.f32.mrb[11].mxu0  ;;  %v647_v44 = vadd.f32 %v641_v29, %v7584_v27  ;;  %v5869_v25 = vcombine.low %v722_v20, %v730_v23  ;;  %1205 = vmatprep.subr.bf16.mxu0 %v5870_v26  ;;  %v737_v29 = vld [vmem:[%s9381_s4 + $0x180] sm:$0xff]  ;;  %v738_v35 = vld [vmem:[%s9381_s4 + $0x188] sm:$0xff]  ;;  %v5856_v20 = vcombine.high %v707_v8, %v715_v9  ;;  %v723_v23 = vld [vmem:[%s9381_s4 + $0x110] sm:$0xff] }
 0x7fd   :  { %v746_v43 = vld [vmem:[%s9381_s4 + $0x1c8] sm:$0xff]  ;;  %v732_v26 = vld [vmem:[%s9381_s4 + $0x158] sm:$0xff] }
 0x7fe   :  { %v649_v56 = vsel %vm160_vm10, %v647_v44, 0.0  ;;  %v648_v46 = vadd.f32 %v644_v36, %v7586_v28  ;;  %1206 = vmatpush1.bf16.msra.mxu0 %v5869_v25  ;;  %v5884_v36 = vcombine.high %v737_v29, %v745_v33  ;;  %v724_v25 = vld [vmem:[%s9381_s4 + $0x118] sm:$0xff] }
 0x7ff   :  { %650 = vadd.xlane.f32.xlu1 %v649_v56  ;;  %v5885_v56 = vcombine.low %v738_v35, %v746_v43 }
 0x800   :  { %v652_v48 = vsel %vm160_vm10, %v648_v46, 0.0  ;;  %1164 = vmatprep.subr.bf16.mxu1 %v5884_v36  ;;  %v5874_v36 = vcombine.high %v724_v25, %v732_v26 }
 0x801   :  { %653 = vadd.xlane.f32.xlu0 %v652_v48  ;;  %v691_v48 = vld [vmem:[%s9381_s4 + $0x10] sm:$0xff] }
 0x88c   :  { %v651_v49 = vpop.xlane.xlu1 %650 }
 0x88d   :  { %v656_v50 = vmul.f32 0.015625, %v651_v49  ;;  %v699_v49 = vld [vmem:[%s9381_s4 + $0x50] sm:$0xff] }
 0x88e   :  { %v654_v52 = vpop.xlane.xlu0 %653 }
 0x88f   :  { %v7791_v53 = vsub.f32 %v647_v44, %v656_v50  ;;  %v657_v54 = vmul.f32 0.015625, %v654_v52  ;;  %v5883_v44 = vcombine.low %v737_v29, %v745_v33  ;;  %v692_v50 = vld [vmem:[%s9381_s4 + $0x18] sm:$0xff]  ;;  %v5840_v52 = vcombine.high %v691_v48, %v699_v49 }
 0x890   :  { %v5855_v29 = vcombine.low %v707_v8, %v715_v9  ;;  %v726_v8 = vld [vmem:[%s9381_s4 + $0x128] sm:$0xff] }
 0x891   :  { %v7793_v55 = vsub.f32 %v648_v46, %v657_v54  ;;  %v660_v57 = vmul.f32 %v7791_v53, %v7791_v53  ;;  %v5886_v46 = vcombine.high %v738_v35, %v746_v43  ;;  %1165 = vmatpush1.bf16.msra.mxu1 %v5883_v44  ;;  %v700_v54 = vld [vmem:[%s9381_s4 + $0x58] sm:$0xff]  ;;  %v5872_v35 = vcombine.high %v723_v23, %v731_v24  ;;  %v739_v43 = vld [vmem:[%s9381_s4 + $0x190] sm:$0xff]  ;;  %v734_v9 = vld [vmem:[%s9381_s4 + $0x168] sm:$0xff] }
 0x892   :  { %1244 = vmatprep.subr.bf16.mxu1 %v5840_v52  ;;  %v747_v44 = vld [vmem:[%s9381_s4 + $0x1d0] sm:$0xff] }
 0x893   :  { %v662_v27 = vsel %vm160_vm10, %v660_v57, 0.0  ;;  %v661_v28 = vmul.f32 %v7793_v55, %v7793_v55  ;;  %1207 = vmatprep.subr.bf16.mxu0 %v5886_v46  ;;  %v5839_v57 = vcombine.low %v691_v48, %v699_v49  ;;  %v748_v46 = vld [vmem:[%s9381_s4 + $0x1d8] sm:$0xff]  ;;  %v5871_v48 = vcombine.low %v723_v23, %v731_v24  ;;  %v741_v23 = vld [vmem:[%s9381_s4 + $0x1a0] sm:$0xff] }
 0x894   :  { %663 = vadd.xlane.f32.xlu1 %v662_v27  ;;  %1208 = vmatpush1.bf16.msra.mxu0 %v5885_v56  ;;  %v5841_v27 = vcombine.low %v692_v50, %v700_v54  ;;  %v740_v56 = vld [vmem:[%s9381_s4 + $0x198] sm:$0xff]  ;;  %v5873_v49 = vcombine.low %v724_v25, %v732_v26  ;;  %v749_v24 = vld [vmem:[%s9381_s4 + $0x1e0] sm:$0xff]  ;;  %v742_v25 = vld [vmem:[%s9381_s4 + $0x1a8] sm:$0xff] }
 0x895   :  { %v665_v58 = vsel %vm160_vm10, %v661_v28, 0.0  ;;  %v5842_v28 = vcombine.high %v692_v50, %v700_v54  ;;  %v5888_v50 = vcombine.high %v739_v43, %v747_v44  ;;  %v5890_v52 = vcombine.high %v740_v56, %v748_v46  ;;  %v693_v54 = vld [vmem:[%s9381_s4 + $0x20] sm:$0xff]  ;;  %v750_v26 = vld [vmem:[%s9381_s4 + $0x1e8] sm:$0xff] }
 0x896   :  { %666 = vadd.xlane.f32.xlu0 %v665_v58 }
 0x897   :  { %1287 = vmatprep.subr.bf16.mxu0 %v5842_v28  ;;  %v702_v28 = vld [vmem:[%s9381_s4 + $0x68] sm:$0xff] }
 0x921   :  { %v664_v58 = vpop.xlane.xlu1 %663 }
 0x922   :  { %v668_v59 = vmul.f32 0.015625, %v664_v58  ;;  %v5887_v58 = vcombine.low %v739_v43, %v747_v44  ;;  %v695_v43 = vld [vmem:[%s9381_s4 + $0x30] sm:$0xff] }
 0x923   :  { %v667_v60 = vpop.xlane.xlu0 %666  ;;  %v703_v44 = vld [vmem:[%s9381_s4 + $0x70] sm:$0xff] }
 0x924   :  { %v670_v61 = vadd.f32 1e-05, %v668_v59  ;;  %v669_v62 = vmul.f32 0.015625, %v667_v60  ;;  %v5889_v59 = vcombine.low %v740_v56, %v748_v46  ;;  %v696_v56 = vld [vmem:[%s9381_s4 + $0x38] sm:$0xff] }
 0x925   :  { %v704_v46 = vld [vmem:[%s9381_s4 + $0x78] sm:$0xff] }
 0x926   :  { %7401 = vrsqrt.f32 %v670_v61  ;;  %v671_v63 = vadd.f32 1e-05, %v669_v62  ;;  %v709_v62 = vld [vmem:[%s9381_s4 + $0xa0] sm:$0xff] }
 0x928   :  { %7403 = vrsqrt.f32 %v671_v63  ;;  %v717_v63 = vld [vmem:[%s9381_s4 + $0xe0] sm:$0xff] }
 0x930   :  { %v7402_v0 = vpop.eup %7401 }
 0x931   :  { %v674_v47 = vmul.f32 %v7402_v0, %v7791_v53  ;;  %v708_v53 = vld [vmem:[%s9381_s4 + $0x98] sm:$0xff]  ;;  %v710_v0 = vld [vmem:[%s9381_s4 + $0xa8] sm:$0xff] }
 0x932   :  { %v7404_v3 = vpop.eup %7403 }
 0x933   :  { %v680_v4 = vmul.f32 %v5833_v2, %v674_v47  ;;  %v675_v5 = vmul.f32 %v7404_v3, %v7793_v55  ;;  %v716_v55 = vld [vmem:[%s9381_s4 + $0xd8] sm:$0xff] }
 0x934   :  { %v5858_v22 = vcombine.high %v708_v53, %v716_v55  ;;  %v5857_v33 = vcombine.low %v708_v53, %v716_v55  ;;  %v5859_v53 = vcombine.low %v709_v62, %v717_v63 }
 0x935   :  { %v681_v7 = vmul.f32 %v5833_v2, %v675_v5  ;;  %v7881_v10 = vadd.f32 %v5834_v6, %v680_v4  ;;  %v718_v2 = vld [vmem:[%s9381_s4 + $0xe8] sm:$0xff]  ;;  %v5860_v4 = vcombine.high %v709_v62, %v717_v63  ;;  %v727_v62 = vld [vmem:[%s9381_s4 + $0x130] sm:$0xff] }
 0x936   :  { %v5862_v5 = vcombine.high %v710_v0, %v718_v2  ;;  %v5861_v55 = vcombine.low %v710_v0, %v718_v2  ;;  %v735_v63 = vld [vmem:[%s9381_s4 + $0x170] sm:$0xff]  ;;  %v728_v0 = vld [vmem:[%s9381_s4 + $0x138] sm:$0xff] }
 0x937   :  { %v7883_v16 = vadd.f32 %v5834_v6, %v681_v7  ;;  %v725_v6 = vld [vmem:[%s9381_s4 + $0x120] sm:$0xff]  ;;  %v736_v2 = vld [vmem:[%s9381_s4 + $0x178] sm:$0xff] }
 0x938   :  { %v733_v7 = vld [vmem:[%s9381_s4 + $0x160] sm:$0xff] }
 0x939   :  { %v7887_v19 = vpack.c.bf16 %v7883_v16, %v7881_v10 }
 0x93b   :  { %5899 = vmatmul.mubr.msk.bf16.vlgmr.msra.gmra.mrb[12].mxu1 %vm160_vm10, %v7887_v19  ;;  %5900 = vmatmul.mubr.msk.bf16.vlgmr.msra.gmra.mrb[12].mxu0 %vm160_vm10, %v7887_v19 }
 0x93c   :  { %1245 = vmatpush1.bf16.msra.mxu1 %v5839_v57  ;;  %1288 = vmatpush1.bf16.msra.mxu0 %v5841_v27  ;;  %v701_v57 = vld [vmem:[%s9381_s4 + $0x60] sm:$0xff]  ;;  %v694_v27 = vld [vmem:[%s9381_s4 + $0x28] sm:$0xff] }
 0x93d   :  { %1246 = vmatprep.subr.bf16.mxu1 %v5856_v20  ;;  %1289 = vmatprep.subr.bf16.mxu0 %v5858_v22  ;;  %v5844_v60 = vcombine.high %v693_v54, %v701_v57  ;;  %v5846_v61 = vcombine.high %v694_v27, %v702_v28  ;;  %v5843_v47 = vcombine.low %v693_v54, %v701_v57  ;;  %v711_v54 = vld [vmem:[%s9381_s4 + $0xb0] sm:$0xff] }
 0x93e   :  { %1276 = vmatprep.mubr.bf16.mxu1 %v7461_v1  ;;  %1319 = vmatprep.mubr.bf16.mxu0 %v7461_v1  ;;  %v5845_v3 = vcombine.low %v694_v27, %v702_v28  ;;  %v5876_v20 = vcombine.high %v725_v6, %v733_v7  ;;  %v5878_v22 = vcombine.high %v726_v8, %v734_v9  ;;  %v719_v57 = vld [vmem:[%s9381_s4 + $0xf0] sm:$0xff]  ;;  %v712_v27 = vld [vmem:[%s9381_s4 + $0xb8] sm:$0xff] }
 0x93f   :  { %v720_v28 = vld [vmem:[%s9381_s4 + $0xf8] sm:$0xff] }
 0x940   :  { %1247 = vmatpush1.bf16.msra.mxu1 %v5855_v29  ;;  %1290 = vmatpush1.bf16.msra.mxu0 %v5857_v33  ;;  %v5875_v29 = vcombine.low %v725_v6, %v733_v7  ;;  %v5877_v33 = vcombine.low %v726_v8, %v734_v9  ;;  %v743_v6 = vld [vmem:[%s9381_s4 + $0x1b0] sm:$0xff]  ;;  %v744_v8 = vld [vmem:[%s9381_s4 + $0x1b8] sm:$0xff] }
 0x941   :  { %1248 = vmatprep.subr.bf16.mxu1 %v5872_v35  ;;  %1291 = vmatprep.subr.bf16.mxu0 %v5874_v36  ;;  %v5892_v35 = vcombine.high %v741_v23, %v749_v24  ;;  %v5894_v36 = vcombine.high %v742_v25, %v750_v26  ;;  %v751_v7 = vld [vmem:[%s9381_s4 + $0x1f0] sm:$0xff]  ;;  %v752_v9 = vld [vmem:[%s9381_s4 + $0x1f8] sm:$0xff] }
 0x944   :  { %1249 = vmatpush1.bf16.msra.mxu1 %v5871_v48  ;;  %1292 = vmatpush1.bf16.msra.mxu0 %v5873_v49  ;;  %v5891_v48 = vcombine.low %v741_v23, %v749_v24  ;;  %v5893_v49 = vcombine.low %v742_v25, %v750_v26  ;;  %v5895_v23 = vcombine.low %v743_v6, %v751_v7  ;;  %v7109_v25 = vld [vmem:[%s9382_s5 + $0x40] sm:$0xff]  }
 0x945   :  { %1250 = vmatprep.subr.bf16.mxu1 %v5888_v50  ;;  %1293 = vmatprep.subr.bf16.mxu0 %v5890_v52  ;;  %v5848_v50 = vcombine.high %v695_v43, %v703_v44  ;;  %v5850_v52 = vcombine.high %v696_v56, %v704_v46  ;;  %v5897_v24 = vcombine.low %v744_v8, %v752_v9  ;;  %v7110_v26 = vld [vmem:[%s9382_s5 + $0xc0] sm:$0xff]  }
 0x948   :  { %1251 = vmatpush1.bf16.msra.mxu1 %v5887_v58  ;;  %1294 = vmatpush1.bf16.msra.mxu0 %v5889_v59  ;;  %v5847_v58 = vcombine.low %v695_v43, %v703_v44  ;;  %v5849_v59 = vcombine.low %v696_v56, %v704_v46  ;;  %v7115_v43 = vld [vmem:[%s9382_s5 + $0x8] sm:$0xff]   ;;  %v7117_v56 = vld [vmem:[%s9382_s5 + $0x50] sm:$0xff]  }
 0x949   :  { %1330 = vmatprep.subr.bf16.mxu1 %v5844_v60  ;;  %1373 = vmatprep.subr.bf16.mxu0 %v5846_v61  ;;  %v5864_v60 = vcombine.high %v711_v54, %v719_v57  ;;  %v5866_v61 = vcombine.high %v712_v27, %v720_v28  ;;  %v7116_v44 = vld [vmem:[%s9382_s5 + $0x88] sm:$0xff]   ;;  %v7119_v46 = vld [vmem:[%s9382_s5 + $0x10] sm:$0xff]  }
 0x94b   :  { %5901 = vmatmul.mubr.msk.bf16.vlgmr.msra.gmra.mrb[16].mxu1 %vm160_vm10, %v7887_v19  ;;  %5902 = vmatmul.mubr.msk.bf16.vlgmr.msra.gmra.mrb[16].mxu0 %vm160_vm10, %v7887_v19 }
 0x94c   :  { %1331 = vmatpush1.bf16.msra.mxu1 %v5843_v47  ;;  %1374 = vmatpush1.bf16.msra.mxu0 %v5845_v3  ;;  %v5863_v47 = vcombine.low %v711_v54, %v719_v57  ;;  %v5865_v3 = vcombine.low %v712_v27, %v720_v28  ;;  %v7124_v54 = vld [vmem:[%s9382_s5 + $0x98] sm:$0xff]   ;;  %v7125_v57 = vld [vmem:[%s9382_s5 + $0x60] sm:$0xff]  }
 0x94d   :  { %1332 = vmatprep.subr.bf16.mxu1 %v5860_v4  ;;  %1375 = vmatprep.subr.bf16.mxu0 %v5862_v5  ;;  %v5880_v4 = vcombine.high %v727_v62, %v735_v63  ;;  %v5882_v5 = vcombine.high %v728_v0, %v736_v2  ;;  %v7126_v27 = vld [vmem:[%s9382_s5 + $0xe0] sm:$0xff]  }
 0x94e   :  { %1362 = vmatprep.mubr.bf16.mxu1 %v7461_v1  ;;  %1405 = vmatprep.mubr.bf16.mxu0 %v7461_v1  ;;  %v7127_v28 = vld [vmem:[%s9382_s5 + $0x20] sm:$0xff]  }
 0x950   :  { %1333 = vmatpush1.bf16.msra.mxu1 %v5859_v53  ;;  %1376 = vmatpush1.bf16.msra.mxu0 %v5861_v55  ;;  %v5879_v53 = vcombine.low %v727_v62, %v735_v63  ;;  %v5881_v55 = vcombine.low %v728_v0, %v736_v2  ;;  %v7132_v62 = vld [vmem:[%s9382_s5 + $0xa8] sm:$0xff]   ;;  %v7133_v63 = vld [vmem:[%s9382_s5 + $0x70] sm:$0xff]  }
 0x951   :  { %1334 = vmatprep.subr.bf16.mxu1 %v5876_v20  ;;  %1377 = vmatprep.subr.bf16.mxu0 %v5878_v22  ;;  %v5896_v20 = vcombine.high %v743_v6, %v751_v7  ;;  %v5898_v22 = vcombine.high %v744_v8, %v752_v9  ;;  %v7134_v0 = vld [vmem:[%s9382_s5 + $0xf0] sm:$0xff]   ;;  %v7140_v6 = vld [vmem:[%s9382_s5 + $0xb8] sm:$0xff]   ;;  %v7141_v7 = vld [vmem:[%s9382_s5 + $0x140] sm:$0xff]   ;;  %v8134_v9 = vsub.s32 2, %v7591_v30 }
 0x952   :  { %v7135_v2 = vld [vmem:[%s9382_s5 + $0x30] sm:$0xff]   ;;  %v7142_v8 = vld [vmem:[%s9382_s5 + $0x1c0] sm:$0xff]  }
 0x954   :  { %1335 = vmatpush1.bf16.msra.mxu1 %v5875_v29  ;;  %1378 = vmatpush1.bf16.msra.mxu0 %v5877_v33  ;;  %v7111_v29 = vld [vmem:[%s9382_s5] sm:$0xff]  }
 0x955   :  { %1336 = vmatprep.subr.bf16.mxu1 %v5892_v35  ;;  %1379 = vmatprep.subr.bf16.mxu0 %v5894_v36  ;;  %v7112_v33 = vld [vmem:[%s9382_s5 + $0x80] sm:$0xff]   ;;  %v7113_v35 = vld [vmem:[%s9382_s5 + $0x48] sm:$0xff]  }
 0x956   :  { %v7114_v36 = vld [vmem:[%s9382_s5 + $0xc8] sm:$0xff]  }
 0x958   :  { %1337 = vmatpush1.bf16.msra.mxu1 %v5891_v48  ;;  %1380 = vmatpush1.bf16.msra.mxu0 %v5893_v49  ;;  %v7120_v48 = vld [vmem:[%s9382_s5 + $0x90] sm:$0xff]   ;;  %v7121_v49 = vld [vmem:[%s9382_s5 + $0x58] sm:$0xff]  }
 0x959   :  { %1416 = vmatprep.subr.bf16.mxu1 %v5848_v50  ;;  %1459 = vmatprep.subr.bf16.mxu0 %v5850_v52  ;;  %v7122_v50 = vld [vmem:[%s9382_s5 + $0xd8] sm:$0xff]  }
 0x95a   :  { %v7123_v52 = vld [vmem:[%s9382_s5 + $0x18] sm:$0xff]  }
 0x95b   :  { %5903 = vmatmul.mubr.msk.bf16.vlgmr.msra.gmra.mrb[20].mxu1 %vm160_vm10, %v7887_v19  ;;  %5904 = vmatmul.mubr.msk.bf16.vlgmr.msra.gmra.mrb[20].mxu0 %vm160_vm10, %v7887_v19 }
 0x95c   :  { %1417 = vmatpush1.bf16.msra.mxu1 %v5847_v58  ;;  %1460 = vmatpush1.bf16.msra.mxu0 %v5849_v59  ;;  %v7128_v58 = vld [vmem:[%s9382_s5 + $0xa0] sm:$0xff]   ;;  %v7129_v59 = vld [vmem:[%s9382_s5 + $0x68] sm:$0xff]  }
 0x95d   :  { %1418 = vmatprep.subr.bf16.mxu1 %v5864_v60  ;;  %1461 = vmatprep.subr.bf16.mxu0 %v5866_v61  ;;  %v7130_v60 = vld [vmem:[%s9382_s5 + $0xe8] sm:$0xff]  }
 0x95e   :  { %1448 = vmatprep.mubr.bf16.mxu1 %v7461_v1  ;;  %1491 = vmatprep.mubr.bf16.mxu0 %v7461_v1  ;;  %v7131_v61 = vld [vmem:[%s9382_s5 + $0x28] sm:$0xff]  }
 0x960   :  { %1419 = vmatpush1.bf16.msra.mxu1 %v5863_v47  ;;  %1462 = vmatpush1.bf16.msra.mxu0 %v5865_v3  ;;  %v7136_v47 = vld [vmem:[%s9382_s5 + $0xb0] sm:$0xff]   ;;  %v7137_v3 = vld [vmem:[%s9382_s5 + $0x78] sm:$0xff]  }
 0x961   :  { %1420 = vmatprep.subr.bf16.mxu1 %v5880_v4  ;;  %1463 = vmatprep.subr.bf16.mxu0 %v5882_v5  ;;  %v7138_v4 = vld [vmem:[%s9382_s5 + $0xf8] sm:$0xff]  }
 0x962   :  { %v7139_v5 = vld [vmem:[%s9382_s5 + $0x38] sm:$0xff]  }
 0x964   :  { %1421 = vmatpush1.bf16.msra.mxu1 %v5879_v53  ;;  %1464 = vmatpush1.bf16.msra.mxu0 %v5881_v55  ;;  %v5812_v53 = vld [vmem:[%s9383_s6 + $0xa] ss:$2 sm:$0xff]  ;;  %v8140_v55 = vsub.s32 3, %v7591_v30 }
 0x965   :  { %1422 = vmatprep.subr.bf16.mxu1 %v5896_v20  ;;  %1465 = vmatprep.subr.bf16.mxu0 %v5898_v22  ;;  %v758_v20 = vrot.slane %v5812_v53, %v7594_v32  ;;  %v766_v22 = vrot.slane %v5812_v53, %v8134_v9 }
 0x968   :  { %1423 = vmatpush1.bf16.msra.mxu1 %v5895_v23  ;;  %1466 = vmatpush1.bf16.msra.mxu0 %v5897_v24  ;;  %v762_v23 = vrot.slane %v5812_v53, %v7600_v34  ;;  %v770_v24 = vrot.slane %v5812_v53, %v8140_v55 }
 0x969   :  { %6618 = vmatprep.subr.bf16.mxu1 %v7109_v25  ;;  %6640 = vmatprep.subr.bf16.mxu0 %v7110_v26 }
 0x96b   :  { %5905 = vmatmul.mubr.msk.bf16.vlgmr.msra.gmra.mrb[24].mxu1 %vm160_vm10, %v7887_v19  ;;  %5906 = vmatmul.mubr.msk.bf16.vlgmr.msra.gmra.mrb[24].mxu0 %vm160_vm10, %v7887_v19  ;;  %v7118_v19 = vld [vmem:[%s9382_s5 + $0xd0] sm:$0xff]  }
 0x96c   :  { %6619 = vmatpush3.bf16.msra.mxu1 %v7111_v29  ;;  %6641 = vmatpush3.bf16.msra.mxu0 %v7112_v33 }
 0x96d   :  { %6620 = vmatprep.subr.bf16.mxu1 %v7113_v35  ;;  %6642 = vmatprep.subr.bf16.mxu0 %v7114_v36 }
 0x970   :  { %6621 = vmatpush3.bf16.msra.mxu1 %v7115_v43  ;;  %6643 = vmatpush3.bf16.msra.mxu0 %v7116_v44 }
 0x971   :  { %6622 = vmatprep.subr.bf16.mxu1 %v7117_v56  ;;  %6644 = vmatprep.subr.bf16.mxu0 %v7118_v19 }
 0x974   :  { %6623 = vmatpush3.bf16.msra.mxu1 %v7119_v46  ;;  %6645 = vmatpush3.bf16.msra.mxu0 %v7120_v48 }
 0x975   :  { %6624 = vmatprep.subr.bf16.mxu1 %v7121_v49  ;;  %6646 = vmatprep.subr.bf16.mxu0 %v7122_v50 }
 0x978   :  { %6625 = vmatpush3.bf16.msra.mxu1 %v7123_v52  ;;  %6647 = vmatpush3.bf16.msra.mxu0 %v7124_v54 }
 0x979   :  { %6626 = vmatprep.subr.bf16.mxu1 %v7125_v57  ;;  %6648 = vmatprep.subr.bf16.mxu0 %v7126_v27 }
 0x97c   :  { %6627 = vmatpush3.bf16.msra.mxu1 %v7127_v28  ;;  %6649 = vmatpush3.bf16.msra.mxu0 %v7128_v58 }
 0x97d   :  { %6628 = vmatprep.subr.bf16.mxu1 %v7129_v59  ;;  %6650 = vmatprep.subr.bf16.mxu0 %v7130_v60 }
 0x980   :  { %6629 = vmatpush3.bf16.msra.mxu1 %v7131_v61  ;;  %6651 = vmatpush3.bf16.msra.mxu0 %v7132_v62 }
 0x981   :  { %6630 = vmatprep.subr.bf16.mxu1 %v7133_v63  ;;  %6652 = vmatprep.subr.bf16.mxu0 %v7134_v0 }
 0x984   :  { %6631 = vmatpush3.bf16.msra.mxu1 %v7135_v2  ;;  %6653 = vmatpush3.bf16.msra.mxu0 %v7136_v47 }
 0x985   :  { %6632 = vmatprep.subr.bf16.mxu1 %v7137_v3  ;;  %6654 = vmatprep.subr.bf16.mxu0 %v7138_v4  ;;  %v7143_v3 = vld [vmem:[%s9382_s5 + $0x100] sm:$0xff]  }
 0x986   :  { %v7144_v4 = vld [vmem:[%s9382_s5 + $0x180] sm:$0xff]  }
 0x988   :  { %6633 = vmatpush3.bf16.msra.mxu1 %v7139_v5  ;;  %6655 = vmatpush3.bf16.msra.mxu0 %v7140_v6  ;;  %v7145_v5 = vld [vmem:[%s9382_s5 + $0x148] sm:$0xff]  }
 0x989   :  { %6662 = vmatprep.subr.bf16.mxu1 %v7141_v7  ;;  %6684 = vmatprep.subr.bf16.mxu0 %v7142_v8  ;;  %v7146_v6 = vld [vmem:[%s9382_s5 + $0x1c8] sm:$0xff]   ;;  %v8159_v7 = vsub.s32 4, %v7591_v30  ;;  %v8162_v8 = vsub.s32 6, %v7591_v30 }
 0xa0e   :  { %v1192_v25 = vpop.f32.mrb[12].mxu1  ;;  %v1235_v26 = vpop.f32.mrb[12].mxu0 }
 0xa0f   :  { %v1193_v29 = vadd.f32 %v1192_v25, %v758_v20  ;;  %v1236_v33 = vadd.f32 %v1235_v26, %v766_v22  ;;  %v1194_v35 = vpop.f32.mrb[13].mxu1  ;;  %v1237_v36 = vpop.f32.mrb[13].mxu0  ;;  %v774_v25 = vrot.slane %v5812_v53, %v8159_v7  ;;  %v782_v26 = vrot.slane %v5812_v53, %v8162_v8 }
 0xa10   :  { %v1195_v43 = vadd.f32 %v1194_v35, %v762_v23  ;;  %v1238_v44 = vadd.f32 %v1237_v36, %v770_v24  ;;  %v1196_v56 = vpop.f32.mrb[14].mxu1  ;;  %v1239_v19 = vpop.f32.mrb[14].mxu0 }
 0xa11   :  { %v1197_v46 = vadd.f32 %v1196_v56, %v758_v20  ;;  %v1240_v48 = vadd.f32 %v1239_v19, %v766_v22  ;;  %v1198_v49 = vpop.f32.mrb[15].mxu1  ;;  %v1241_v50 = vpop.f32.mrb[15].mxu0  ;;  %v1502_v57 = vmax.f32 %v1193_v29, 0.0  ;;  %v1504_v27 = vmax.f32 %v1236_v33, 0.0  ;;  %v7150_v29 = vld [vmem:[%s9382_s5 + $0x1d0] sm:$0xff]  }
 0xa12   :  { %v1199_v52 = vadd.f32 %v1198_v49, %v762_v23  ;;  %v1242_v54 = vadd.f32 %v1241_v50, %v770_v24  ;;  %v1503_v59 = vmax.f32 %v1195_v43, 0.0  ;;  %v1505_v60 = vmax.f32 %v1238_v44, 0.0  ;;  %v7147_v23 = vld [vmem:[%s9382_s5 + $0x108] sm:$0xff]   ;;  %v7151_v44 = vld [vmem:[%s9382_s5 + $0x110] sm:$0xff]   ;;  %v7154_v50 = vld [vmem:[%s9382_s5 + $0x1d8] sm:$0xff]  }
 0xa13   :  { %v1518_v28 = vmax.f32 %v1197_v46, 0.0  ;;  %v1520_v58 = vmax.f32 %v1240_v48, 0.0  ;;  %v8165_v20 = vsub.s32 5, %v7591_v30  ;;  %v8168_v22 = vsub.s32 7, %v7591_v30  ;;  %v7148_v24 = vld [vmem:[%s9382_s5 + $0x188] sm:$0xff]   ;;  %v7149_v30 = vld [vmem:[%s9382_s5 + $0x150] sm:$0xff]  }
 0xa14   :  { %v1519_v61 = vmax.f32 %v1199_v52, 0.0  ;;  %v1521_v62 = vmax.f32 %v1242_v54, 0.0  ;;  %v7152_v56 = vld [vmem:[%s9382_s5 + $0x190] sm:$0xff]  }
 0xa15   :  { %v1534_v63 = vpack.c.bf16 %v1518_v28, %v1502_v57  ;;  %v1536_v0 = vpack.c.bf16 %v1520_v58, %v1504_v27  ;;  %v778_v33 = vrot.slane %v5812_v53, %v8165_v20  ;;  %v786_v35 = vrot.slane %v5812_v53, %v8168_v22  ;;  %v7153_v53 = vld [vmem:[%s9382_s5 + $0x158] sm:$0xff]  }
 0xa16   :  { %v1535_v2 = vpack.c.bf16 %v1519_v61, %v1503_v59  ;;  %v1537_v47 = vpack.c.bf16 %v1521_v62, %v1505_v60 }
 0xa18   :  { %2610 = vmatprep.mubr.bf16.mxu1 %v1535_v2  ;;  %2651 = vmatprep.mubr.bf16.mxu0 %v1537_v47 }
 0xa19   :  { %2611 = vmatmul.mubr.bf16.vlgmr.msra.gmra.mrb[28].mxu1 %v1534_v63  ;;  %2652 = vmatmul.mubr.bf16.vlgmr.msra.gmra.mrb[28].mxu0 %v1536_v0  ;;  %v7155_v63 = vld [vmem:[%s9382_s5 + $0x118] sm:$0xff]  }
 0xa1a   :  { %6663 = vmatpush3.bf16.msra.mxu1 %v7143_v3  ;;  %6685 = vmatpush3.bf16.msra.mxu0 %v7144_v4  ;;  %v7156_v0 = vld [vmem:[%s9382_s5 + $0x198] sm:$0xff]  }
 0xa1b   :  { %6664 = vmatprep.subr.bf16.mxu1 %v7145_v5  ;;  %6686 = vmatprep.subr.bf16.mxu0 %v7146_v6  ;;  %v7157_v5 = vld [vmem:[%s9382_s5 + $0x160] sm:$0xff]  }
 0xa1c   :  { %v7158_v6 = vld [vmem:[%s9382_s5 + $0x1e0] sm:$0xff]  }
 0xa1e   :  { %v1278_v36 = vpop.f32.mrb[16].mxu1  ;;  %v1321_v43 = vpop.f32.mrb[16].mxu0  ;;  %6665 = vmatpush3.bf16.msra.mxu1 %v7147_v23  ;;  %6687 = vmatpush3.bf16.msra.mxu0 %v7148_v24 }
 0xa1f   :  { %v1279_v19 = vadd.f32 %v1278_v36, %v774_v25  ;;  %v1322_v46 = vadd.f32 %v1321_v43, %v782_v26  ;;  %v1280_v48 = vpop.f32.mrb[17].mxu1  ;;  %v1323_v49 = vpop.f32.mrb[17].mxu0  ;;  %6666 = vmatprep.subr.bf16.mxu1 %v7149_v30  ;;  %6688 = vmatprep.subr.bf16.mxu0 %v7150_v29  ;;  %v7159_v36 = vld [vmem:[%s9382_s5 + $0x120] sm:$0xff]  }
 0xa20   :  { %v1281_v52 = vadd.f32 %v1280_v48, %v778_v33  ;;  %v1324_v54 = vadd.f32 %v1323_v49, %v786_v35  ;;  %v1282_v57 = vpop.f32.mrb[18].mxu1  ;;  %v1325_v27 = vpop.f32.mrb[18].mxu0  ;;  %v7160_v43 = vld [vmem:[%s9382_s5 + $0x1a0] sm:$0xff]   ;;  %v7164_v48 = vld [vmem:[%s9382_s5 + $0x1a8] sm:$0xff]  }
 0xa21   :  { %v1283_v28 = vadd.f32 %v1282_v57, %v774_v25  ;;  %v1326_v58 = vadd.f32 %v1325_v27, %v782_v26  ;;  %v1284_v59 = vpop.f32.mrb[19].mxu1  ;;  %v1327_v60 = vpop.f32.mrb[19].mxu0  ;;  %v1506_v2 = vmax.f32 %v1279_v19, 0.0  ;;  %v1508_v47 = vmax.f32 %v1322_v46, 0.0  ;;  %v8229_v19 = vld [vmem:[%s9383_s6 + $0x1a] ss:$2 sm:$0xff] }
 0xa22   :  { %v1285_v61 = vadd.f32 %v1284_v59, %v778_v33  ;;  %v1328_v62 = vadd.f32 %v1327_v60, %v786_v35  ;;  %6667 = vmatpush3.bf16.msra.mxu1 %v7151_v44  ;;  %6689 = vmatpush3.bf16.msra.mxu0 %v7152_v56  ;;  %v1507_v23 = vmax.f32 %v1281_v52, 0.0  ;;  %v1509_v24 = vmax.f32 %v1324_v54, 0.0  ;;  %v7161_v44 = vld [vmem:[%s9382_s5 + $0x168] sm:$0xff]   ;;  %v7166_v52 = vld [vmem:[%s9382_s5 + $0x1f0] sm:$0xff]  }
 0xa23   :  { %v1522_v3 = vmax.f32 %v1283_v28, 0.0  ;;  %v1524_v4 = vmax.f32 %v1326_v58, 0.0  ;;  %6668 = vmatprep.subr.bf16.mxu1 %v7153_v53  ;;  %6690 = vmatprep.subr.bf16.mxu0 %v7154_v50  ;;  %v7162_v56 = vld [vmem:[%s9382_s5 + $0x1e8] sm:$0xff]   ;;  %v790_v49 = vrot.slane %v8229_v19, %v7594_v32  ;;  %v798_v53 = vrot.slane %v8229_v19, %v8134_v9  ;;  %v7165_v50 = vld [vmem:[%s9382_s5 + $0x170] sm:$0xff]  }
 0xa24   :  { %v1523_v25 = vmax.f32 %v1285_v61, 0.0  ;;  %v1525_v26 = vmax.f32 %v1328_v62, 0.0  ;;  %v7163_v46 = vld [vmem:[%s9382_s5 + $0x128] sm:$0xff]   ;;  %v794_v54 = vrot.slane %v8229_v19, %v7600_v34  ;;  %v802_v57 = vrot.slane %v8229_v19, %v8140_v55  ;;  %v7167_v58 = vld [vmem:[%s9382_s5 + $0x130] sm:$0xff]  }
 0xa25   :  { %v8210_v30 = vpack.c.bf16 %v1522_v3, %v1506_v2  ;;  %v8212_v29 = vpack.c.bf16 %v1524_v4, %v1508_v47  ;;  %v7168_v59 = vld [vmem:[%s9382_s5 + $0x1b0] sm:$0xff]   ;;  %v7170_v2 = vld [vmem:[%s9382_s5 + $0x1f8] sm:$0xff]  }
 0xa26   :  { %v1539_v33 = vpack.c.bf16 %v1523_v25, %v1507_v23  ;;  %v1541_v35 = vpack.c.bf16 %v1525_v26, %v1509_v24  ;;  %6669 = vmatpush3.bf16.msra.mxu1 %v7155_v63  ;;  %6691 = vmatpush3.bf16.msra.mxu0 %v7156_v0  ;;  %v7169_v0 = vld [vmem:[%s9382_s5 + $0x178] sm:$0xff]  }
 0xa27   :  { %6670 = vmatprep.subr.bf16.mxu1 %v7157_v5  ;;  %6692 = vmatprep.subr.bf16.mxu0 %v7158_v6 }
 0xa28   :  { %2692 = vmatprep.mubr.bf16.mxu1 %v1539_v33  ;;  %2733 = vmatprep.mubr.bf16.mxu0 %v1541_v35  ;;  %v7171_v35 = vld [vmem:[%s9382_s5 + $0x138] sm:$0xff]  }
 0xa2a   :  { %6671 = vmatpush3.bf16.msra.mxu1 %v7159_v36  ;;  %6693 = vmatpush3.bf16.msra.mxu0 %v7160_v43  ;;  %v7172_v36 = vld [vmem:[%s9382_s5 + $0x1b8] sm:$0xff]  }
 0xa2b   :  { %6672 = vmatprep.subr.bf16.mxu1 %v7161_v44  ;;  %6694 = vmatprep.subr.bf16.mxu0 %v7162_v56 }
 0xa2e   :  { %v1364_v27 = vpop.f32.mrb[20].mxu1  ;;  %v1407_v28 = vpop.f32.mrb[20].mxu0  ;;  %6673 = vmatpush3.bf16.msra.mxu1 %v7163_v46  ;;  %6695 = vmatpush3.bf16.msra.mxu0 %v7164_v48  ;;  %v7173_v48 = vld [vmem:[%s9382_s5 + $0x240] sm:$0xff]  }
 0xa2f   :  { %v1365_v60 = vadd.f32 %v1364_v27, %v790_v49  ;;  %v1408_v61 = vadd.f32 %v1407_v28, %v798_v53  ;;  %v1366_v62 = vpop.f32.mrb[21].mxu1  ;;  %v1409_v63 = vpop.f32.mrb[21].mxu0  ;;  %6674 = vmatprep.subr.bf16.mxu1 %v7165_v50  ;;  %6696 = vmatprep.subr.bf16.mxu0 %v7166_v52 }
 0xa30   :  { %v1367_v47 = vadd.f32 %v1366_v62, %v794_v54  ;;  %v1410_v3 = vadd.f32 %v1409_v63, %v802_v57  ;;  %v1368_v4 = vpop.f32.mrb[22].mxu1  ;;  %v1411_v5 = vpop.f32.mrb[22].mxu0  ;;  %v7178_v62 = vld [vmem:[%s9382_s5 + $0x2c8] sm:$0xff]  }
 0xa31   :  { %v1369_v6 = vadd.f32 %v1368_v4, %v790_v49  ;;  %v1412_v23 = vadd.f32 %v1411_v5, %v798_v53  ;;  %v1370_v24 = vpop.f32.mrb[23].mxu1  ;;  %v1413_v25 = vpop.f32.mrb[23].mxu0  ;;  %v1510_v43 = vmax.f32 %v1365_v60, 0.0  ;;  %v1512_v44 = vmax.f32 %v1408_v61, 0.0  ;;  %v7174_v49 = vld [vmem:[%s9382_s5 + $0x2c0] sm:$0xff]   ;;  %v7177_v61 = vld [vmem:[%s9382_s5 + $0x248] sm:$0xff]  }
 0xa32   :  { %v1371_v26 = vadd.f32 %v1370_v24, %v794_v54  ;;  %v1414_v33 = vadd.f32 %v1413_v25, %v802_v57  ;;  %6675 = vmatpush3.bf16.msra.mxu1 %v7167_v58  ;;  %6697 = vmatpush3.bf16.msra.mxu0 %v7168_v59  ;;  %v1511_v53 = vmax.f32 %v1367_v47, 0.0  ;;  %v1513_v50 = vmax.f32 %v1410_v3, 0.0  ;;  %v7175_v59 = vld [vmem:[%s9382_s5 + $0x200] sm:$0xff]   ;;  %v7179_v63 = vld [vmem:[%s9382_s5 + $0x208] sm:$0xff]   ;;  %v7182_v4 = vld [vmem:[%s9382_s5 + $0x2d0] sm:$0xff]  }
 0xa33   :  { %v1526_v56 = vmax.f32 %v1369_v6, 0.0  ;;  %v1528_v46 = vmax.f32 %v1412_v23, 0.0  ;;  %6676 = vmatprep.subr.bf16.mxu1 %v7169_v0  ;;  %6698 = vmatprep.subr.bf16.mxu0 %v7170_v2  ;;  %v7176_v60 = vld [vmem:[%s9382_s5 + $0x280] sm:$0xff]   ;;  %v806_v0 = vrot.slane %v8229_v19, %v8159_v7  ;;  %v814_v2 = vrot.slane %v8229_v19, %v8162_v8  ;;  %v7183_v23 = vld [vmem:[%s9382_s5 + $0x210] sm:$0xff]  }
 0xa34   :  { %v1527_v52 = vmax.f32 %v1371_v26, 0.0  ;;  %v1529_v54 = vmax.f32 %v1414_v33, 0.0  ;;  %v810_v47 = vrot.slane %v8229_v19, %v8165_v20  ;;  %v818_v3 = vrot.slane %v8229_v19, %v8168_v22  ;;  %v7184_v19 = vld [vmem:[%s9382_s5 + $0x290] sm:$0xff]  }
 0xa35   :  { %v8275_v57 = vpack.c.bf16 %v1526_v56, %v1510_v43  ;;  %v8277_v27 = vpack.c.bf16 %v1528_v46, %v1512_v44  ;;  %v7186_v46 = vld [vmem:[%s9382_s5 + $0x2d8] sm:$0xff]  }
 0xa36   :  { %v1543_v28 = vpack.c.bf16 %v1527_v52, %v1511_v53  ;;  %v1545_v58 = vpack.c.bf16 %v1529_v54, %v1513_v50  ;;  %6677 = vmatpush3.bf16.msra.mxu1 %v7171_v35  ;;  %6699 = vmatpush3.bf16.msra.mxu0 %v7172_v36  ;;  %v7185_v35 = vld [vmem:[%s9382_s5 + $0x258] sm:$0xff]  }
 0xa37   :  { %6706 = vmatprep.subr.bf16.mxu1 %v7173_v48  ;;  %6728 = vmatprep.subr.bf16.mxu0 %v7174_v49 }
 0xa39   :  { %2693 = vmatmul.mubr.bf16.vlgmr.msra.gmra.mrb[32].mxu1 %v8210_v30  ;;  %2734 = vmatmul.mubr.bf16.vlgmr.msra.gmra.mrb[32].mxu0 %v8212_v29  ;;  %v7180_v30 = vld [vmem:[%s9382_s5 + $0x288] sm:$0xff]   ;;  %v7181_v29 = vld [vmem:[%s9382_s5 + $0x250] sm:$0xff]  }
 0xa3a   :  { %6707 = vmatpush3.bf16.msra.mxu1 %v7175_v59  ;;  %2774 = vmatprep.mubr.bf16.mxu1 %v1543_v28  ;;  %v7187_v28 = vld [vmem:[%s9382_s5 + $0x218] sm:$0xff]  }
 0xa3b   :  { %6729 = vmatpush3.bf16.msra.mxu0 %v7176_v60  ;;  %2815 = vmatprep.mubr.bf16.mxu0 %v1545_v58 }
 0xa3c   :  { %6708 = vmatprep.subr.bf16.mxu1 %v7177_v61  ;;  %6730 = vmatprep.subr.bf16.mxu0 %v7178_v62  ;;  %v7188_v62 = vld [vmem:[%s9382_s5 + $0x298] sm:$0xff]  }
 0xa3e   :  { %v1450_v5 = vpop.f32.mrb[24].mxu1  ;;  %v1493_v6 = vpop.f32.mrb[24].mxu0  ;;  %6709 = vmatpush3.bf16.msra.mxu1 %v7179_v63  ;;  %v7189_v63 = vld [vmem:[%s9382_s5 + $0x260] sm:$0xff]  }
 0xa3f   :  { %v1451_v24 = vadd.f32 %v1450_v5, %v806_v0  ;;  %v1494_v25 = vadd.f32 %v1493_v6, %v814_v2  ;;  %6731 = vmatpush3.bf16.msra.mxu0 %v7180_v30  ;;  %v1452_v26 = vpop.f32.mrb[25].mxu1  ;;  %v1495_v33 = vpop.f32.mrb[25].mxu0  ;;  %6710 = vmatprep.subr.bf16.mxu1 %v7181_v29 }
 0xa40   :  { %v1453_v36 = vadd.f32 %v1452_v26, %v810_v47  ;;  %v1496_v43 = vadd.f32 %v1495_v33, %v818_v3  ;;  %v1454_v44 = vpop.f32.mrb[26].mxu1  ;;  %v1497_v56 = vpop.f32.mrb[26].mxu0  ;;  %6732 = vmatprep.subr.bf16.mxu0 %v7182_v4  ;;  %v7194_v26 = vld [vmem:[%s9382_s5 + $0x2e8] sm:$0xff]  }
 0xa41   :  { %v1455_v48 = vadd.f32 %v1454_v44, %v806_v0  ;;  %v1498_v49 = vadd.f32 %v1497_v56, %v814_v2  ;;  %v1456_v53 = vpop.f32.mrb[27].mxu1  ;;  %v1499_v50 = vpop.f32.mrb[27].mxu0  ;;  %v1514_v58 = vmax.f32 %v1451_v24, 0.0  ;;  %v1516_v59 = vmax.f32 %v1494_v25, 0.0  ;;  %v7192_v24 = vld [vmem:[%s9382_s5 + $0x2a0] sm:$0xff]   ;;  %v7193_v25 = vld [vmem:[%s9382_s5 + $0x268] sm:$0xff]  }
 0xa42   :  { %v1457_v52 = vadd.f32 %v1456_v53, %v810_v47  ;;  %v1500_v54 = vadd.f32 %v1499_v50, %v818_v3  ;;  %6711 = vmatpush3.bf16.msra.mxu1 %v7183_v23  ;;  %v1515_v0 = vmax.f32 %v1453_v36, 0.0  ;;  %v1517_v2 = vmax.f32 %v1496_v43, 0.0  ;;  %v7190_v47 = vld [vmem:[%s9382_s5 + $0x2e0] sm:$0xff]   ;;  %v7195_v33 = vld [vmem:[%s9382_s5 + $0x228] sm:$0xff]   ;;  %v7198_v36 = vld [vmem:[%s9382_s5 + $0x2f0] sm:$0xff]  }
 0xa43   :  { %v1530_v60 = vmax.f32 %v1455_v48, 0.0  ;;  %v1532_v61 = vmax.f32 %v1498_v49, 0.0  ;;  %6733 = vmatpush3.bf16.msra.mxu0 %v7184_v19  ;;  %6712 = vmatprep.subr.bf16.mxu1 %v7185_v35  ;;  %v7191_v23 = vld [vmem:[%s9382_s5 + $0x220] sm:$0xff]   ;;  %v7196_v19 = vld [vmem:[%s9382_s5 + $0x2a8] sm:$0xff]   ;;  %v7197_v35 = vld [vmem:[%s9382_s5 + $0x270] sm:$0xff]  }
 0xa44   :  { %v1531_v30 = vmax.f32 %v1457_v52, 0.0  ;;  %v1533_v29 = vmax.f32 %v1500_v54, 0.0  ;;  %6734 = vmatprep.subr.bf16.mxu0 %v7186_v46  ;;  %v7199_v43 = vld [vmem:[%s9382_s5 + $0x230] sm:$0xff]   ;;  %v7201_v56 = vld [vmem:[%s9382_s5 + $0x278] sm:$0xff]   ;;  %v7205_v53 = vld [vmem:[%s9382_s5 + $0x340] sm:$0xff]  }
 0xa45   :  { %v8337_v3 = vpack.c.bf16 %v1530_v60, %v1514_v58  ;;  %v8339_v4 = vpack.c.bf16 %v1532_v61, %v1516_v59  ;;  %v7200_v44 = vld [vmem:[%s9382_s5 + $0x2b0] sm:$0xff]   ;;  %v7202_v46 = vld [vmem:[%s9382_s5 + $0x2f8] sm:$0xff]   ;;  %v7206_v50 = vld [vmem:[%s9382_s5 + $0x3c0] sm:$0xff]  }
 0xa46   :  { %v1547_v5 = vpack.c.bf16 %v1531_v30, %v1515_v0  ;;  %v1549_v6 = vpack.c.bf16 %v1533_v29, %v1517_v2  ;;  %6713 = vmatpush3.bf16.msra.mxu1 %v7187_v28  ;;  %v7203_v48 = vld [vmem:[%s9382_s5 + $0x238] sm:$0xff]   ;;  %v7207_v52 = vld [vmem:[%s9382_s5 + $0x300] sm:$0xff]   ;;  %v7209_v28 = vld [vmem:[%s9382_s5 + $0x348] sm:$0xff]  }
 0xa47   :  { %6735 = vmatpush3.bf16.msra.mxu0 %v7188_v62  ;;  %6714 = vmatprep.subr.bf16.mxu1 %v7189_v63  ;;  %v7204_v49 = vld [vmem:[%s9382_s5 + $0x2b8] sm:$0xff]   ;;  %v7208_v54 = vld [vmem:[%s9382_s5 + $0x380] sm:$0xff]   ;;  %v7210_v58 = vld [vmem:[%s9382_s5 + $0x3c8] sm:$0xff]  }
 0xa48   :  { %6736 = vmatprep.subr.bf16.mxu0 %v7190_v47  ;;  %v7211_v59 = vld [vmem:[%s9382_s5 + $0x308] sm:$0xff]   ;;  %v7215_v61 = vld [vmem:[%s9382_s5 + $0x310] sm:$0xff]   ;;  %v7217_v63 = vld [vmem:[%s9382_s5 + $0x358] sm:$0xff]  }
 0xa49   :  { %v7212_v60 = vld [vmem:[%s9382_s5 + $0x388] sm:$0xff]   ;;  %v7216_v62 = vld [vmem:[%s9382_s5 + $0x390] sm:$0xff]   ;;  %v7218_v0 = vld [vmem:[%s9382_s5 + $0x3d8] sm:$0xff]  }
 0xa4a   :  { %6715 = vmatpush3.bf16.msra.mxu1 %v7191_v23  ;;  %v7219_v2 = vld [vmem:[%s9382_s5 + $0x318] sm:$0xff]   ;;  %v7221_v29 = vld [vmem:[%s9382_s5 + $0x360] sm:$0xff]   ;;  %v7225_v23 = vld [vmem:[%s9382_s5 + $0x368] sm:$0xff]  }
 0xa4b   :  { %6737 = vmatpush3.bf16.msra.mxu0 %v7192_v24  ;;  %6716 = vmatprep.subr.bf16.mxu1 %v7193_v25  ;;  %v7220_v30 = vld [vmem:[%s9382_s5 + $0x398] sm:$0xff]   ;;  %v7222_v47 = vld [vmem:[%s9382_s5 + $0x3e0] sm:$0xff]   ;;  %v7226_v24 = vld [vmem:[%s9382_s5 + $0x3e8] sm:$0xff]  }
 0xa4c   :  { %6738 = vmatprep.subr.bf16.mxu0 %v7194_v26  ;;  %v7227_v25 = vld [vmem:[%s9382_s5 + $0x328] sm:$0xff]  }
 0xa4d   :  { %v7228_v26 = vld [vmem:[%s9382_s5 + $0x3a8] sm:$0xff]  }
 0xa4e   :  { %6717 = vmatpush3.bf16.msra.mxu1 %v7195_v33  ;;  %v7229_v33 = vld [vmem:[%s9382_s5 + $0x370] sm:$0xff]  }
 0xa4f   :  { %6739 = vmatpush3.bf16.msra.mxu0 %v7196_v19  ;;  %6718 = vmatprep.subr.bf16.mxu1 %v7197_v35  ;;  %v7230_v19 = vld [vmem:[%s9382_s5 + $0x3f0] sm:$0xff]  }
 0xa50   :  { %6740 = vmatprep.subr.bf16.mxu0 %v7198_v36  ;;  %v7231_v35 = vld [vmem:[%s9382_s5 + $0x330] sm:$0xff]  }
 0xa51   :  { %v7232_v36 = vld [vmem:[%s9382_s5 + $0x3b0] sm:$0xff]  }
 0xa52   :  { %6719 = vmatpush3.bf16.msra.mxu1 %v7199_v43  ;;  %v7233_v43 = vld [vmem:[%s9382_s5 + $0x378] sm:$0xff]  }
 0xa53   :  { %6741 = vmatpush3.bf16.msra.mxu0 %v7200_v44  ;;  %6720 = vmatprep.subr.bf16.mxu1 %v7201_v56  ;;  %v7234_v44 = vld [vmem:[%s9382_s5 + $0x3f8] sm:$0xff]  }
 0xa54   :  { %6742 = vmatprep.subr.bf16.mxu0 %v7202_v46  ;;  %v7235_v56 = vld [vmem:[%s9382_s5 + $0x338] sm:$0xff]  }
 0xa55   :  { %v7236_v46 = vld [vmem:[%s9382_s5 + $0x3b8] sm:$0xff]  }
 0xa56   :  { %6721 = vmatpush3.bf16.msra.mxu1 %v7203_v48 }
 0xa57   :  { %6743 = vmatpush3.bf16.msra.mxu0 %v7204_v49  ;;  %6750 = vmatprep.subr.bf16.mxu1 %v7205_v53  ;;  %v5907_v53 = vld [vmem:[%s9383_s6 + $0x2a] ss:$0 sm:$0xff] }
 0xa58   :  { %6772 = vmatprep.subr.bf16.mxu0 %v7206_v50 }
 0xa59   :  { %2775 = vmatmul.mubr.bf16.vlgmr.msra.gmra.mrb[36].mxu1 %v8275_v57  ;;  %v7213_v57 = vld [vmem:[%s9382_s5 + $0x350] sm:$0xff]  }
 0xa5a   :  { %2816 = vmatmul.mubr.bf16.vlgmr.msra.gmra.mrb[36].mxu0 %v8277_v27  ;;  %6751 = vmatpush3.bf16.msra.mxu1 %v7207_v52  ;;  %v7214_v27 = vld [vmem:[%s9382_s5 + $0x3d0] sm:$0xff]  }
 0xa5b   :  { %2856 = vmatprep.mubr.bf16.mxu1 %v1547_v5  ;;  %6773 = vmatpush3.bf16.msra.mxu0 %v7208_v54  ;;  %v7223_v5 = vld [vmem:[%s9382_s5 + $0x320] sm:$0xff]  }
 0xa5c   :  { %2897 = vmatprep.mubr.bf16.mxu0 %v1549_v6  ;;  %6752 = vmatprep.subr.bf16.mxu1 %v7209_v28  ;;  %v7224_v6 = vld [vmem:[%s9382_s5 + $0x3a0] sm:$0xff]  }
 0xa5d   :  { %6774 = vmatprep.subr.bf16.mxu0 %v7210_v58 }
 0xa5e   :  { %6753 = vmatpush3.bf16.msra.mxu1 %v7211_v59 }
 0xa5f   :  { %6775 = vmatpush3.bf16.msra.mxu0 %v7212_v60  ;;  %6754 = vmatprep.subr.bf16.mxu1 %v7213_v57 }
 0xa60   :  { %6776 = vmatprep.subr.bf16.mxu0 %v7214_v27 }
 0xa62   :  { %6755 = vmatpush3.bf16.msra.mxu1 %v7215_v61 }
 0xa63   :  { %6777 = vmatpush3.bf16.msra.mxu0 %v7216_v62  ;;  %6756 = vmatprep.subr.bf16.mxu1 %v7217_v63 }
 0xa64   :  { %6778 = vmatprep.subr.bf16.mxu0 %v7218_v0 }
 0xa66   :  { %6757 = vmatpush3.bf16.msra.mxu1 %v7219_v2 }
 0xa67   :  { %6779 = vmatpush3.bf16.msra.mxu0 %v7220_v30  ;;  %6758 = vmatprep.subr.bf16.mxu1 %v7221_v29 }
 0xa68   :  { %6780 = vmatprep.subr.bf16.mxu0 %v7222_v47 }
 0xa6a   :  { %6759 = vmatpush3.bf16.msra.mxu1 %v7223_v5 }
 0xa6b   :  { %6781 = vmatpush3.bf16.msra.mxu0 %v7224_v6  ;;  %6760 = vmatprep.subr.bf16.mxu1 %v7225_v23 }
 0xa6c   :  { %6782 = vmatprep.subr.bf16.mxu0 %v7226_v24 }
 0xa6e   :  { %6761 = vmatpush3.bf16.msra.mxu1 %v7227_v25 }
 0xa6f   :  { %6783 = vmatpush3.bf16.msra.mxu0 %v7228_v26  ;;  %6762 = vmatprep.subr.bf16.mxu1 %v7229_v33 }
 0xa70   :  { %6784 = vmatprep.subr.bf16.mxu0 %v7230_v19 }
 0xa72   :  { %6763 = vmatpush3.bf16.msra.mxu1 %v7231_v35 }
 0xa73   :  { %6785 = vmatpush3.bf16.msra.mxu0 %v7232_v36  ;;  %6764 = vmatprep.subr.bf16.mxu1 %v7233_v43 }
 0xa74   :  { %6786 = vmatprep.subr.bf16.mxu0 %v7234_v44 }
 0xa76   :  { %6765 = vmatpush3.bf16.msra.mxu1 %v7235_v56 }
 0xa77   :  { %6787 = vmatpush3.bf16.msra.mxu0 %v7236_v46 }
 0xa78   :  { %7031 = vmatprep.subr.bf16.mxu0 %v7462_v12 }
 0xa79   :  { %2857 = vmatmul.mubr.bf16.vlgmr.msra.gmra.mrb[40].mxu1 %v8337_v3 }
 0xa7a   :  { %2898 = vmatmul.mubr.bf16.vlgmr.msra.gmra.mrb[40].mxu0 %v8339_v4  ;;  %3054 = vmatprep.mubr.bf16.mxu1 %v7461_v1 }
 0xa7b   :  { %7035 = vmatprep.mubr.msk.bf16.mxu0 %vm7464_vm11, %v7462_v12 }
 0xaec   :  { %v6634_v48 = vpop.f32.mrb[28].mxu1  ;;  %v6656_v49 = vpop.f32.mrb[28].mxu0 }
 0xaed   :  { %v6635_v50 = vpop.f32.mrb[29].mxu1  ;;  %v6657_v52 = vpop.f32.mrb[29].mxu0 }
 0xaee   :  { %v6636_v54 = vadd.f32 %v6635_v50, %v6634_v48  ;;  %v6658_v28 = vadd.f32 %v6657_v52, %v6656_v49  ;;  %v6637_v58 = vpop.f32.mrb[30].mxu1  ;;  %v6659_v59 = vpop.f32.mrb[30].mxu0 }
 0xaef   :  { %v6638_v3 = vpop.f32.mrb[31].mxu1  ;;  %v6660_v60 = vpop.f32.mrb[31].mxu0 }
 0xaf0   :  { %v2613_v4 = vadd.f32 %v6636_v54, %v5907_v53  ;;  %v6639_v57 = vadd.f32 %v6638_v3, %v6637_v58  ;;  %v6661_v27 = vadd.f32 %v6660_v60, %v6659_v59 }
 0xaf2   :  { %v2654_v61 = vadd.f32 %v6658_v28, %v2613_v4  ;;  %v2616_v62 = vadd.f32 %v6639_v57, %v5907_v53 }
 0xaf4   :  { %v2657_v63 = vadd.f32 %v6661_v27, %v2616_v62 }
 0xb0c   :  { %v6678_v0 = vpop.f32.mrb[32].mxu1  ;;  %v6700_v2 = vpop.f32.mrb[32].mxu0 }
 0xb0d   :  { %v6679_v30 = vpop.f32.mrb[33].mxu1  ;;  %v6701_v29 = vpop.f32.mrb[33].mxu0 }
 0xb0e   :  { %v6680_v47 = vadd.f32 %v6679_v30, %v6678_v0  ;;  %v6702_v5 = vadd.f32 %v6701_v29, %v6700_v2  ;;  %v6681_v6 = vpop.f32.mrb[34].mxu1  ;;  %v6703_v23 = vpop.f32.mrb[34].mxu0 }
 0xb0f   :  { %v6682_v24 = vpop.f32.mrb[35].mxu1  ;;  %v6704_v25 = vpop.f32.mrb[35].mxu0 }
 0xb10   :  { %v2695_v26 = vadd.f32 %v6680_v47, %v2654_v61  ;;  %v6683_v33 = vadd.f32 %v6682_v24, %v6681_v6  ;;  %v6705_v19 = vadd.f32 %v6704_v25, %v6703_v23 }
 0xb12   :  { %v2736_v35 = vadd.f32 %v6702_v5, %v2695_v26  ;;  %v2698_v36 = vadd.f32 %v6683_v33, %v2657_v63 }
 0xb14   :  { %v2739_v43 = vadd.f32 %v6705_v19, %v2698_v36 }
 0xb2c   :  { %v6722_v44 = vpop.f32.mrb[36].mxu1 }
 0xb2d   :  { %v6744_v56 = vpop.f32.mrb[36].mxu0  ;;  %v6723_v46 = vpop.f32.mrb[37].mxu1 }
 0xb2e   :  { %v6724_v48 = vadd.f32 %v6723_v46, %v6722_v44  ;;  %v6745_v49 = vpop.f32.mrb[37].mxu0  ;;  %v6725_v53 = vpop.f32.mrb[38].mxu1 }
 0xb2f   :  { %v6746_v50 = vadd.f32 %v6745_v49, %v6744_v56  ;;  %v6747_v52 = vpop.f32.mrb[38].mxu0  ;;  %v6726_v54 = vpop.f32.mrb[39].mxu1 }
 0xb30   :  { %v2777_v28 = vadd.f32 %v6724_v48, %v2736_v35  ;;  %v6727_v58 = vadd.f32 %v6726_v54, %v6725_v53  ;;  %v6748_v59 = vpop.f32.mrb[39].mxu0 }
 0xb31   :  { %v6749_v3 = vadd.f32 %v6748_v59, %v6747_v52  ;;  %v7240_v59 = vld [vmem:[%s9379_s2 + $0x50] ss:$8 sps:$4 sm:$0xff]  }
 0xb32   :  { %v2818_v60 = vadd.f32 %v6746_v50, %v2777_v28  ;;  %v2780_v4 = vadd.f32 %v6727_v58, %v2739_v43  ;;  %v7237_v28 = vld [vmem:[%s9379_s2 + $0x40] ss:$8 sps:$4 sm:$0xff]   ;;  %v7242_v58 = vld [vmem:[%s9379_s2 + $0x54] ss:$8 sps:$4 sm:$0xff]  }
 0xb34   :  { %v2821_v57 = vadd.f32 %v6749_v3, %v2780_v4  ;;  %v7245_v3 = vld [vmem:[%s9379_s2 + $0x64] ss:$8 sps:$4 sm:$0xff]   ;;  %v7248_v4 = vld [vmem:[%s9379_s2 + $0x74] ss:$8 sps:$4 sm:$0xff]  }
 0xb4c   :  { %v6766_v27 = vpop.f32.mrb[40].mxu1 }
 0xb4d   :  { %v6788_v61 = vpop.f32.mrb[40].mxu0  ;;  %v6767_v62 = vpop.f32.mrb[41].mxu1 }
 0xb4e   :  { %v6768_v63 = vadd.f32 %v6767_v62, %v6766_v27  ;;  %v6789_v0 = vpop.f32.mrb[41].mxu0  ;;  %v6769_v2 = vpop.f32.mrb[42].mxu1 }
 0xb4f   :  { %v6790_v30 = vadd.f32 %v6789_v0, %v6788_v61  ;;  %v6791_v29 = vpop.f32.mrb[42].mxu0  ;;  %v6770_v47 = vpop.f32.mrb[43].mxu1 }
 0xb50   :  { %v2859_v5 = vadd.f32 %v6768_v63, %v2818_v60  ;;  %v6771_v6 = vadd.f32 %v6770_v47, %v6769_v2  ;;  %v6792_v23 = vpop.f32.mrb[43].mxu0  ;;  %v7243_v60 = vld [vmem:[%s9379_s2 + $0x60] ss:$8 sps:$4 sm:$0xff]  }
 0xb51   :  { %v6793_v24 = vadd.f32 %v6792_v23, %v6791_v29  ;;  %v6036_v29 = vld [vmem:[%s9383_s6 + $0x2c] ss:$0 sm:$0xff] }
 0xb52   :  { %v2900_v25 = vadd.f32 %v6790_v30, %v2859_v5  ;;  %v2862_v26 = vadd.f32 %v6771_v6, %v2821_v57  ;;  %v7246_v57 = vld [vmem:[%s9379_s2 + $0x70] ss:$8 sps:$4 sm:$0xff]  }
 0xb54   :  { %v2903_v33 = vadd.f32 %v6793_v24, %v2862_v26  ;;  %v2906_v19 = vadd.f32 %v2900_v25, %v7881_v10  ;;  %v6037_v24 = vld [vmem:[%s9383_s6 + $0x2e] ss:$0 sm:$0xff] }
 0xb56   :  { %v2908_v35 = vsel %vm160_vm10, %v2906_v19, 0.0  ;;  %v2907_v36 = vadd.f32 %v2903_v33, %v7883_v16  ;;  %v7239_v16 = vld [vmem:[%s9379_s2 + $0x44] ss:$8 sps:$4 sm:$0xff]  }
 0xb57   :  { %2909 = vadd.xlane.f32.xlu1 %v2908_v35  ;;  %3022 = vmatprep.subr.bf16.mxu1 %v7239_v16  ;;  %v6038_v35 = vld [vmem:[%s9383_s6 + $0x1] ss:$2 sm:$0x3] }
 0xb58   :  { %v2911_v43 = vsel %vm160_vm10, %v2907_v36, 0.0  ;;  %3023 = vmatpush1.bf16.msra.mxu1 %v7237_v28 }
 0xb59   :  { %2912 = vadd.xlane.f32.xlu0 %v2911_v43  ;;  %3024 = vmatprep.subr.bf16.mxu1 %v7242_v58  ;;  %v2976_v43 = vrot.slane %v6038_v35, %v7600_v34 }
 0xb5c   :  { %3025 = vmatpush1.bf16.msra.mxu1 %v7240_v59 }
 0xb5d   :  { %3026 = vmatprep.subr.bf16.mxu1 %v7245_v3 }
 0xb60   :  { %3027 = vmatpush1.bf16.msra.mxu1 %v7243_v60 }
 0xb61   :  { %3028 = vmatprep.subr.bf16.mxu1 %v7248_v4 }
 0xb64   :  { %3029 = vmatpush1.bf16.msra.mxu1 %v7246_v57 }
 0xb65   :  { %7039 = vmatprep.subr.bf16.mxu1 %v7462_v12 }
 0xbe4   :  { %v2910_v44 = vpop.xlane.xlu1 %2909 }
 0xbe5   :  { %v2914_v56 = vmul.f32 0.015625, %v2910_v44 }
 0xbe6   :  { %v2913_v46 = vpop.xlane.xlu0 %2912 }
 0xbe7   :  { %v2916_v48 = vsub.f32 %v2906_v19, %v2914_v56  ;;  %v2915_v49 = vmul.f32 0.015625, %v2913_v46 }
 0xbe9   :  { %v2917_v53 = vsub.f32 %v2907_v36, %v2915_v49  ;;  %v2918_v50 = vmul.f32 %v2916_v48, %v2916_v48  ;;  %v2972_v36 = vrot.slane %v6038_v35, %v7594_v32 }
 0xbeb   :  { %v2920_v52 = vsel %vm160_vm10, %v2918_v50, 0.0  ;;  %v2919_v54 = vmul.f32 %v2917_v53, %v2917_v53 }
 0xbec   :  { %2921 = vadd.xlane.f32.xlu1 %v2920_v52 }
 0xbed   :  { %v2923_v10 = vsel %vm160_vm10, %v2919_v54, 0.0 }
 0xbee   :  { %2924 = vadd.xlane.f32.xlu0 %v2923_v10 }
 0xc79   :  { %v2922_v27 = vpop.xlane.xlu1 %2921 }
 0xc7a   :  { %v2926_v61 = vmul.f32 0.015625, %v2922_v27 }
 0xc7b   :  { %v2925_v62 = vpop.xlane.xlu0 %2924 }
 0xc7c   :  { %v2928_v63 = vadd.f32 1e-05, %v2926_v61  ;;  %v2927_v0 = vmul.f32 0.015625, %v2925_v62 }
 0xc7e   :  { %7405 = vrsqrt.f32 %v2928_v63  ;;  %v2929_v2 = vadd.f32 1e-05, %v2927_v0 }
 0xc80   :  { %7407 = vrsqrt.f32 %v2929_v2 }
 0xc88   :  { %v7406_v30 = vpop.eup %7405 }
 0xc89   :  { %v2932_v47 = vmul.f32 %v7406_v30, %v2916_v48 }
 0xc8a   :  { %v7408_v5 = vpop.eup %7407 }
 0xc8b   :  { %v2938_v6 = vmul.f32 %v6036_v29, %v2932_v47  ;;  %v2933_v23 = vmul.f32 %v7408_v5, %v2917_v53 }
 0xc8d   :  { %v2939_v25 = vmul.f32 %v6036_v29, %v2933_v23  ;;  %v8527_v26 = vadd.f32 %v6037_v24, %v2938_v6 }
 0xc8f   :  { %v8529_v33 = vadd.f32 %v6037_v24, %v2939_v25 }
 0xc91   :  { %v2958_v19 = vpack.c.bf16 %v8529_v33, %v8527_v26 }
 0xc93   :  { %6057 = vmatmul.mubr.msk.bf16.vlgmr.msra.gmra.mrb[44].mxu1 %vm160_vm10, %v2958_v19 }
 0xc94   :  { %7043 = vmatprep.mubr.msk.bf16.mxu1 %vm7464_vm11, %v7462_v12 }
 0xd66   :  { %v3056_v44 = vpop.f32.mrb[44].mxu1 }
 0xd67   :  { %v3057_v56 = vadd.f32 %v3056_v44, %v2972_v36  ;;  %v3058_v46 = vpop.f32.mrb[45].mxu1 }
 0xd68   :  { %v3059_v48 = vadd.f32 %v3058_v46, %v2976_v43  ;;  %v3060_v49 = vpop.f32.mrb[46].mxu1 }
 0xd69   :  { %v8541_v53 = vadd.f32 %v3060_v49, %v2972_v36  ;;  %v3062_v50 = vpop.f32.mrb[47].mxu1  ;;  %v3067_v52 = vmul.f32 %v7606_v39, %v3057_v56  ;;  %v3068_v54 = vmul.f32 %v7604_v38, %v3057_v56  ;;  %v3065_v28 = vmul.f32 %v7608_v40, %v3057_v56 }
 0xd6a   :  { %v3069_v10 = vmul.f32 %v7550_v14, %v3059_v48  ;;  %v3070_v16 = vmul.f32 %v7561_v15, %v3059_v48  ;;  %v3063_v58 = vadd.f32 %v3062_v50, %v2976_v43  ;;  %v3066_v3 = vmul.f32 %v7610_v42, %v3057_v56 }
 0xd6b   :  { %v3075_v59 = vpack.c.bf16 %v3068_v54, %v3067_v52  ;;  %v3071_v60 = vmul.f32 %v7566_v17, %v3059_v48  ;;  %v3072_v4 = vmul.f32 %v7569_v18, %v3059_v48  ;;  %v3073_v47 = vpack.c.bf16 %v3057_v56, %v3057_v56 }
 0xd6c   :  { %v3189_v57 = vpack.c.bf16 %v3070_v16, %v3069_v10  ;;  %v3074_v27 = vpack.c.bf16 %v3066_v3, %v3065_v28  ;;  %v3238_v30 = vmul.f32 %v7550_v14, %v3063_v58  ;;  %v3239_v29 = vmul.f32 %v7561_v15, %v3063_v58 }
 0xd6d   :  { %3080 = vrot.lane.b32.xlu0 %v3075_v59, %s7463_s20  ;;  %v3190_v61 = vpack.c.bf16 %v3072_v4, %v3071_v60  ;;  %v3240_v5 = vmul.f32 %v7566_v17, %v3063_v58  ;;  %v3241_v6 = vmul.f32 %v7569_v18, %v3063_v58 }
 0xd6e   :  { %7040 = vmatpush3.bf16.msra.mxu1 %v3189_v57  ;;  %3078 = vrot.lane.b32.xlu1 %v3074_v27, %s7463_s20  ;;  %v3358_v23 = vpack.c.bf16 %v3239_v29, %v3238_v30 }
 0xd6f   :  { %7041 = vmatprep.subr.bf16.mxu1 %v7462_v12  ;;  %v3359_v24 = vpack.c.bf16 %v3241_v6, %v3240_v5  ;;  %v3234_v5 = vmul.f32 %v7608_v40, %v8541_v53  ;;  %v3235_v6 = vmul.f32 %v7610_v42, %v8541_v53 }
 0xd72   :  { %7042 = vmatpush3.bf16.msra.mxu1 %v3190_v61 }
 0xd73   :  { %7047 = vmatprep.subr.bf16.mxu1 %v7462_v12 }
 0xddf   :  { %v3081_v0 = vpop.permute.xlu0 %3080 }
 0xde0   :  { %v3079_v62 = vpop.permute.xlu1 %3078  ;;  %v3089_v2 = vsel %vm160_vm10, %v3081_v0, 0 }
 0xde1   :  { %v3086_v63 = vsel %vm160_vm10, %v3079_v62, 0 }
 0xde2   :  { %7032 = vmatpush3.bf16.xpose.msra.mxu0 %v3086_v63 }
 0xde3   :  { %7033 = vmatprep.subr.bf16.mxu0 %v7462_v12 }
 0xdea   :  { %7034 = vmatpush3.bf16.xpose.msra.mxu0 %v3089_v2 }
 0xdeb   :  { %7055 = vmatprep.subr.bf16.mxu0 %v7462_v12 }
 0xdf1   :  { %7036 = vmatmul.mubr.msk.bf16.vlgmr.msra.gmra.mrb[44].mxu0 %vm160_vm10, %v3073_v47 }
 0xdf2   :  { %7056 = vmatpush3.bf16.msra.mxu0 %v3358_v23  ;;  %7059 = vmatprep.mubr.msk.bf16.mxu0 %vm7464_vm11, %v7462_v12  ;;  %v3243_v23 = vpack.c.bf16 %v3235_v6, %v3234_v5 }
 0xdf3   :  { %7057 = vmatprep.subr.bf16.mxu0 %v7462_v12 }
 0xdf6   :  { %7058 = vmatpush3.bf16.msra.mxu0 %v3359_v24  ;;  %v3236_v24 = vmul.f32 %v7606_v39, %v8541_v53 }
 0xdf7   :  { %7063 = vmatprep.subr.bf16.mxu0 %v7462_v12 }
 0xec4   :  { %v3125_v14 = vpop.f32.mrb[44].mxu0 }
 0xec5   :  { %v3131_v15 = vmul.f32 0.25, %v3125_v14  ;;  %v7037_v25 = vpop.f32.mrb[45].mxu0  ;;  %v3237_v14 = vmul.f32 %v7604_v38, %v8541_v53 }
 0xec6   :  { %v3128_v19 = vpop.f32.mrb[46].mxu0 }
 0xec7   :  { %v7038_v17 = vpop.f32.mrb[47].mxu0  ;;  %v3138_v18 = vsel %vm7647_vm14, %v3131_v15, -1e+30  ;;  %v3132_v35 = vsel %vm73_vm15, %v3131_v15, -1e+30 }
 0xec8   :  { %v3139_v36 = vsel %vm292_vm3, %v3138_v18, -inf  ;;  %v3133_v43 = vsel %vm292_vm3, %v3132_v35, -inf  ;;  %v3150_v44 = vsel %vm7669_vm1, %v3131_v15, -1e+30  ;;  %v3144_v56 = vsel %vm7654_vm4, %v3131_v15, -1e+30 }
 0xec9   :  { %3140 = vmax.xlane.f32.xlu0 %v3139_v36  ;;  %3134 = vmax.xlane.f32.xlu1 %v3133_v43  ;;  %v3151_v46 = vsel %vm292_vm3, %v3150_v44, -inf  ;;  %v3145_v48 = vsel %vm292_vm3, %v3144_v56, -inf }
 0xecd   :  { %3152 = vmax.xlane.f32.xlu0 %v3151_v46  ;;  %3146 = vmax.xlane.f32.xlu1 %v3145_v48 }
 0xf56   :  { %v3141_v49 = vpop.xlane.xlu0 %3140  ;;  %v3135_v50 = vpop.xlane.xlu1 %3134 }
 0xf57   :  { %v3142_v52 = vmul.f32 %v7680_v37, %v3141_v49  ;;  %v3136_v54 = vmul.f32 %v7685_v41, %v3135_v50 }
 0xf59   :  { %v3143_v28 = vadd.f32 %v3142_v52, %v3136_v54 }
 0xf5a   :  { %v3153_v10 = vpop.xlane.xlu0 %3152  ;;  %v3147_v16 = vpop.xlane.xlu1 %3146 }
 0xf5b   :  { %v3148_v58 = vmul.f32 %v7690_v45, %v3147_v16  ;;  %v3154_v59 = vmul.f32 %v7698_v51, %v3153_v10 }
 0xf5d   :  { %v3149_v3 = vadd.f32 %v3148_v58, %v3143_v28  ;;  %v3242_v28 = vpack.c.bf16 %v8541_v53, %v8541_v53 }
 0xf5f   :  { %v3155_v60 = vadd.f32 %v3154_v59, %v3149_v3 }
 0xf61   :  { %v3156_v4 = vsub.f32 %v3131_v15, %v3155_v60  ;;  %v3244_v15 = vpack.c.bf16 %v3237_v14, %v3236_v24 }
 0xf63   :  { %v3157_v57 = vmul.f32 1.442695, %v3156_v4 }
 0xf65   :  { %7409 = vpow2.f32 %v3157_v57 }
 0xf6f   :  { %v7410_v27 = vpop.eup %7409 }
 0xf70   :  { %v3166_v61 = vmul.f32 %v7410_v27, %v7680_v37  ;;  %v3159_v62 = vmul.f32 %v7410_v27, %v7685_v41  ;;  %v3180_v2 = vmul.f32 %v7410_v27, %v7698_v51  ;;  %v3173_v30 = vmul.f32 %v7410_v27, %v7690_v45 }
 0xf72   :  { %v3167_v63 = vsel %vm292_vm3, %v3166_v61, 0.0  ;;  %v3160_v0 = vsel %vm292_vm3, %v3159_v62, 0.0  ;;  %v3181_v29 = vsel %vm292_vm3, %v3180_v2, 0.0  ;;  %v3174_v47 = vsel %vm292_vm3, %v3173_v30, 0.0 }
 0xf73   :  { %3168 = vadd.xlane.f32.xlu0 %v3167_v63  ;;  %3161 = vadd.xlane.f32.xlu1 %v3160_v0 }
 0xf77   :  { %3182 = vadd.xlane.f32.xlu0 %v3181_v29  ;;  %3175 = vadd.xlane.f32.xlu1 %v3174_v47 }
 0xf88   :  { %3247 = vrot.lane.b32.xlu1 %v3243_v23, %s7463_s20 }
 0xf8d   :  { %3249 = vrot.lane.b32.xlu0 %v3244_v15, %s7463_s20 }
0x1000   :  { %v3169_v25 = vpop.xlane.xlu0 %3168  ;;  %v3162_v19 = vpop.xlane.xlu1 %3161 }
0x1001   :  { %7411 = vrcp.f32 %v3169_v25 }
0x1002   :  { %7413 = vrcp.f32 %v3162_v19 }
0x1004   :  { %v3183_v40 = vpop.xlane.xlu0 %3182  ;;  %v3176_v17 = vpop.xlane.xlu1 %3175 }
0x1005   :  { %7415 = vrcp.f32 %v3183_v40 }
0x1006   :  { %7417 = vrcp.f32 %v3176_v17 }
0x1008   :  { %v3248_v50 = vpop.permute.xlu1 %3247  ;;  %v3250_v10 = vpop.permute.xlu0 %3249 }
0x1009   :  { %v3255_v54 = vsel %vm160_vm10, %v3248_v50, 0  ;;  %v3258_v16 = vsel %vm160_vm10, %v3250_v10, 0 }
0x100b   :  { %v7412_v42 = vpop.eup %7411 }
0x100c   :  { %v7414_v18 = vpop.eup %7413  ;;  %v3171_v39 = vmul.f32 %v7412_v42, %v7680_v37 }
0x100d   :  { %v3164_v35 = vmul.f32 %v7414_v18, %v7685_v41 }
0x100f   :  { %v7416_v38 = vpop.eup %7415  ;;  %v3172_v43 = vadd.f32 %v3171_v39, %v3164_v35 }
0x1010   :  { %v7418_v36 = vpop.eup %7417  ;;  %v3185_v56 = vmul.f32 %v7416_v38, %v7698_v51 }
0x1011   :  { %v3178_v44 = vmul.f32 %v7418_v36, %v7690_v45 }
0x1013   :  { %v3179_v46 = vadd.f32 %v3178_v44, %v3172_v43 }
0x1015   :  { %v3186_v48 = vadd.f32 %v3185_v56, %v3179_v46 }
0x1017   :  { %v3187_v49 = vmul.f32 %v7410_v27, %v3186_v48 }
0x1019   :  { %v3188_v52 = vpack.c.bf16 %v3187_v49, %v3187_v49 }
0x101b   :  { %7044 = vmatmul.mubr.msk.bf16.vlgmr.msra.gmra.mrb[48].mxu1 %vm292_vm3, %v3188_v52 }
0x101c   :  { %7048 = vmatpush3.bf16.xpose.msra.mxu1 %v3255_v54  ;;  %7051 = vmatprep.mubr.msk.bf16.mxu1 %vm7464_vm11, %v7462_v12 }
0x101d   :  { %7049 = vmatprep.subr.bf16.mxu1 %v7462_v12 }
0x1024   :  { %7050 = vmatpush3.bf16.xpose.msra.mxu1 %v3258_v16 }
0x102b   :  { %7052 = vmatmul.mubr.msk.bf16.vlgmr.msra.gmra.mrb[52].mxu1 %vm160_vm10, %v3242_v28 }
0x102c   :  { %4028 = vmatprep.mubr.bf16.mxu1 %v7461_v1 }
0x10ee   :  { %v8616_v58 = vpop.f32.mrb[48].mxu1 }
0x10ef   :  { %v7045_v59 = vpop.f32.mrb[49].mxu1 }
0x10f0   :  { %v3231_v3 = vpop.f32.mrb[50].mxu1 }
0x10f1   :  { %v7046_v60 = vpop.f32.mrb[51].mxu1 }
0x10fe   :  { %v3294_v4 = vpop.f32.mrb[52].mxu1 }
0x10ff   :  { %v3300_v57 = vmul.f32 0.25, %v3294_v4  ;;  %v7053_v27 = vpop.f32.mrb[53].mxu1 }
0x1100   :  { %v3297_v61 = vpop.f32.mrb[54].mxu1 }
0x1101   :  { %v7054_v62 = vpop.f32.mrb[55].mxu1  ;;  %v3307_v63 = vsel %vm7647_vm14, %v3300_v57, -1e+30  ;;  %v3301_v53 = vsel %vm73_vm15, %v3300_v57, -1e+30 }
0x1102   :  { %v3308_v0 = vsel %vm292_vm3, %v3307_v63, -inf  ;;  %v3302_v2 = vsel %vm292_vm3, %v3301_v53, -inf  ;;  %v3319_v30 = vsel %vm7669_vm1, %v3300_v57, -1e+30  ;;  %v3313_v29 = vsel %vm7654_vm4, %v3300_v57, -1e+30 }
0x1103   :  { %3309 = vmax.xlane.f32.xlu0 %v3308_v0  ;;  %3303 = vmax.xlane.f32.xlu1 %v3302_v2  ;;  %v3320_v47 = vsel %vm292_vm3, %v3319_v30, -inf  ;;  %v3314_v11 = vsel %vm292_vm3, %v3313_v29, -inf  ;;  %v7249_v62 = vld [vmem:[%s9380_s3 + $0x20] sm:$0xff]  }
0x1104   :  { %v6070_v29 = vld [vmem:[%s9383_s6 + $0x5] ss:$0 sm:$0xff] }
0x1107   :  { %3321 = vmax.xlane.f32.xlu0 %v3320_v47  ;;  %3315 = vmax.xlane.f32.xlu1 %v3314_v11 }
0x1190   :  { %v3310_v13 = vpop.xlane.xlu0 %3309  ;;  %v3304_v5 = vpop.xlane.xlu1 %3303 }
0x1191   :  { %v3311_v6 = vmul.f32 %v7680_v37, %v3310_v13  ;;  %v3305_v23 = vmul.f32 %v7685_v41, %v3304_v5 }
0x1193   :  { %v3312_v15 = vadd.f32 %v3311_v6, %v3305_v23 }
0x1194   :  { %v3322_v24 = vpop.xlane.xlu0 %3321  ;;  %v3316_v14 = vpop.xlane.xlu1 %3315 }
0x1195   :  { %v3317_v31 = vmul.f32 %v7690_v45, %v3316_v14  ;;  %v3323_v21 = vmul.f32 %v7698_v51, %v3322_v24 }
0x1197   :  { %v3318_v25 = vadd.f32 %v3317_v31, %v3312_v15 }
0x1199   :  { %v3324_v19 = vadd.f32 %v3323_v21, %v3318_v25 }
0x119b   :  { %v3325_v40 = vsub.f32 %v3300_v57, %v3324_v19 }
0x119d   :  { %v3326_v17 = vmul.f32 1.442695, %v3325_v40 }
0x119f   :  { %7419 = vpow2.f32 %v3326_v17 }
0x11a9   :  { %v7420_v42 = vpop.eup %7419 }
0x11aa   :  { %v3335_v18 = vmul.f32 %v7420_v42, %v7680_v37  ;;  %v3328_v39 = vmul.f32 %v7420_v42, %v7685_v41  ;;  %v3349_v36 = vmul.f32 %v7420_v42, %v7698_v51  ;;  %v3342_v43 = vmul.f32 %v7420_v42, %v7690_v45 }
0x11ac   :  { %v3336_v35 = vsel %vm292_vm3, %v3335_v18, 0.0  ;;  %v3329_v38 = vsel %vm292_vm3, %v3328_v39, 0.0  ;;  %v3350_v44 = vsel %vm292_vm3, %v3349_v36, 0.0  ;;  %v3343_v56 = vsel %vm292_vm3, %v3342_v43, 0.0  ;;  %v6078_v18 = vld [vmem:[%s9381_s4 + $0x200] sm:$0xff]  ;;  %v6087_v36 = vld [vmem:[%s9381_s4 + $0x248] sm:$0xff] }
0x11ad   :  { %3337 = vadd.xlane.f32.xlu0 %v3336_v35  ;;  %3330 = vadd.xlane.f32.xlu1 %v3329_v38  ;;  %v6086_v39 = vld [vmem:[%s9381_s4 + $0x240] sm:$0xff]  ;;  %v6079_v35 = vld [vmem:[%s9381_s4 + $0x208] sm:$0xff] }
0x11ae   :  { %v6143_v38 = vcombine.high %v6078_v18, %v6086_v39  ;;  %v6142_v43 = vcombine.low %v6078_v18, %v6086_v39  ;;  %v6096_v39 = vld [vmem:[%s9381_s4 + $0x290] sm:$0xff] }
0x11b0   :  { %3996 = vmatprep.subr.bf16.mxu1 %v6143_v38 }
0x11b1   :  { %3351 = vadd.xlane.f32.xlu0 %v3350_v44  ;;  %3344 = vadd.xlane.f32.xlu1 %v3343_v56  ;;  %v6144_v44 = vcombine.low %v6079_v35, %v6087_v36  ;;  %v6145_v56 = vcombine.high %v6079_v35, %v6087_v36  ;;  %v6104_v35 = vld [vmem:[%s9381_s4 + $0x2d0] sm:$0xff] }
0x11b2   :  { %3997 = vmatpush1.bf16.msra.mxu1 %v6142_v43 }
0x123a   :  { %v3338_v46 = vpop.xlane.xlu0 %3337  ;;  %v3331_v48 = vpop.xlane.xlu1 %3330 }
0x123b   :  { %7421 = vrcp.f32 %v3338_v46  ;;  %v6094_v46 = vld [vmem:[%s9381_s4 + $0x280] sm:$0xff] }
0x123c   :  { %7423 = vrcp.f32 %v3331_v48  ;;  %v6102_v48 = vld [vmem:[%s9381_s4 + $0x2c0] sm:$0xff] }
0x123e   :  { %v3352_v49 = vpop.xlane.xlu0 %3351  ;;  %v3345_v50 = vpop.xlane.xlu1 %3344 }
0x123f   :  { %7425 = vrcp.f32 %v3352_v49  ;;  %v6095_v49 = vld [vmem:[%s9381_s4 + $0x288] sm:$0xff] }
0x1240   :  { %7427 = vrcp.f32 %v3345_v50  ;;  %v6159_v50 = vcombine.high %v6094_v46, %v6102_v48 }
0x1242   :  { %3998 = vmatprep.subr.bf16.mxu1 %v6159_v50  ;;  %v6121_v50 = vld [vmem:[%s9381_s4 + $0x358] sm:$0xff] }
0x1245   :  { %v7422_v52 = vpop.eup %7421 }
0x1246   :  { %v7424_v54 = vpop.eup %7423  ;;  %v3340_v10 = vmul.f32 %v7422_v52, %v7680_v37  ;;  %v7250_v37 = vld [vmem:[%s9380_s3 + $0x28] sm:$0xff]  }
0x1247   :  { %v3333_v16 = vmul.f32 %v7424_v54, %v7685_v41  ;;  %v7251_v41 = vld [vmem:[%s9380_s3 + $0x30] sm:$0xff]   ;;  %v6103_v52 = vld [vmem:[%s9381_s4 + $0x2c8] sm:$0xff]  ;;  %v6158_v54 = vcombine.low %v6094_v46, %v6102_v48 }
0x1248   :  { %v6112_v46 = vld [vmem:[%s9381_s4 + $0x310] sm:$0xff] }
0x1249   :  { %v7426_v28 = vpop.eup %7425  ;;  %v3341_v3 = vadd.f32 %v3340_v10, %v3333_v16  ;;  %v6160_v10 = vcombine.low %v6095_v49, %v6103_v52  ;;  %v6161_v16 = vcombine.high %v6095_v49, %v6103_v52  ;;  %3999 = vmatpush1.bf16.msra.mxu1 %v6158_v54  ;;  %v6120_v48 = vld [vmem:[%s9381_s4 + $0x350] sm:$0xff]  ;;  %v6113_v49 = vld [vmem:[%s9381_s4 + $0x318] sm:$0xff]  ;;  %v6162_v52 = vcombine.low %v6096_v39, %v6104_v35 }
0x124a   :  { %v7428_v59 = vpop.eup %7427  ;;  %v3354_v4 = vmul.f32 %v7426_v28, %v7698_v51  ;;  %v6110_v28 = vld [vmem:[%s9381_s4 + $0x300] sm:$0xff] }
0x124b   :  { %v3347_v60 = vmul.f32 %v7428_v59, %v7690_v45  ;;  %v7252_v45 = vld [vmem:[%s9380_s3 + $0x38] sm:$0xff]   ;;  %v6118_v59 = vld [vmem:[%s9381_s4 + $0x340] sm:$0xff] }
0x124d   :  { %v3348_v57 = vadd.f32 %v3347_v60, %v3341_v3  ;;  %v6111_v3 = vld [vmem:[%s9381_s4 + $0x308] sm:$0xff]  ;;  %v6175_v60 = vcombine.high %v6110_v28, %v6118_v59 }
0x124f   :  { %v3355_v27 = vadd.f32 %v3354_v4, %v3348_v57  ;;  %v6119_v4 = vld [vmem:[%s9381_s4 + $0x348] sm:$0xff]  ;;  %v6174_v57 = vcombine.low %v6110_v28, %v6118_v59  ;;  %4000 = vmatprep.subr.bf16.mxu1 %v6175_v60  ;;  %v6128_v28 = vld [vmem:[%s9381_s4 + $0x390] sm:$0xff]  ;;  %v6137_v60 = vld [vmem:[%s9381_s4 + $0x3d8] sm:$0xff] }
0x1250   :  { %v6136_v59 = vld [vmem:[%s9381_s4 + $0x3d0] sm:$0xff] }
0x1251   :  { %v3356_v61 = vmul.f32 %v7420_v42, %v3355_v27  ;;  %v6176_v27 = vcombine.low %v6111_v3, %v6119_v4  ;;  %4001 = vmatpush1.bf16.msra.mxu1 %v6174_v57  ;;  %v6180_v57 = vcombine.low %v6113_v49, %v6121_v50 }
0x1253   :  { %v3357_v63 = vpack.c.bf16 %v3356_v61, %v3356_v61  ;;  %v6177_v61 = vcombine.high %v6111_v3, %v6119_v4  ;;  %v6129_v3 = vld [vmem:[%s9381_s4 + $0x398] sm:$0xff]  ;;  %v6178_v4 = vcombine.low %v6112_v46, %v6120_v48 }
0x1255   :  { %7060 = vmatmul.mubr.msk.bf16.vlgmr.msra.gmra.mrb[48].mxu0 %vm292_vm3, %v3357_v63  ;;  %v6134_v63 = vld [vmem:[%s9381_s4 + $0x3c0] sm:$0xff] }
0x1256   :  { %7064 = vmatpush3.bf16.msra.mxu0 %v7249_v62  ;;  %7071 = vmatprep.mubr.msk.bf16.mxu0 %vm7464_vm11, %v7462_v12  ;;  %v6126_v62 = vld [vmem:[%s9381_s4 + $0x380] sm:$0xff] }
0x1257   :  { %7065 = vmatprep.subr.bf16.mxu0 %v7462_v12 }
0x125a   :  { %7066 = vmatpush3.bf16.msra.mxu0 %v7250_v37  ;;  %v6127_v37 = vld [vmem:[%s9381_s4 + $0x388] sm:$0xff] }
0x125b   :  { %7067 = vmatprep.subr.bf16.mxu0 %v7462_v12 }
0x125e   :  { %7068 = vmatpush3.bf16.msra.mxu0 %v7251_v41  ;;  %v6191_v41 = vcombine.high %v6126_v62, %v6134_v63 }
0x125f   :  { %7069 = vmatprep.subr.bf16.mxu0 %v7462_v12 }
0x1260   :  { %4002 = vmatprep.subr.bf16.mxu1 %v6191_v41  ;;  %v6091_v41 = vld [vmem:[%s9381_s4 + $0x268] sm:$0xff] }
0x1262   :  { %7070 = vmatpush3.bf16.msra.mxu0 %v7252_v45  ;;  %v6135_v45 = vld [vmem:[%s9381_s4 + $0x3c8] sm:$0xff] }
0x1263   :  { %4039 = vmatprep.subr.bf16.mxu0 %v6145_v56 }
0x1328   :  { %v3397_v51 = vpop.f32.mrb[48].mxu0 }
0x1329   :  { %v3403_v53 = vpack.c.bf16 %v3397_v51, %v8616_v58  ;;  %v7061_v0 = vpop.f32.mrb[49].mxu0  ;;  %v6190_v51 = vcombine.low %v6126_v62, %v6134_v63  ;;  %v6082_v62 = vld [vmem:[%s9381_s4 + $0x220] sm:$0xff] }
0x132a   :  { %v3400_v2 = vpop.f32.mrb[50].mxu0  ;;  %v6193_v0 = vcombine.high %v6127_v37, %v6135_v45  ;;  %v6090_v63 = vld [vmem:[%s9381_s4 + $0x260] sm:$0xff] }
0x132b   :  { %v7062_v30 = vpop.f32.mrb[51].mxu0  ;;  %7072 = vmatmul.mubr.msk.bf16.vlgmr.msra.gmra.mrb[52].mxu0 %vm160_vm10, %v3403_v53  ;;  %v6192_v53 = vcombine.low %v6127_v37, %v6135_v45  ;;  %4003 = vmatpush1.bf16.msra.mxu1 %v6190_v51  ;;  %v6080_v2 = vld [vmem:[%s9381_s4 + $0x210] sm:$0xff]  ;;  %v6083_v37 = vld [vmem:[%s9381_s4 + $0x228] sm:$0xff]  ;;  %v6194_v45 = vcombine.low %v6128_v28, %v6136_v59  ;;  %v6196_v51 = vcombine.low %v6129_v3, %v6137_v60 }
0x132c   :  { %4071 = vmatprep.mubr.bf16.mxu0 %v7461_v1  ;;  %4040 = vmatpush1.bf16.msra.mxu0 %v6144_v44  ;;  %v6088_v30 = vld [vmem:[%s9381_s4 + $0x250] sm:$0xff]  ;;  %v6163_v44 = vcombine.high %v6096_v39, %v6104_v35 }
0x132d   :  { %4041 = vmatprep.subr.bf16.mxu0 %v6161_v16  ;;  %v6181_v16 = vcombine.high %v6113_v49, %v6121_v50 }
0x1330   :  { %4042 = vmatpush1.bf16.msra.mxu0 %v6160_v10  ;;  %v6179_v10 = vcombine.high %v6112_v46, %v6120_v48 }
0x1331   :  { %4043 = vmatprep.subr.bf16.mxu0 %v6177_v61  ;;  %v6197_v61 = vcombine.high %v6129_v3, %v6137_v60 }
0x1334   :  { %4044 = vmatpush1.bf16.msra.mxu0 %v6176_v27  ;;  %v6195_v27 = vcombine.high %v6128_v28, %v6136_v59 }
0x1335   :  { %4045 = vmatprep.subr.bf16.mxu0 %v6193_v0  ;;  %v6153_v0 = vcombine.high %v6083_v37, %v6091_v41 }
0x1338   :  { %4046 = vmatpush1.bf16.msra.mxu0 %v6192_v53  ;;  %v6151_v53 = vcombine.high %v6082_v62, %v6090_v63 }
0x13fe   :  { %v3478_v12 = vpop.f32.mrb[52].mxu0 }
0x13ff   :  { %v3479_v47 = vadd.f32 %v6070_v29, %v3478_v12  ;;  %v7073_v11 = vpop.f32.mrb[53].mxu0  ;;  %v6147_v12 = vcombine.high %v6080_v2, %v6088_v30 }
0x1400   :  { %v3481_v13 = vpop.f32.mrb[54].mxu0  ;;  %v6146_v11 = vcombine.low %v6080_v2, %v6088_v30  ;;  %v6098_v2 = vld [vmem:[%s9381_s4 + $0x2a0] sm:$0xff] }
0x1401   :  { %v3482_v5 = vadd.f32 %v6070_v29, %v3481_v13  ;;  %v7074_v6 = vpop.f32.mrb[55].mxu0  ;;  %v3485_v23 = vadd.f32 %v3479_v47, %v8527_v26  ;;  %v6081_v29 = vld [vmem:[%s9381_s4 + $0x218] sm:$0xff]  ;;  %4082 = vmatprep.subr.bf16.mxu1 %v6147_v12  ;;  %v6106_v30 = vld [vmem:[%s9381_s4 + $0x2e0] sm:$0xff]  ;;  %v6107_v12 = vld [vmem:[%s9381_s4 + $0x2e8] sm:$0xff] }
0x1402   :  { %v6089_v47 = vld [vmem:[%s9381_s4 + $0x258] sm:$0xff] }
0x1403   :  { %v3487_v58 = vsel %vm160_vm10, %v3485_v23, 0.0  ;;  %v3486_v24 = vadd.f32 %v3482_v5, %v8529_v33  ;;  %v6148_v13 = vcombine.low %v6081_v29, %v6089_v47  ;;  %v6149_v5 = vcombine.high %v6081_v29, %v6089_v47  ;;  %v6099_v29 = vld [vmem:[%s9381_s4 + $0x2a8] sm:$0xff] }
0x1404   :  { %3488 = vadd.xlane.f32.xlu1 %v3487_v58  ;;  %v6150_v47 = vcombine.low %v6082_v62, %v6090_v63 }
0x1405   :  { %v3490_v14 = vsel %vm160_vm10, %v3486_v24, 0.0  ;;  %4125 = vmatprep.subr.bf16.mxu0 %v6149_v5  ;;  %v6169_v5 = vcombine.high %v6099_v29, %v6107_v12 }
0x1406   :  { %3491 = vadd.xlane.f32.xlu0 %v3490_v14 }
0x1491   :  { %v3489_v15 = vpop.xlane.xlu1 %3488 }
0x1492   :  { %v3493_v31 = vmul.f32 0.015625, %v3489_v15 }
0x1493   :  { %v3492_v21 = vpop.xlane.xlu0 %3491 }
0x1494   :  { %v8674_v25 = vsub.f32 %v3485_v23, %v3493_v31  ;;  %v3494_v19 = vmul.f32 0.015625, %v3492_v21  ;;  %v6076_v21 = vld [vmem:[%s9383_s6 + $0x7] ss:$0 sm:$0xff] }
0x1496   :  { %v8676_v40 = vsub.f32 %v3486_v24, %v3494_v19  ;;  %v3497_v17 = vmul.f32 %v8674_v25, %v8674_v25 }
0x1498   :  { %v3499_v26 = vsel %vm160_vm10, %v3497_v17, 0.0  ;;  %v3498_v33 = vmul.f32 %v8676_v40, %v8676_v40 }
0x1499   :  { %3500 = vadd.xlane.f32.xlu1 %v3499_v26 }
0x149a   :  { %v3502_v42 = vsel %vm160_vm10, %v3498_v33, 0.0 }
0x149b   :  { %3503 = vadd.xlane.f32.xlu0 %v3502_v42  ;;  %v6077_v42 = vld [vmem:[%s9383_s6 + $0x9] ss:$0 sm:$0xff] }
0x1526   :  { %v3501_v6 = vpop.xlane.xlu1 %3500 }
0x1527   :  { %v3505_v23 = vmul.f32 0.015625, %v3501_v6  ;;  %v6114_v6 = vld [vmem:[%s9381_s4 + $0x320] sm:$0xff] }
0x1528   :  { %v3504_v58 = vpop.xlane.xlu0 %3503 }
0x1529   :  { %v3507_v24 = vadd.f32 1e-05, %v3505_v23  ;;  %v3506_v14 = vmul.f32 0.015625, %v3504_v58  ;;  %v6122_v23 = vld [vmem:[%s9381_s4 + $0x360] sm:$0xff]  ;;  %v6115_v58 = vld [vmem:[%s9381_s4 + $0x328] sm:$0xff] }
0x152b   :  { %7429 = vrsqrt.f32 %v3507_v24  ;;  %v3508_v15 = vadd.f32 1e-05, %v3506_v14  ;;  %v6123_v24 = vld [vmem:[%s9381_s4 + $0x368] sm:$0xff]  ;;  %v6166_v14 = vcombine.low %v6098_v2, %v6106_v30 }
0x152d   :  { %7431 = vrsqrt.f32 %v3508_v15  ;;  %v6168_v15 = vcombine.low %v6099_v29, %v6107_v12 }
0x1535   :  { %v7430_v31 = vpop.eup %7429 }
0x1536   :  { %v3511_v19 = vmul.f32 %v7430_v31, %v8674_v25  ;;  %v6097_v25 = vld [vmem:[%s9381_s4 + $0x298] sm:$0xff]  ;;  %v6183_v31 = vcombine.high %v6114_v6, %v6122_v23 }
0x1537   :  { %v7432_v17 = vpop.eup %7431 }
0x1538   :  { %v3517_v26 = vmul.f32 %v6076_v21, %v3511_v19  ;;  %v3512_v33 = vmul.f32 %v7432_v17, %v8676_v40  ;;  %v6105_v40 = vld [vmem:[%s9381_s4 + $0x2d8] sm:$0xff]  ;;  %v6130_v19 = vld [vmem:[%s9381_s4 + $0x3a0] sm:$0xff] }
0x1539   :  { %v6165_v56 = vcombine.high %v6097_v25, %v6105_v40  ;;  %v6164_v54 = vcombine.low %v6097_v25, %v6105_v40  ;;  %v6138_v17 = vld [vmem:[%s9381_s4 + $0x3e0] sm:$0xff]  ;;  %v6084_v25 = vld [vmem:[%s9381_s4 + $0x230] sm:$0xff] }
0x153a   :  { %v3518_v18 = vmul.f32 %v6076_v21, %v3512_v33  ;;  %v8764_v38 = vadd.f32 %v6077_v42, %v3517_v26  ;;  %v6185_v21 = vcombine.high %v6115_v58, %v6123_v24  ;;  %v6131_v26 = vld [vmem:[%s9381_s4 + $0x3a8] sm:$0xff]  ;;  %v6199_v39 = vcombine.high %v6130_v19, %v6138_v17  ;;  %v6092_v40 = vld [vmem:[%s9381_s4 + $0x270] sm:$0xff] }
0x153b   :  { %v6139_v33 = vld [vmem:[%s9381_s4 + $0x3e8] sm:$0xff]  ;;  %v6198_v46 = vcombine.low %v6130_v19, %v6138_v17  ;;  %v6155_v49 = vcombine.high %v6084_v25, %v6092_v40  ;;  %v6154_v28 = vcombine.low %v6084_v25, %v6092_v40  ;;  %v7265_v19 = vld [vmem:[%s9382_s5 + $0x458] sm:$0xff]  }
0x153c   :  { %v8766_v36 = vadd.f32 %v6077_v42, %v3518_v18  ;;  %v6182_v42 = vcombine.low %v6114_v6, %v6122_v23  ;;  %v6184_v18 = vcombine.low %v6115_v58, %v6123_v24  ;;  %v6201_v35 = vcombine.high %v6131_v26, %v6139_v33  ;;  %v7256_v6 = vld [vmem:[%s9382_s5 + $0x480] sm:$0xff]   ;;  %v7257_v23 = vld [vmem:[%s9382_s5 + $0x448] sm:$0xff]   ;;  %v7266_v17 = vld [vmem:[%s9382_s5 + $0x4d8] sm:$0xff]  }
0x153d   :  { %v6200_v48 = vcombine.low %v6131_v26, %v6139_v33  ;;  %v7258_v58 = vld [vmem:[%s9382_s5 + $0x4c8] sm:$0xff]   ;;  %v7267_v26 = vld [vmem:[%s9382_s5 + $0x418] sm:$0xff]  }
0x153e   :  { %v8770_v43 = vpack.c.bf16 %v8766_v36, %v8764_v38  ;;  %v7259_v24 = vld [vmem:[%s9382_s5 + $0x408] sm:$0xff]   ;;  %v7268_v33 = vld [vmem:[%s9382_s5 + $0x498] sm:$0xff]  }
0x153f   :  { %v7273_v25 = vld [vmem:[%s9382_s5 + $0x468] sm:$0xff]  }
0x1540   :  { %6206 = vmatmul.mubr.msk.bf16.vlgmr.msra.gmra.mrb[56].mxu1 %vm160_vm10, %v8770_v43  ;;  %6207 = vmatmul.mubr.msk.bf16.vlgmr.msra.gmra.mrb[56].mxu0 %vm160_vm10, %v8770_v43  ;;  %v7274_v40 = vld [vmem:[%s9382_s5 + $0x4e8] sm:$0xff]  }
0x1541   :  { %4083 = vmatpush1.bf16.msra.mxu1 %v6146_v11  ;;  %4126 = vmatpush1.bf16.msra.mxu0 %v6148_v13  ;;  %v6152_v11 = vcombine.low %v6083_v37, %v6091_v41  ;;  %v6167_v13 = vcombine.high %v6098_v2, %v6106_v30 }
0x1542   :  { %4084 = vmatprep.subr.bf16.mxu1 %v6163_v44  ;;  %4127 = vmatprep.subr.bf16.mxu0 %v6165_v56  ;;  %v6085_v44 = vld [vmem:[%s9381_s4 + $0x238] sm:$0xff] }
0x1543   :  { %4114 = vmatprep.mubr.bf16.mxu1 %v7461_v1  ;;  %4157 = vmatprep.mubr.bf16.mxu0 %v7461_v1  ;;  %v6093_v56 = vld [vmem:[%s9381_s4 + $0x278] sm:$0xff] }
0x1544   :  { %v6157_v50 = vcombine.high %v6085_v44, %v6093_v56  ;;  %v6156_v59 = vcombine.low %v6085_v44, %v6093_v56  ;;  %v7275_v44 = vld [vmem:[%s9382_s5 + $0x428] sm:$0xff]  }
0x1545   :  { %4085 = vmatpush1.bf16.msra.mxu1 %v6162_v52  ;;  %4128 = vmatpush1.bf16.msra.mxu0 %v6164_v54  ;;  %v6100_v52 = vld [vmem:[%s9381_s4 + $0x2b0] sm:$0xff]  ;;  %v7276_v56 = vld [vmem:[%s9382_s5 + $0x4a8] sm:$0xff]  }
0x1546   :  { %4086 = vmatprep.subr.bf16.mxu1 %v6179_v10  ;;  %4129 = vmatprep.subr.bf16.mxu0 %v6181_v16  ;;  %v6108_v54 = vld [vmem:[%s9381_s4 + $0x2f0] sm:$0xff]  ;;  %v6101_v10 = vld [vmem:[%s9381_s4 + $0x2b8] sm:$0xff] }
0x1547   :  { %v6109_v16 = vld [vmem:[%s9381_s4 + $0x2f8] sm:$0xff]  ;;  %v6171_v3 = vcombine.high %v6100_v52, %v6108_v54  ;;  %v6170_v62 = vcombine.low %v6100_v52, %v6108_v54 }
0x1548   :  { %v6173_v60 = vcombine.high %v6101_v10, %v6109_v16  ;;  %v6172_v63 = vcombine.low %v6101_v10, %v6109_v16  ;;  %v7281_v52 = vld [vmem:[%s9382_s5 + $0x478] sm:$0xff]  }
0x1549   :  { %4087 = vmatpush1.bf16.msra.mxu1 %v6178_v4  ;;  %4130 = vmatpush1.bf16.msra.mxu0 %v6180_v57  ;;  %v6116_v4 = vld [vmem:[%s9381_s4 + $0x330] sm:$0xff]  ;;  %v7282_v54 = vld [vmem:[%s9382_s5 + $0x4f8] sm:$0xff]  }
0x154a   :  { %4088 = vmatprep.subr.bf16.mxu1 %v6195_v27  ;;  %4131 = vmatprep.subr.bf16.mxu0 %v6197_v61  ;;  %v6124_v57 = vld [vmem:[%s9381_s4 + $0x370] sm:$0xff]  ;;  %v6117_v27 = vld [vmem:[%s9381_s4 + $0x338] sm:$0xff] }
0x154b   :  { %v6125_v61 = vld [vmem:[%s9381_s4 + $0x378] sm:$0xff]  ;;  %v6187_v37 = vcombine.high %v6116_v4, %v6124_v57  ;;  %v6186_v2 = vcombine.low %v6116_v4, %v6124_v57 }
0x154c   :  { %v6189_v41 = vcombine.high %v6117_v27, %v6125_v61  ;;  %v6188_v30 = vcombine.low %v6117_v27, %v6125_v61  ;;  %v7283_v10 = vld [vmem:[%s9382_s5 + $0x438] sm:$0xff]  }
0x154d   :  { %4089 = vmatpush1.bf16.msra.mxu1 %v6194_v45  ;;  %4132 = vmatpush1.bf16.msra.mxu0 %v6196_v51  ;;  %v6132_v45 = vld [vmem:[%s9381_s4 + $0x3b0] sm:$0xff]  ;;  %v7284_v16 = vld [vmem:[%s9382_s5 + $0x4b8] sm:$0xff]  }
0x154e   :  { %4168 = vmatprep.subr.bf16.mxu1 %v6151_v53  ;;  %4211 = vmatprep.subr.bf16.mxu0 %v6153_v0  ;;  %v6140_v51 = vld [vmem:[%s9381_s4 + $0x3f0] sm:$0xff]  ;;  %v6133_v53 = vld [vmem:[%s9381_s4 + $0x3b8] sm:$0xff] }
0x154f   :  { %v6141_v0 = vld [vmem:[%s9381_s4 + $0x3f8] sm:$0xff]  ;;  %v6203_v29 = vcombine.high %v6132_v45, %v6140_v51 }
0x1550   :  { %6208 = vmatmul.mubr.msk.bf16.vlgmr.msra.gmra.mrb[60].mxu1 %vm160_vm10, %v8770_v43  ;;  %6209 = vmatmul.mubr.msk.bf16.vlgmr.msra.gmra.mrb[60].mxu0 %vm160_vm10, %v8770_v43  ;;  %v6205_v12 = vcombine.high %v6133_v53, %v6141_v0 }
0x1551   :  { %4169 = vmatpush1.bf16.msra.mxu1 %v6150_v47  ;;  %4212 = vmatpush1.bf16.msra.mxu0 %v6152_v11  ;;  %v6202_v47 = vcombine.low %v6132_v45, %v6140_v51  ;;  %v6204_v11 = vcombine.low %v6133_v53, %v6141_v0 }
0x1552   :  { %4170 = vmatprep.subr.bf16.mxu1 %v6167_v13  ;;  %4213 = vmatprep.subr.bf16.mxu0 %v6169_v5  ;;  %v7253_v13 = vld [vmem:[%s9382_s5 + $0x440] sm:$0xff]  }
0x1553   :  { %4200 = vmatprep.mubr.bf16.mxu1 %v7461_v1  ;;  %4243 = vmatprep.mubr.bf16.mxu0 %v7461_v1  ;;  %v7255_v5 = vld [vmem:[%s9382_s5 + $0x400] sm:$0xff]  }
0x1555   :  { %4171 = vmatpush1.bf16.msra.mxu1 %v6166_v14  ;;  %4214 = vmatpush1.bf16.msra.mxu0 %v6168_v15  ;;  %v7260_v14 = vld [vmem:[%s9382_s5 + $0x488] sm:$0xff]   ;;  %v7261_v15 = vld [vmem:[%s9382_s5 + $0x450] sm:$0xff]  }
0x1556   :  { %4172 = vmatprep.subr.bf16.mxu1 %v6183_v31  ;;  %4215 = vmatprep.subr.bf16.mxu0 %v6185_v21  ;;  %v7263_v31 = vld [vmem:[%s9382_s5 + $0x410] sm:$0xff]  }
0x1557   :  { %v7264_v21 = vld [vmem:[%s9382_s5 + $0x490] sm:$0xff]  }
0x1559   :  { %4173 = vmatpush1.bf16.msra.mxu1 %v6182_v42  ;;  %4216 = vmatpush1.bf16.msra.mxu0 %v6184_v18  ;;  %v7269_v42 = vld [vmem:[%s9382_s5 + $0x460] sm:$0xff]  }
0x155a   :  { %4174 = vmatprep.subr.bf16.mxu1 %v6199_v39  ;;  %4217 = vmatprep.subr.bf16.mxu0 %v6201_v35  ;;  %v7270_v18 = vld [vmem:[%s9382_s5 + $0x4e0] sm:$0xff]  }
0x155b   :  { %v7271_v39 = vld [vmem:[%s9382_s5 + $0x420] sm:$0xff]  }
0x155c   :  { %v7272_v35 = vld [vmem:[%s9382_s5 + $0x4a0] sm:$0xff]  }
0x155d   :  { %4175 = vmatpush1.bf16.msra.mxu1 %v6198_v46  ;;  %4218 = vmatpush1.bf16.msra.mxu0 %v6200_v48  ;;  %v7277_v46 = vld [vmem:[%s9382_s5 + $0x470] sm:$0xff]  }
0x155e   :  { %4254 = vmatprep.subr.bf16.mxu1 %v6155_v49  ;;  %4297 = vmatprep.subr.bf16.mxu0 %v6157_v50  ;;  %v7278_v48 = vld [vmem:[%s9382_s5 + $0x4f0] sm:$0xff]  }
0x155f   :  { %v7279_v49 = vld [vmem:[%s9382_s5 + $0x430] sm:$0xff]  }
0x1560   :  { %6210 = vmatmul.mubr.msk.bf16.vlgmr.msra.gmra.mrb[64].mxu1 %vm160_vm10, %v8770_v43  ;;  %6211 = vmatmul.mubr.msk.bf16.vlgmr.msra.gmra.mrb[64].mxu0 %vm160_vm10, %v8770_v43  ;;  %v7280_v50 = vld [vmem:[%s9382_s5 + $0x4b0] sm:$0xff]  }
0x1561   :  { %4255 = vmatpush1.bf16.msra.mxu1 %v6154_v28  ;;  %4298 = vmatpush1.bf16.msra.mxu0 %v6156_v59  ;;  %v7285_v28 = vld [vmem:[%s9382_s5 + $0x540] sm:$0xff]  }
0x1562   :  { %4256 = vmatprep.subr.bf16.mxu1 %v6171_v3  ;;  %4299 = vmatprep.subr.bf16.mxu0 %v6173_v60  ;;  %v7286_v59 = vld [vmem:[%s9382_s5 + $0x5c0] sm:$0xff]   ;;  %v6039_v3 = vld [vmem:[%s9383_s6 + $0xb] ss:$2 sm:$0xff] }
0x1563   :  { %4286 = vmatprep.mubr.bf16.mxu1 %v7461_v1  ;;  %4329 = vmatprep.mubr.bf16.mxu0 %v7461_v1  ;;  %v7254_v1 = vld [vmem:[%s9382_s5 + $0x4c0] sm:$0xff]   ;;  %v3596_v60 = vrot.slane %v6039_v3, %v7594_v32  ;;  %v3604_v4 = vrot.slane %v6039_v3, %v8134_v9  ;;  %v3600_v57 = vrot.slane %v6039_v3, %v7600_v34 }
0x1564   :  { %v3608_v27 = vrot.slane %v6039_v3, %v8140_v55 }
0x1565   :  { %4257 = vmatpush1.bf16.msra.mxu1 %v6170_v62  ;;  %4300 = vmatpush1.bf16.msra.mxu0 %v6172_v63 }
0x1566   :  { %4258 = vmatprep.subr.bf16.mxu1 %v6187_v37  ;;  %4301 = vmatprep.subr.bf16.mxu0 %v6189_v41 }
0x1569   :  { %4259 = vmatpush1.bf16.msra.mxu1 %v6186_v2  ;;  %4302 = vmatpush1.bf16.msra.mxu0 %v6188_v30 }
0x156a   :  { %4260 = vmatprep.subr.bf16.mxu1 %v6203_v29  ;;  %4303 = vmatprep.subr.bf16.mxu0 %v6205_v12 }
0x156d   :  { %4261 = vmatpush1.bf16.msra.mxu1 %v6202_v47  ;;  %4304 = vmatpush1.bf16.msra.mxu0 %v6204_v11 }
0x156e   :  { %6811 = vmatprep.subr.bf16.mxu1 %v7253_v13  ;;  %6833 = vmatprep.subr.bf16.mxu0 %v7254_v1 }
0x1570   :  { %6212 = vmatmul.mubr.msk.bf16.vlgmr.msra.gmra.mrb[68].mxu1 %vm160_vm10, %v8770_v43  ;;  %6213 = vmatmul.mubr.msk.bf16.vlgmr.msra.gmra.mrb[68].mxu0 %vm160_vm10, %v8770_v43  ;;  %v7262_v43 = vld [vmem:[%s9382_s5 + $0x4d0] sm:$0xff]  }
0x1571   :  { %6812 = vmatpush3.bf16.msra.mxu1 %v7255_v5  ;;  %6834 = vmatpush3.bf16.msra.mxu0 %v7256_v6 }
0x1572   :  { %6813 = vmatprep.subr.bf16.mxu1 %v7257_v23  ;;  %6835 = vmatprep.subr.bf16.mxu0 %v7258_v58 }
0x1575   :  { %6814 = vmatpush3.bf16.msra.mxu1 %v7259_v24  ;;  %6836 = vmatpush3.bf16.msra.mxu0 %v7260_v14 }
0x1576   :  { %6815 = vmatprep.subr.bf16.mxu1 %v7261_v15  ;;  %6837 = vmatprep.subr.bf16.mxu0 %v7262_v43 }
0x1579   :  { %6816 = vmatpush3.bf16.msra.mxu1 %v7263_v31  ;;  %6838 = vmatpush3.bf16.msra.mxu0 %v7264_v21 }
0x157a   :  { %6817 = vmatprep.subr.bf16.mxu1 %v7265_v19  ;;  %6839 = vmatprep.subr.bf16.mxu0 %v7266_v17  ;;  %v7287_v17 = vld [vmem:[%s9382_s5 + $0x500] sm:$0xff]  }
0x157d   :  { %6818 = vmatpush3.bf16.msra.mxu1 %v7267_v26  ;;  %6840 = vmatpush3.bf16.msra.mxu0 %v7268_v33  ;;  %v7288_v26 = vld [vmem:[%s9382_s5 + $0x580] sm:$0xff]   ;;  %v7289_v33 = vld [vmem:[%s9382_s5 + $0x548] sm:$0xff]  }
0x157e   :  { %6819 = vmatprep.subr.bf16.mxu1 %v7269_v42  ;;  %6841 = vmatprep.subr.bf16.mxu0 %v7270_v18  ;;  %v7290_v42 = vld [vmem:[%s9382_s5 + $0x5c8] sm:$0xff]  }
0x157f   :  { %v7291_v18 = vld [vmem:[%s9382_s5 + $0x508] sm:$0xff]  }
0x1581   :  { %6820 = vmatpush3.bf16.msra.mxu1 %v7271_v39  ;;  %6842 = vmatpush3.bf16.msra.mxu0 %v7272_v35  ;;  %v7292_v39 = vld [vmem:[%s9382_s5 + $0x588] sm:$0xff]   ;;  %v3612_v35 = vrot.slane %v6039_v3, %v8159_v7 }
0x1582   :  { %6821 = vmatprep.subr.bf16.mxu1 %v7273_v25  ;;  %6843 = vmatprep.subr.bf16.mxu0 %v7274_v40  ;;  %v3620_v25 = vrot.slane %v6039_v3, %v8162_v8  ;;  %v7293_v40 = vld [vmem:[%s9382_s5 + $0x550] sm:$0xff]  }
0x1585   :  { %6822 = vmatpush3.bf16.msra.mxu1 %v7275_v44  ;;  %6844 = vmatpush3.bf16.msra.mxu0 %v7276_v56  ;;  %v7294_v44 = vld [vmem:[%s9382_s5 + $0x5d0] sm:$0xff]   ;;  %v3616_v56 = vrot.slane %v6039_v3, %v8165_v20 }
0x1586   :  { %6823 = vmatprep.subr.bf16.mxu1 %v7277_v46  ;;  %6845 = vmatprep.subr.bf16.mxu0 %v7278_v48  ;;  %v3624_v46 = vrot.slane %v6039_v3, %v8168_v22  ;;  %v7298_v3 = vld [vmem:[%s9382_s5 + $0x5d8] sm:$0xff]  }
0x1589   :  { %6824 = vmatpush3.bf16.msra.mxu1 %v7279_v49  ;;  %6846 = vmatpush3.bf16.msra.mxu0 %v7280_v50  ;;  %v7295_v50 = vld [vmem:[%s9382_s5 + $0x510] sm:$0xff]  }
0x158a   :  { %6825 = vmatprep.subr.bf16.mxu1 %v7281_v52  ;;  %6847 = vmatprep.subr.bf16.mxu0 %v7282_v54  ;;  %v7296_v52 = vld [vmem:[%s9382_s5 + $0x590] sm:$0xff]  }
0x158d   :  { %6826 = vmatpush3.bf16.msra.mxu1 %v7283_v10  ;;  %6848 = vmatpush3.bf16.msra.mxu0 %v7284_v16 }
0x158e   :  { %6855 = vmatprep.subr.bf16.mxu1 %v7285_v28  ;;  %6877 = vmatprep.subr.bf16.mxu0 %v7286_v59  ;;  %v7297_v59 = vld [vmem:[%s9382_s5 + $0x558] sm:$0xff]  }
0x1613   :  { %v4030_v61 = vpop.f32.mrb[56].mxu1  ;;  %v4073_v62 = vpop.f32.mrb[56].mxu0 }
0x1614   :  { %v4031_v63 = vadd.f32 %v4030_v61, %v3596_v60  ;;  %v4074_v37 = vadd.f32 %v4073_v62, %v3604_v4  ;;  %v4032_v41 = vpop.f32.mrb[57].mxu1  ;;  %v4075_v45 = vpop.f32.mrb[57].mxu0 }
0x1615   :  { %v4033_v51 = vadd.f32 %v4032_v41, %v3600_v57  ;;  %v4076_v53 = vadd.f32 %v4075_v45, %v3608_v27  ;;  %v4034_v0 = vpop.f32.mrb[58].mxu1  ;;  %v4077_v2 = vpop.f32.mrb[58].mxu0 }
0x1616   :  { %v4035_v30 = vadd.f32 %v4034_v0, %v3596_v60  ;;  %v4078_v29 = vadd.f32 %v4077_v2, %v3604_v4  ;;  %v4036_v12 = vpop.f32.mrb[59].mxu1  ;;  %v4079_v47 = vpop.f32.mrb[59].mxu0  ;;  %v4340_v1 = vmax.f32 %v4031_v63, 0.0  ;;  %v4342_v5 = vmax.f32 %v4074_v37, 0.0 }
0x1617   :  { %v4037_v11 = vadd.f32 %v4036_v12, %v3600_v57  ;;  %v4080_v13 = vadd.f32 %v4079_v47, %v3608_v27  ;;  %v4341_v58 = vmax.f32 %v4033_v51, 0.0  ;;  %v4343_v24 = vmax.f32 %v4076_v53, 0.0  ;;  %v7299_v51 = vld [vmem:[%s9382_s5 + $0x518] sm:$0xff]   ;;  %v7301_v12 = vld [vmem:[%s9382_s5 + $0x560] sm:$0xff]  }
0x1618   :  { %v4356_v6 = vmax.f32 %v4035_v30, 0.0  ;;  %v4358_v23 = vmax.f32 %v4078_v29, 0.0  ;;  %v7300_v53 = vld [vmem:[%s9382_s5 + $0x598] sm:$0xff]   ;;  %v7302_v47 = vld [vmem:[%s9382_s5 + $0x5e0] sm:$0xff]  }
0x1619   :  { %v4357_v14 = vmax.f32 %v4037_v11, 0.0  ;;  %v4359_v15 = vmax.f32 %v4080_v13, 0.0 }
0x161a   :  { %v4372_v43 = vpack.c.bf16 %v4356_v6, %v4340_v1  ;;  %v4374_v31 = vpack.c.bf16 %v4358_v23, %v4342_v5 }
0x161b   :  { %v4373_v21 = vpack.c.bf16 %v4357_v14, %v4341_v58  ;;  %v4375_v19 = vpack.c.bf16 %v4359_v15, %v4343_v24  ;;  %v7303_v14 = vld [vmem:[%s9382_s5 + $0x520] sm:$0xff]  }
0x161c   :  { %v7304_v15 = vld [vmem:[%s9382_s5 + $0x5a0] sm:$0xff]  }
0x161d   :  { %5449 = vmatprep.mubr.bf16.mxu1 %v4373_v21  ;;  %5490 = vmatprep.mubr.bf16.mxu0 %v4375_v19  ;;  %v9094_v21 = vld [vmem:[%s9383_s6 + $0x1b] ss:$2 sm:$0xff] }
0x161e   :  { %5450 = vmatmul.mubr.bf16.vlgmr.msra.gmra.mrb[72].mxu1 %v4372_v43  ;;  %5491 = vmatmul.mubr.bf16.vlgmr.msra.gmra.mrb[72].mxu0 %v4374_v31  ;;  %v7305_v43 = vld [vmem:[%s9382_s5 + $0x568] sm:$0xff]  }
0x161f   :  { %6856 = vmatpush3.bf16.msra.mxu1 %v7287_v17  ;;  %6878 = vmatpush3.bf16.msra.mxu0 %v7288_v26  ;;  %v7306_v31 = vld [vmem:[%s9382_s5 + $0x5e8] sm:$0xff]   ;;  %v3628_v26 = vrot.slane %v9094_v21, %v7594_v32  ;;  %v7311_v32 = vld [vmem:[%s9382_s5 + $0x530] sm:$0xff]  }
0x1620   :  { %6857 = vmatprep.subr.bf16.mxu1 %v7289_v33  ;;  %6879 = vmatprep.subr.bf16.mxu0 %v7290_v42  ;;  %v7307_v19 = vld [vmem:[%s9382_s5 + $0x528] sm:$0xff]   ;;  %v3636_v33 = vrot.slane %v9094_v21, %v8134_v9  ;;  %v7309_v42 = vld [vmem:[%s9382_s5 + $0x570] sm:$0xff]  }
0x1621   :  { %v7308_v17 = vld [vmem:[%s9382_s5 + $0x5a8] sm:$0xff]   ;;  %v7312_v9 = vld [vmem:[%s9382_s5 + $0x5b0] sm:$0xff]  }
0x1623   :  { %v4116_v48 = vpop.f32.mrb[60].mxu1  ;;  %v4159_v49 = vpop.f32.mrb[60].mxu0  ;;  %6858 = vmatpush3.bf16.msra.mxu1 %v7291_v18  ;;  %6880 = vmatpush3.bf16.msra.mxu0 %v7292_v39  ;;  %v7310_v18 = vld [vmem:[%s9382_s5 + $0x5f0] sm:$0xff]   ;;  %v3632_v39 = vrot.slane %v9094_v21, %v7600_v34  ;;  %v7313_v34 = vld [vmem:[%s9382_s5 + $0x578] sm:$0xff]  }
0x1624   :  { %v4117_v54 = vadd.f32 %v4116_v48, %v3612_v35  ;;  %v4160_v10 = vadd.f32 %v4159_v49, %v3620_v25  ;;  %v4118_v16 = vpop.f32.mrb[61].mxu1  ;;  %v4161_v28 = vpop.f32.mrb[61].mxu0  ;;  %6859 = vmatprep.subr.bf16.mxu1 %v7293_v40  ;;  %6881 = vmatprep.subr.bf16.mxu0 %v7294_v44 }
0x1625   :  { %v4119_v60 = vadd.f32 %v4118_v16, %v3616_v56  ;;  %v4162_v4 = vadd.f32 %v4161_v28, %v3624_v46  ;;  %v4120_v57 = vpop.f32.mrb[62].mxu1  ;;  %v4163_v27 = vpop.f32.mrb[62].mxu0 }
0x1626   :  { %v4121_v61 = vadd.f32 %v4120_v57, %v3612_v35  ;;  %v4164_v62 = vadd.f32 %v4163_v27, %v3620_v25  ;;  %v4122_v63 = vpop.f32.mrb[63].mxu1  ;;  %v4165_v37 = vpop.f32.mrb[63].mxu0  ;;  %v4344_v0 = vmax.f32 %v4117_v54, 0.0  ;;  %v4346_v2 = vmax.f32 %v4160_v10, 0.0  ;;  %v7316_v57 = vld [vmem:[%s9382_s5 + $0x5b8] sm:$0xff]  }
0x1627   :  { %v4123_v41 = vadd.f32 %v4122_v63, %v3616_v56  ;;  %v4166_v45 = vadd.f32 %v4165_v37, %v3624_v46  ;;  %6860 = vmatpush3.bf16.msra.mxu1 %v7295_v50  ;;  %6882 = vmatpush3.bf16.msra.mxu0 %v7296_v52  ;;  %v4345_v11 = vmax.f32 %v4119_v60, 0.0  ;;  %v4347_v13 = vmax.f32 %v4162_v4, 0.0  ;;  %v7315_v4 = vld [vmem:[%s9382_s5 + $0x538] sm:$0xff]   ;;  %v7317_v37 = vld [vmem:[%s9382_s5 + $0x640] sm:$0xff]  }
0x1628   :  { %v4360_v30 = vmax.f32 %v4121_v61, 0.0  ;;  %v4362_v29 = vmax.f32 %v4164_v62, 0.0  ;;  %6861 = vmatprep.subr.bf16.mxu1 %v7297_v59  ;;  %6883 = vmatprep.subr.bf16.mxu0 %v7298_v3  ;;  %v3640_v35 = vrot.slane %v9094_v21, %v8140_v55  ;;  %v7314_v55 = vld [vmem:[%s9382_s5 + $0x5f8] sm:$0xff]  }
0x1629   :  { %v4361_v1 = vmax.f32 %v4123_v41, 0.0  ;;  %v4363_v5 = vmax.f32 %v4166_v45, 0.0  ;;  %v7318_v41 = vld [vmem:[%s9382_s5 + $0x6c0] sm:$0xff]  }
0x162a   :  { %v9075_v6 = vpack.c.bf16 %v4360_v30, %v4344_v0  ;;  %v9077_v23 = vpack.c.bf16 %v4362_v29, %v4346_v2 }
0x162b   :  { %v4377_v58 = vpack.c.bf16 %v4361_v1, %v4345_v11  ;;  %v4379_v24 = vpack.c.bf16 %v4363_v5, %v4347_v13  ;;  %6862 = vmatpush3.bf16.msra.mxu1 %v7299_v51  ;;  %6884 = vmatpush3.bf16.msra.mxu0 %v7300_v53  ;;  %v7320_v11 = vld [vmem:[%s9382_s5 + $0x680] sm:$0xff]   ;;  %v7321_v13 = vld [vmem:[%s9382_s5 + $0x648] sm:$0xff]  }
0x162c   :  { %6863 = vmatprep.subr.bf16.mxu1 %v7301_v12  ;;  %6885 = vmatprep.subr.bf16.mxu0 %v7302_v47  ;;  %v7319_v47 = vld [vmem:[%s9382_s5 + $0x600] sm:$0xff]   ;;  %v7322_v1 = vld [vmem:[%s9382_s5 + $0x6c8] sm:$0xff]  }
0x162d   :  { %5531 = vmatprep.mubr.bf16.mxu1 %v4377_v58  ;;  %5572 = vmatprep.mubr.bf16.mxu0 %v4379_v24  ;;  %v7323_v5 = vld [vmem:[%s9382_s5 + $0x608] sm:$0xff]   ;;  %v3644_v58 = vrot.slane %v9094_v21, %v8159_v7  ;;  %v3652_v24 = vrot.slane %v9094_v21, %v8162_v8  ;;  %v7326_v7 = vld [vmem:[%s9382_s5 + $0x6d0] sm:$0xff]  }
0x162f   :  { %6864 = vmatpush3.bf16.msra.mxu1 %v7303_v14  ;;  %6886 = vmatpush3.bf16.msra.mxu0 %v7304_v15  ;;  %v3648_v14 = vrot.slane %v9094_v21, %v8165_v20  ;;  %v3656_v15 = vrot.slane %v9094_v21, %v8168_v22  ;;  %v7328_v20 = vld [vmem:[%s9382_s5 + $0x690] sm:$0xff]   ;;  %v7329_v22 = vld [vmem:[%s9382_s5 + $0x658] sm:$0xff]  }
0x1630   :  { %6865 = vmatprep.subr.bf16.mxu1 %v7305_v43  ;;  %6887 = vmatprep.subr.bf16.mxu0 %v7306_v31  ;;  %v7327_v31 = vld [vmem:[%s9382_s5 + $0x610] sm:$0xff]  }
0x1633   :  { %v4202_v25 = vpop.f32.mrb[64].mxu1  ;;  %v4245_v40 = vpop.f32.mrb[64].mxu0  ;;  %6866 = vmatpush3.bf16.msra.mxu1 %v7307_v19  ;;  %6888 = vmatpush3.bf16.msra.mxu0 %v7308_v17 }
0x1634   :  { %v4203_v44 = vadd.f32 %v4202_v25, %v3628_v26  ;;  %v4246_v56 = vadd.f32 %v4245_v40, %v3636_v33  ;;  %v4204_v46 = vpop.f32.mrb[65].mxu1  ;;  %v4247_v48 = vpop.f32.mrb[65].mxu0  ;;  %6867 = vmatprep.subr.bf16.mxu1 %v7309_v42  ;;  %6889 = vmatprep.subr.bf16.mxu0 %v7310_v18 }
0x1635   :  { %v4205_v49 = vadd.f32 %v4204_v46, %v3632_v39  ;;  %v4248_v50 = vadd.f32 %v4247_v48, %v3640_v35  ;;  %v4206_v52 = vpop.f32.mrb[66].mxu1  ;;  %v4249_v54 = vpop.f32.mrb[66].mxu0  ;;  %v7331_v46 = vld [vmem:[%s9382_s5 + $0x618] sm:$0xff]  }
0x1636   :  { %v4207_v10 = vadd.f32 %v4206_v52, %v3628_v26  ;;  %v4250_v16 = vadd.f32 %v4249_v54, %v3636_v33  ;;  %v4208_v28 = vpop.f32.mrb[67].mxu1  ;;  %v4251_v59 = vpop.f32.mrb[67].mxu0  ;;  %v4348_v27 = vmax.f32 %v4203_v44, 0.0  ;;  %v4350_v61 = vmax.f32 %v4246_v56, 0.0  ;;  %v7333_v52 = vld [vmem:[%s9382_s5 + $0x660] sm:$0xff]  }
0x1637   :  { %v4209_v3 = vadd.f32 %v4208_v28, %v3632_v39  ;;  %v4252_v60 = vadd.f32 %v4251_v59, %v3640_v35  ;;  %6868 = vmatpush3.bf16.msra.mxu1 %v7311_v32  ;;  %6890 = vmatpush3.bf16.msra.mxu0 %v7312_v9  ;;  %v4349_v45 = vmax.f32 %v4205_v49, 0.0  ;;  %v4351_v51 = vmax.f32 %v4248_v50, 0.0  ;;  %v7330_v35 = vld [vmem:[%s9382_s5 + $0x6d8] sm:$0xff]   ;;  %v7334_v59 = vld [vmem:[%s9382_s5 + $0x6e0] sm:$0xff]  }
0x1638   :  { %v4364_v62 = vmax.f32 %v4207_v10, 0.0  ;;  %v4366_v63 = vmax.f32 %v4250_v16, 0.0  ;;  %6869 = vmatprep.subr.bf16.mxu1 %v7313_v34  ;;  %6891 = vmatprep.subr.bf16.mxu0 %v7314_v55  ;;  %v7332_v50 = vld [vmem:[%s9382_s5 + $0x698] sm:$0xff]  }
0x1639   :  { %v4365_v53 = vmax.f32 %v4209_v3, 0.0  ;;  %v4367_v0 = vmax.f32 %v4252_v60, 0.0 }
0x163a   :  { %v9140_v2 = vpack.c.bf16 %v4364_v62, %v4348_v27  ;;  %v9142_v30 = vpack.c.bf16 %v4366_v63, %v4350_v61  ;;  %v7335_v27 = vld [vmem:[%s9382_s5 + $0x620] sm:$0xff]   ;;  %v7337_v62 = vld [vmem:[%s9382_s5 + $0x668] sm:$0xff]  }
0x163b   :  { %v4381_v29 = vpack.c.bf16 %v4365_v53, %v4349_v45  ;;  %v4383_v12 = vpack.c.bf16 %v4367_v0, %v4351_v51  ;;  %6870 = vmatpush3.bf16.msra.mxu1 %v7315_v4  ;;  %6892 = vmatpush3.bf16.msra.mxu0 %v7316_v57  ;;  %v7336_v61 = vld [vmem:[%s9382_s5 + $0x6a0] sm:$0xff]   ;;  %v7338_v63 = vld [vmem:[%s9382_s5 + $0x6e8] sm:$0xff]   ;;  %v7341_v45 = vld [vmem:[%s9382_s5 + $0x670] sm:$0xff]  }
0x163c   :  { %6899 = vmatprep.subr.bf16.mxu1 %v7317_v37  ;;  %6921 = vmatprep.subr.bf16.mxu0 %v7318_v41  ;;  %v7339_v37 = vld [vmem:[%s9382_s5 + $0x628] sm:$0xff]   ;;  %v7342_v51 = vld [vmem:[%s9382_s5 + $0x6f0] sm:$0xff]  }
0x163d   :  { %v7340_v41 = vld [vmem:[%s9382_s5 + $0x6a8] sm:$0xff]   ;;  %v7343_v53 = vld [vmem:[%s9382_s5 + $0x630] sm:$0xff]  }
0x163e   :  { %5532 = vmatmul.mubr.bf16.vlgmr.msra.gmra.mrb[76].mxu1 %v9075_v6  ;;  %5573 = vmatmul.mubr.bf16.vlgmr.msra.gmra.mrb[76].mxu0 %v9077_v23  ;;  %v7324_v6 = vld [vmem:[%s9382_s5 + $0x688] sm:$0xff]   ;;  %v7325_v23 = vld [vmem:[%s9382_s5 + $0x650] sm:$0xff]  }
0x163f   :  { %6900 = vmatpush3.bf16.msra.mxu1 %v7319_v47  ;;  %5613 = vmatprep.mubr.bf16.mxu1 %v4381_v29  ;;  %v7344_v0 = vld [vmem:[%s9382_s5 + $0x6b0] sm:$0xff]   ;;  %v7345_v29 = vld [vmem:[%s9382_s5 + $0x678] sm:$0xff]  }
0x1640   :  { %6922 = vmatpush3.bf16.msra.mxu0 %v7320_v11  ;;  %5654 = vmatprep.mubr.bf16.mxu0 %v4383_v12  ;;  %v7346_v12 = vld [vmem:[%s9382_s5 + $0x6f8] sm:$0xff]  }
0x1641   :  { %6901 = vmatprep.subr.bf16.mxu1 %v7321_v13  ;;  %6923 = vmatprep.subr.bf16.mxu0 %v7322_v1  ;;  %v7347_v47 = vld [vmem:[%s9382_s5 + $0x638] sm:$0xff]   ;;  %v7349_v13 = vld [vmem:[%s9382_s5 + $0x740] sm:$0xff]  }
0x1642   :  { %v7348_v11 = vld [vmem:[%s9382_s5 + $0x6b8] sm:$0xff]   ;;  %v7350_v1 = vld [vmem:[%s9382_s5 + $0x7c0] sm:$0xff]  }
0x1643   :  { %v4288_v8 = vpop.f32.mrb[68].mxu1  ;;  %v4331_v43 = vpop.f32.mrb[68].mxu0  ;;  %6902 = vmatpush3.bf16.msra.mxu1 %v7323_v5  ;;  %v7351_v5 = vld [vmem:[%s9382_s5 + $0x700] sm:$0xff]  }
0x1644   :  { %v4289_v19 = vadd.f32 %v4288_v8, %v3644_v58  ;;  %v4332_v17 = vadd.f32 %v4331_v43, %v3652_v24  ;;  %6924 = vmatpush3.bf16.msra.mxu0 %v7324_v6  ;;  %v4290_v26 = vpop.f32.mrb[69].mxu1  ;;  %v4333_v33 = vpop.f32.mrb[69].mxu0  ;;  %6903 = vmatprep.subr.bf16.mxu1 %v7325_v23  ;;  %v7354_v6 = vld [vmem:[%s9382_s5 + $0x7c8] sm:$0xff]   ;;  %v7361_v8 = vld [vmem:[%s9382_s5 + $0x758] sm:$0xff]  }
0x1645   :  { %v4291_v21 = vadd.f32 %v4290_v26, %v3648_v14  ;;  %v4334_v42 = vadd.f32 %v4333_v33, %v3656_v15  ;;  %v4292_v18 = vpop.f32.mrb[70].mxu1  ;;  %v4335_v39 = vpop.f32.mrb[70].mxu0  ;;  %6925 = vmatprep.subr.bf16.mxu0 %v7326_v7  ;;  %v7355_v23 = vld [vmem:[%s9382_s5 + $0x708] sm:$0xff]   ;;  %v7360_v7 = vld [vmem:[%s9382_s5 + $0x790] sm:$0xff]   ;;  %v7362_v43 = vld [vmem:[%s9382_s5 + $0x7d8] sm:$0xff]  }
0x1646   :  { %v4293_v25 = vadd.f32 %v4292_v18, %v3644_v58  ;;  %v4336_v40 = vadd.f32 %v4335_v39, %v3652_v24  ;;  %v4294_v32 = vpop.f32.mrb[71].mxu1  ;;  %v4337_v9 = vpop.f32.mrb[71].mxu0  ;;  %v4352_v48 = vmax.f32 %v4289_v19, 0.0  ;;  %v4354_v34 = vmax.f32 %v4332_v17, 0.0  ;;  %v7352_v58 = vld [vmem:[%s9382_s5 + $0x780] sm:$0xff]   ;;  %v7353_v24 = vld [vmem:[%s9382_s5 + $0x748] sm:$0xff]  }
0x1647   :  { %v4295_v44 = vadd.f32 %v4294_v32, %v3648_v14  ;;  %v4338_v56 = vadd.f32 %v4337_v9, %v3656_v15  ;;  %6904 = vmatpush3.bf16.msra.mxu1 %v7327_v31  ;;  %v4353_v54 = vmax.f32 %v4291_v21, 0.0  ;;  %v4355_v10 = vmax.f32 %v4334_v42, 0.0  ;;  %v7356_v14 = vld [vmem:[%s9382_s5 + $0x788] sm:$0xff]   ;;  %v7359_v15 = vld [vmem:[%s9382_s5 + $0x710] sm:$0xff]   ;;  %v7363_v31 = vld [vmem:[%s9382_s5 + $0x718] sm:$0xff]  }
0x1648   :  { %v4368_v55 = vmax.f32 %v4293_v25, 0.0  ;;  %v4370_v49 = vmax.f32 %v4336_v40, 0.0  ;;  %6926 = vmatpush3.bf16.msra.mxu0 %v7328_v20  ;;  %6905 = vmatprep.subr.bf16.mxu1 %v7329_v22  ;;  %v7364_v19 = vld [vmem:[%s9382_s5 + $0x798] sm:$0xff]   ;;  %v7365_v17 = vld [vmem:[%s9382_s5 + $0x760] sm:$0xff]   ;;  %v7369_v22 = vld [vmem:[%s9382_s5 + $0x768] sm:$0xff]  }
0x1649   :  { %v4369_v16 = vmax.f32 %v4295_v44, 0.0  ;;  %v4371_v28 = vmax.f32 %v4338_v56, 0.0  ;;  %6927 = vmatprep.subr.bf16.mxu0 %v7330_v35  ;;  %v7366_v26 = vld [vmem:[%s9382_s5 + $0x7e0] sm:$0xff]   ;;  %v7370_v21 = vld [vmem:[%s9382_s5 + $0x7e8] sm:$0xff]   ;;  %v7373_v39 = vld [vmem:[%s9382_s5 + $0x770] sm:$0xff]  }
0x164a   :  { %v9202_v3 = vpack.c.bf16 %v4368_v55, %v4352_v48  ;;  %v9204_v60 = vpack.c.bf16 %v4370_v49, %v4354_v34  ;;  %v7367_v33 = vld [vmem:[%s9382_s5 + $0x720] sm:$0xff]   ;;  %v7371_v42 = vld [vmem:[%s9382_s5 + $0x728] sm:$0xff]   ;;  %v7374_v35 = vld [vmem:[%s9382_s5 + $0x7f0] sm:$0xff]  }
0x164b   :  { %v4385_v4 = vpack.c.bf16 %v4369_v16, %v4353_v54  ;;  %v4387_v57 = vpack.c.bf16 %v4371_v28, %v4355_v10  ;;  %6906 = vmatpush3.bf16.msra.mxu1 %v7331_v46  ;;  %v7368_v20 = vld [vmem:[%s9382_s5 + $0x7a0] sm:$0xff]   ;;  %v7372_v18 = vld [vmem:[%s9382_s5 + $0x7a8] sm:$0xff]   ;;  %v7375_v25 = vld [vmem:[%s9382_s5 + $0x730] sm:$0xff]  }
0x164c   :  { %6928 = vmatpush3.bf16.msra.mxu0 %v7332_v50  ;;  %6907 = vmatprep.subr.bf16.mxu1 %v7333_v52  ;;  %v7376_v40 = vld [vmem:[%s9382_s5 + $0x7b0] sm:$0xff]   ;;  %v7377_v32 = vld [vmem:[%s9382_s5 + $0x778] sm:$0xff]   ;;  %v6470_v34 = vld [vmem:[%s9383_s6 + $0x2b] ss:$0 sm:$0xff] }
0x164d   :  { %6929 = vmatprep.subr.bf16.mxu0 %v7334_v59  ;;  %v7378_v9 = vld [vmem:[%s9382_s5 + $0x7f8] sm:$0xff]  }
0x164e   :  { %v7379_v44 = vld [vmem:[%s9382_s5 + $0x738] sm:$0xff]  }
0x164f   :  { %6908 = vmatpush3.bf16.msra.mxu1 %v7335_v27  ;;  %v7380_v56 = vld [vmem:[%s9382_s5 + $0x7b8] sm:$0xff]  }
0x1650   :  { %6930 = vmatpush3.bf16.msra.mxu0 %v7336_v61  ;;  %6909 = vmatprep.subr.bf16.mxu1 %v7337_v62 }
0x1651   :  { %6931 = vmatprep.subr.bf16.mxu0 %v7338_v63 }
0x1653   :  { %6910 = vmatpush3.bf16.msra.mxu1 %v7339_v37 }
0x1654   :  { %6932 = vmatpush3.bf16.msra.mxu0 %v7340_v41  ;;  %6911 = vmatprep.subr.bf16.mxu1 %v7341_v45 }
0x1655   :  { %6933 = vmatprep.subr.bf16.mxu0 %v7342_v51 }
0x1657   :  { %6912 = vmatpush3.bf16.msra.mxu1 %v7343_v53 }
0x1658   :  { %6934 = vmatpush3.bf16.msra.mxu0 %v7344_v0  ;;  %6913 = vmatprep.subr.bf16.mxu1 %v7345_v29 }
0x1659   :  { %6935 = vmatprep.subr.bf16.mxu0 %v7346_v12 }
0x165b   :  { %6914 = vmatpush3.bf16.msra.mxu1 %v7347_v47 }
0x165c   :  { %6936 = vmatpush3.bf16.msra.mxu0 %v7348_v11  ;;  %6943 = vmatprep.subr.bf16.mxu1 %v7349_v13 }
0x165d   :  { %6965 = vmatprep.subr.bf16.mxu0 %v7350_v1 }
0x165e   :  { %5614 = vmatmul.mubr.bf16.vlgmr.msra.gmra.mrb[80].mxu1 %v9140_v2  ;;  %v7357_v2 = vld [vmem:[%s9382_s5 + $0x750] sm:$0xff]  }
0x165f   :  { %5655 = vmatmul.mubr.bf16.vlgmr.msra.gmra.mrb[80].mxu0 %v9142_v30  ;;  %6944 = vmatpush3.bf16.msra.mxu1 %v7351_v5  ;;  %v7358_v30 = vld [vmem:[%s9382_s5 + $0x7d0] sm:$0xff]  }
0x1660   :  { %5695 = vmatprep.mubr.bf16.mxu1 %v4385_v4  ;;  %6966 = vmatpush3.bf16.msra.mxu0 %v7352_v58 }
0x1661   :  { %5736 = vmatprep.mubr.bf16.mxu0 %v4387_v57  ;;  %6945 = vmatprep.subr.bf16.mxu1 %v7353_v24 }
0x1662   :  { %6967 = vmatprep.subr.bf16.mxu0 %v7354_v6 }
0x1663   :  { %6946 = vmatpush3.bf16.msra.mxu1 %v7355_v23 }
0x1664   :  { %6968 = vmatpush3.bf16.msra.mxu0 %v7356_v14  ;;  %6947 = vmatprep.subr.bf16.mxu1 %v7357_v2 }
0x1665   :  { %6969 = vmatprep.subr.bf16.mxu0 %v7358_v30 }
0x1667   :  { %6948 = vmatpush3.bf16.msra.mxu1 %v7359_v15 }
0x1668   :  { %6970 = vmatpush3.bf16.msra.mxu0 %v7360_v7  ;;  %6949 = vmatprep.subr.bf16.mxu1 %v7361_v8 }
0x1669   :  { %6971 = vmatprep.subr.bf16.mxu0 %v7362_v43 }
0x166b   :  { %6950 = vmatpush3.bf16.msra.mxu1 %v7363_v31 }
0x166c   :  { %6972 = vmatpush3.bf16.msra.mxu0 %v7364_v19  ;;  %6951 = vmatprep.subr.bf16.mxu1 %v7365_v17 }
0x166d   :  { %6973 = vmatprep.subr.bf16.mxu0 %v7366_v26 }
0x166f   :  { %6952 = vmatpush3.bf16.msra.mxu1 %v7367_v33 }
0x1670   :  { %6974 = vmatpush3.bf16.msra.mxu0 %v7368_v20  ;;  %6953 = vmatprep.subr.bf16.mxu1 %v7369_v22 }
0x1671   :  { %6975 = vmatprep.subr.bf16.mxu0 %v7370_v21 }
0x1673   :  { %6954 = vmatpush3.bf16.msra.mxu1 %v7371_v42 }
0x1674   :  { %6976 = vmatpush3.bf16.msra.mxu0 %v7372_v18  ;;  %6955 = vmatprep.subr.bf16.mxu1 %v7373_v39 }
0x1675   :  { %6977 = vmatprep.subr.bf16.mxu0 %v7374_v35 }
0x1677   :  { %6956 = vmatpush3.bf16.msra.mxu1 %v7375_v25 }
0x1678   :  { %6978 = vmatpush3.bf16.msra.mxu0 %v7376_v40  ;;  %6957 = vmatprep.subr.bf16.mxu1 %v7377_v32 }
0x1679   :  { %6979 = vmatprep.subr.bf16.mxu0 %v7378_v9 }
0x167b   :  { %6958 = vmatpush3.bf16.msra.mxu1 %v7379_v44 }
0x167c   :  { %6980 = vmatpush3.bf16.msra.mxu0 %v7380_v56 }
0x167e   :  { %5696 = vmatmul.mubr.bf16.vlgmr.msra.gmra.mrb[84].mxu1 %v9202_v3 }
0x167f   :  { %5737 = vmatmul.mubr.bf16.vlgmr.msra.gmra.mrb[84].mxu0 %v9204_v60 }
0x16f1   :  { %v6827_v46 = vpop.f32.mrb[72].mxu1  ;;  %v6849_v48 = vpop.f32.mrb[72].mxu0 }
0x16f2   :  { %v6828_v55 = vpop.f32.mrb[73].mxu1  ;;  %v6850_v49 = vpop.f32.mrb[73].mxu0 }
0x16f3   :  { %v6829_v50 = vadd.f32 %v6828_v55, %v6827_v46  ;;  %v6851_v52 = vadd.f32 %v6850_v49, %v6849_v48  ;;  %v6830_v54 = vpop.f32.mrb[74].mxu1  ;;  %v6852_v10 = vpop.f32.mrb[74].mxu0 }
0x16f4   :  { %v6831_v16 = vpop.f32.mrb[75].mxu1  ;;  %v6853_v28 = vpop.f32.mrb[75].mxu0 }
0x16f5   :  { %v5452_v59 = vadd.f32 %v6829_v50, %v6470_v34  ;;  %v6832_v4 = vadd.f32 %v6831_v16, %v6830_v54  ;;  %v6854_v57 = vadd.f32 %v6853_v28, %v6852_v10 }
0x16f7   :  { %v5493_v3 = vadd.f32 %v6851_v52, %v5452_v59  ;;  %v5455_v27 = vadd.f32 %v6832_v4, %v6470_v34 }
0x16f9   :  { %v5496_v60 = vadd.f32 %v6854_v57, %v5455_v27 }
0x1711   :  { %v6871_v61 = vpop.f32.mrb[76].mxu1  ;;  %v6893_v62 = vpop.f32.mrb[76].mxu0 }
0x1712   :  { %v6872_v63 = vpop.f32.mrb[77].mxu1  ;;  %v6894_v37 = vpop.f32.mrb[77].mxu0 }
0x1713   :  { %v6873_v41 = vadd.f32 %v6872_v63, %v6871_v61  ;;  %v6895_v45 = vadd.f32 %v6894_v37, %v6893_v62  ;;  %v6874_v51 = vpop.f32.mrb[78].mxu1  ;;  %v6896_v53 = vpop.f32.mrb[78].mxu0 }
0x1714   :  { %v6875_v0 = vpop.f32.mrb[79].mxu1  ;;  %v6897_v29 = vpop.f32.mrb[79].mxu0 }
0x1715   :  { %v5534_v12 = vadd.f32 %v6873_v41, %v5493_v3  ;;  %v6876_v47 = vadd.f32 %v6875_v0, %v6874_v51  ;;  %v6898_v11 = vadd.f32 %v6897_v29, %v6896_v53  ;;  %v6600_v0 = vld [vmem:[%s9383_s6 + $0x2f] ss:$0 sm:$0xff] }
0x1717   :  { %v5575_v13 = vadd.f32 %v6895_v45, %v5534_v12  ;;  %v5537_v1 = vadd.f32 %v6876_v47, %v5496_v60  ;;  %v6599_v45 = vld [vmem:[%s9383_s6 + $0x2d] ss:$0 sm:$0xff] }
0x1719   :  { %v5578_v5 = vadd.f32 %v6898_v11, %v5537_v1 }
0x1731   :  { %v6915_v58 = vpop.f32.mrb[80].mxu1 }
0x1732   :  { %v6937_v24 = vpop.f32.mrb[80].mxu0  ;;  %v6916_v6 = vpop.f32.mrb[81].mxu1 }
0x1733   :  { %v6917_v23 = vadd.f32 %v6916_v6, %v6915_v58  ;;  %v6938_v14 = vpop.f32.mrb[81].mxu0  ;;  %v6918_v2 = vpop.f32.mrb[82].mxu1 }
0x1734   :  { %v6939_v30 = vadd.f32 %v6938_v14, %v6937_v24  ;;  %v6940_v15 = vpop.f32.mrb[82].mxu0  ;;  %v6919_v7 = vpop.f32.mrb[83].mxu1 }
0x1735   :  { %v5616_v8 = vadd.f32 %v6917_v23, %v5575_v13  ;;  %v6920_v43 = vadd.f32 %v6919_v7, %v6918_v2  ;;  %v6941_v31 = vpop.f32.mrb[83].mxu0 }
0x1736   :  { %v6942_v19 = vadd.f32 %v6941_v31, %v6940_v15 }
0x1737   :  { %v5657_v17 = vadd.f32 %v6939_v30, %v5616_v8  ;;  %v5619_v26 = vadd.f32 %v6920_v43, %v5578_v5 }
0x1739   :  { %v5660_v33 = vadd.f32 %v6942_v19, %v5619_v26 }
0x1751   :  { %v6959_v20 = vpop.f32.mrb[84].mxu1 }
0x1752   :  { %v6981_v22 = vpop.f32.mrb[84].mxu0  ;;  %v6960_v21 = vpop.f32.mrb[85].mxu1 }
0x1753   :  { %v6961_v42 = vadd.f32 %v6960_v21, %v6959_v20  ;;  %v6982_v18 = vpop.f32.mrb[85].mxu0  ;;  %v6962_v39 = vpop.f32.mrb[86].mxu1 }
0x1754   :  { %v6983_v35 = vadd.f32 %v6982_v18, %v6981_v22  ;;  %v6984_v25 = vpop.f32.mrb[86].mxu0  ;;  %v6963_v40 = vpop.f32.mrb[87].mxu1 }
0x1755   :  { %v5698_v32 = vadd.f32 %v6961_v42, %v5657_v17  ;;  %v6964_v9 = vadd.f32 %v6963_v40, %v6962_v39  ;;  %v6985_v44 = vpop.f32.mrb[87].mxu0 }
0x1756   :  { %v6986_v56 = vadd.f32 %v6985_v44, %v6984_v25 }
0x1757   :  { %v5739_v46 = vadd.f32 %v6983_v35, %v5698_v32  ;;  %v5701_v48 = vadd.f32 %v6964_v9, %v5660_v33 }
0x1759   :  { %v5742_v34 = vadd.f32 %v6986_v56, %v5701_v48  ;;  %v5745_v55 = vadd.f32 %v5739_v46, %v8764_v38 }
0x175b   :  { %v5747_v49 = vsel %vm160_vm10, %v5745_v55, 0.0  ;;  %v5746_v50 = vadd.f32 %v5742_v34, %v8766_v36 }
0x175c   :  { %5748 = vadd.xlane.f32.xlu1 %v5747_v49 }
0x175d   :  { %v5750_v52 = vsel %vm160_vm10, %v5746_v50, 0.0 }
0x175e   :  { %5751 = vadd.xlane.f32.xlu0 %v5750_v52 }
0x17e9   :  { %v5749_v54 = vpop.xlane.xlu1 %5748 }
0x17ea   :  { %v5753_v10 = vmul.f32 0.015625, %v5749_v54 }
0x17eb   :  { %v5752_v16 = vpop.xlane.xlu0 %5751 }
0x17ec   :  { %v5755_v28 = vsub.f32 %v5745_v55, %v5753_v10  ;;  %v5754_v59 = vmul.f32 0.015625, %v5752_v16 }
0x17ee   :  { %v5756_v4 = vsub.f32 %v5746_v50, %v5754_v59  ;;  %v5757_v57 = vmul.f32 %v5755_v28, %v5755_v28 }
0x17f0   :  { %v5759_v3 = vsel %vm160_vm10, %v5757_v57, 0.0  ;;  %v5758_v27 = vmul.f32 %v5756_v4, %v5756_v4 }
0x17f1   :  { %5760 = vadd.xlane.f32.xlu1 %v5759_v3 }
0x17f2   :  { %v5762_v38 = vsel %vm160_vm10, %v5758_v27, 0.0 }
0x17f3   :  { %5763 = vadd.xlane.f32.xlu0 %v5762_v38 }
0x187e   :  { %v5761_v60 = vpop.xlane.xlu1 %5760 }
0x187f   :  { %v5765_v36 = vmul.f32 0.015625, %v5761_v60 }
0x1880   :  { %v5764_v61 = vpop.xlane.xlu0 %5763 }
0x1881   :  { %v5767_v62 = vadd.f32 1e-05, %v5765_v36  ;;  %v5766_v63 = vmul.f32 0.015625, %v5764_v61 }
0x1883   :  { %7433 = vrsqrt.f32 %v5767_v62  ;;  %v5768_v37 = vadd.f32 1e-05, %v5766_v63 }
0x1885   :  { %7435 = vrsqrt.f32 %v5768_v37 }
0x188d   :  { %v7434_v41 = vpop.eup %7433 }
0x188e   :  { %v5771_v51 = vmul.f32 %v7434_v41, %v5755_v28 }
0x188f   :  { %v7436_v53 = vpop.eup %7435 }
0x1890   :  { %v5772_v29 = vmul.f32 %v7436_v53, %v5756_v4  ;;  %v5777_v12 = vmul.f32 %v6599_v45, %v5771_v51 }
0x1892   :  { %v5778_v47 = vmul.f32 %v6599_v45, %v5772_v29  ;;  %v5783_v11 = vadd.f32 %v6600_v0, %v5777_v12 }
0x1894   :  { %v5784_v13 = vadd.f32 %v6600_v0, %v5778_v47  ;;  %5785 = vst.msk [vmem:[#allocation2] sm:$0xff] %vm160_vm10, %v5783_v11 }
0x1896   :  { %5786 = vst.msk [vmem:[#allocation2 + $0x8] sm:$0xff] %vm160_vm10, %v5784_v13 }
0x1897   :  { %7448 = shalt.err (!%p7445_p4)
}
0x1898   :  { %s7449_s2 = scalar_lea.hbm %s9384_s7, 256 }
0x1899   :  { %p7450_p5 = scmp.ne.s32.totalorder %s9384_s7, %s7449_s2  ;;  %p7453_p6 = scmp.lt.u32.totalorder %s7449_s2, %s9384_s7 }
0x189b   :  { %p7455_p7 = pnand %p7453_p6, %p7450_p5 }
0x189d   :  { %7458 = shalt.err (!%p7455_p7)
}
0x189e   :  { %s7466_s22 = smov 128   ;;  %s7467_s23 = smov 8  }
0x189f   :  { %5798 = dma.vmem_to_hbm [thread:$0]  %s5793_s16, 256, %s9384_s7, [#allocation3], %s7466_s22, %s7466_s22, %s7467_s23  }
0x18a0   :  { %7459 = dma.done.wait [#allocation3], 256  }
0x18a1   :  { %7460 = vsyncadd [#allocation3], 4294967040 }
0x18a2   :  { %5802 = vsyncpa [#allocation3], 1 }

</bundles_post_ra>
